<compile_context>
chip_gen: v5e
topology: v5e:2x2
jax: 0.10.0
libtpu: 0.0.40
codegen_flags: <defaults>
</compile_context>

<pallas_src>
import math

import jax
import jax.numpy as jnp
from jax.experimental import pallas as pl
from jax.experimental.pallas import tpu as pltpu


# ----------------------------------------------------------------------------
# VMEM budget: explicit scoped limit (v5e/v6e defaults 16/32 MiB are too small
# for 512-class tiles; v7x has only 64 MiB physical per TensorCore).
# ----------------------------------------------------------------------------

def _vmem_limit_bytes():
    try:
        cap = pltpu.get_tpu_info().vmem_capacity_bytes
        return int(min(64 * 1024 * 1024, (cap * 3) // 4))
    except Exception:
        return 64 * 1024 * 1024


_VMEM_LIMIT = _vmem_limit_bytes()
_VMEM_BUDGET = int(_VMEM_LIMIT * 0.7)   # headroom for Mosaic internal scratch


# ----------------------------------------------------------------------------
# Tiling helpers
# ----------------------------------------------------------------------------

def _tile_and_pad(dim, cap, base):
    """Pick a tile (<= cap) for `dim`.  Returns (tile, padded_dim).
    Tile = full dim (if dim <= cap), an exact divisor that is a multiple of
    `base`, or a base-aligned cap tile with `dim` zero-padded up to a multiple."""
    if dim <= cap:
        return dim, dim
    t = (cap // base) * base
    while t >= base:
        if dim % t == 0:
            return t, dim
        t -= base
    t = (cap // base) * base
    return t, ((dim + t - 1) // t) * t


def _seq_tile(dim, cap, base):
    if dim <= cap:
        return dim
    t = (cap // base) * base
    while t >= base:
        if dim % t == 0:
            return t
        t -= base
    # TODO(synk): pad non-divisible sequence lengths instead of a full-dim block.
    return dim


def _linear_vmem_bytes(tm, tn, tk, has_bias, has_res, has_ln):
    bytes_ = 2 * tm * tk * 2        # x tile  (bf16), double-buffered
    bytes_ += 2 * tk * tn * 2       # w tile  (bf16), double-buffered
    bytes_ += 2 * tm * tn * 2       # out tile (bf16), double-buffered
    bytes_ += tm * tn * 4           # f32 accumulator scratch
    if has_bias:
        bytes_ += 2 * tn * 4
    if has_res:
        bytes_ += 2 * tm * tn * 2
    if has_ln:
        bytes_ += 4 * tn * 4
    return bytes_


def _attn_tiles(Sq, Sk, D, num_heads):
    tq_cap, tk_cap = 256, 256
    while True:
        tq = _seq_tile(Sq, tq_cap, 8)
        tk = _seq_tile(Sk, tk_cap, 128)
        est = (2 * tq * D * 2            # q tile (bf16), double-buffered
               + 2 * 2 * tk * D * 2      # k, v tiles
               + 2 * tq * D * 2          # out tile
               + tq * D * 4              # f32 accumulator scratch
               + 2 * num_heads * max(tq, 8) * 128 * 4   # m/l scratch (lane padded)
               + 2 * (tq + tk) * 128 * 4)               # validity blocks
        if est <= _VMEM_BUDGET or (tq_cap <= 8 and tk_cap <= 128):
            return tq, tk
        if tk_cap > 128:
            tk_cap //= 2
        elif tq_cap > 8:
            tq_cap //= 2
        else:
            return tq, tk


# ----------------------------------------------------------------------------
# Fused tiled linear: y = x @ w (+ bias) (+ GELU) (+ residual, LayerNorm)
#   x:[M,K] bf16/f32, w:[K,N] bf16, b:[1,N] f32, residual:[M,N] bf16/f32,
#   ln=(gamma[1,N], beta[1,N]) f32.   Output dtype bf16 by default.
# ----------------------------------------------------------------------------

def linear_pallas(x, w, b=None, *, gelu=False, residual=None, ln=None,
                  eps=1e-5, out_dtype=jnp.bfloat16):
    M, K = x.shape
    Kw, N = w.shape
    assert K == Kw
    has_bias = b is not None
    has_res = residual is not None
    has_ln = ln is not None

    # --- tile selection (VMEM-budget aware; LN needs the full row in one tile) ---
    if has_ln:
        tn, Np = N, N
    else:
        tn, Np = _tile_and_pad(N, 512, 128)
    tm_cap, tk_cap = 512, 512
    while True:
        tm, Mp = _tile_and_pad(M, tm_cap, 8)
        tk, Kp = _tile_and_pad(K, tk_cap, 128)
        if (_linear_vmem_bytes(tm, tn, tk, has_bias, has_res, has_ln)
                <= _VMEM_BUDGET) or (tm_cap <= 8 and tk_cap <= 128):
            break
        if tm_cap > 8:
            tm_cap //= 2
        else:
            tk_cap //= 2
    if has_ln:
        assert tn == N and Np == N, "LayerNorm epilogue requires an un-tiled row"

    gm, gn, gk = Mp // tm, Np // tn, Kp // tk

    # --- pad operands (zero K-contributions; padded rows/cols sliced away) ---
    xb = x.astype(jnp.bfloat16)
    if (Mp, Kp) != (M, K):
        xb = jnp.pad(xb, ((0, Mp - M), (0, Kp - K)))
    wb = w.astype(jnp.bfloat16)
    if (Kp, Np) != (K, N):
        wb = jnp.pad(wb, ((0, Kp - K), (0, Np - N)))

    args = [xb, wb]
    in_specs = [pl.BlockSpec((tm, tk), lambda i, j, k: (i, k)),
                pl.BlockSpec((tk, tn), lambda i, j, k: (k, j))]
    if has_bias:
        bb = b if Np == N else jnp.pad(b, ((0, 0), (0, Np - N)))
        in_specs.append(pl.BlockSpec((1, tn), lambda i, j, k: (0, j)))
        args.append(bb)
    if has_res:
        rb = residual.astype(jnp.bfloat16)
        if (Mp, Np) != (M, N):
            rb = jnp.pad(rb, ((0, Mp - M), (0, Np - N)))
        in_specs.append(pl.BlockSpec((tm, tn), lambda i, j, k: (i, j)))
        args.append(rb)
    if has_ln:
        gamma, beta = ln
        in_specs.append(pl.BlockSpec((1, tn), lambda i, j, k: (0, j)))
        in_specs.append(pl.BlockSpec((1, tn), lambda i, j, k: (0, j)))
        args.extend([gamma, beta])

    def kernel(*refs):
        refs = list(refs)
        x_ref = refs.pop(0)
        w_ref = refs.pop(0)
        b_ref = refs.pop(0) if has_bias else None
        r_ref = refs.pop(0) if has_res else None
        g_ref = refs.pop(0) if has_ln else None
        beta_ref = refs.pop(0) if has_ln else None
        o_ref = refs.pop(0)
        acc_ref = refs.pop(0)

        kk = pl.program_id(2)

        @pl.when(kk == 0)
        def _():
            acc_ref[...] = jnp.zeros_like(acc_ref)

        # bf16 MXU matmul, f32 accumulation (no per-step VPU cast).
        acc_ref[...] += jnp.dot(x_ref[...], w_ref[...],
                                preferred_element_type=jnp.float32)

        @pl.when(kk == pl.num_programs(2) - 1)
        def _():
            y = acc_ref[...]
            if has_bias:
                y = y + b_ref[...]
            if gelu:
                # exact GELU (matches torch.nn.GELU default, approximate='none')
                y = 0.5 * y * (1.0 + jax.lax.erf(y * (1.0 / math.sqrt(2.0))))
            if has_res:
                y = y + r_ref[...].astype(jnp.float32)
            if has_ln:
                mean = jnp.mean(y, axis=-1, keepdims=True)
                var = jnp.mean(jnp.square(y - mean), axis=-1, keepdims=True)
                y = (y - mean) * jax.lax.rsqrt(var + eps) * g_ref[...] + beta_ref[...]
            o_ref[...] = y.astype(o_ref.dtype)

    bytes_accessed = (Mp * Kp * 2 + Kp * Np * 2 + Mp * Np * 2
                      + (Np * 4 if has_bias else 0)
                      + (Mp * Np * 2 if has_res else 0)
                      + (2 * Np * 4 if has_ln else 0))
    cost = pl.CostEstimate(flops=2 * Mp * Np * Kp,
                           transcendentals=(Mp * Np if gelu else 0),
                           bytes_accessed=bytes_accessed)

    out = pl.pallas_call(
        kernel,
        grid=(gm, gn, gk),
        in_specs=in_specs,
        out_specs=pl.BlockSpec((tm, tn), lambda i, j, k: (i, j)),
        out_shape=jax.ShapeDtypeStruct((Mp, Np), out_dtype),
        scratch_shapes=[pltpu.VMEM((tm, tn), jnp.float32)],
        compiler_params=pltpu.CompilerParams(
            dimension_semantics=("parallel", "parallel", "arbitrary"),
            vmem_limit_bytes=_VMEM_LIMIT),
        cost_estimate=cost,
    )(*args)
    if (Mp, Np) != (M, N):
        out = out[:M, :N]
    return out


# ----------------------------------------------------------------------------
# Flash-attention-style multi-head attention kernel
#   q:[B,Sq,D], k,v:[B,Sk,D]  (bf16);
#   q_valid:[B,Sq,1], k_valid:[B,1,Sk] f32 (1 keep / 0 mask, torch masked_fill).
#   grid = (batch, q-tile, kv-tile);  kv axis = online-softmax reduction.
# ----------------------------------------------------------------------------

def flash_attention_pallas(q, k, v, q_valid, k_valid, *, causal, num_heads):
    B, Sq, D = q.shape
    Sk = k.shape[1]
    assert D % num_heads == 0
    dk = D // num_heads
    scale = 1.0 / math.sqrt(dk)

    tq, tk = _attn_tiles(Sq, Sk, D, num_heads)
    gq, gk = Sq // tq, Sk // tk

    def kernel(q_ref, k_ref, v_ref, qv_ref, kv_ref, o_ref, m_ref, l_ref, acc_ref):
        kv_step = pl.program_id(2)

        @pl.when(kv_step == 0)
        def _():
            m_ref[...] = jnp.full_like(m_ref, -jnp.inf)
            l_ref[...] = jnp.zeros_like(l_ref)
            acc_ref[...] = jnp.zeros_like(acc_ref)

        qb = q_ref[0]                                   # [tq, D] bf16
        kb = k_ref[0]                                   # [tk, D] bf16
        vb = v_ref[0]                                   # [tk, D] bf16

        # mask rebuilt from tiny validity vectors (no [S,S] mask in HBM)
        keep = (kv_ref[0] != 0.0) & (qv_ref[0] != 0.0)  # [tq, tk]
        if causal:
            qpos = pl.program_id(1) * tq + jax.lax.broadcasted_iota(
                jnp.int32, (tq, tk), 0)
            kpos = kv_step * tk + jax.lax.broadcasted_iota(
                jnp.int32, (tq, tk), 1)
            keep = keep & (kpos <= qpos)
        neg = jnp.float32(-1e20)

        for h in range(num_heads):
            lo = h * dk
            s = jax.lax.dot_general(qb[:, lo:lo + dk], kb[:, lo:lo + dk],
                                    (((1,), (1,)), ((), ())),
                                    preferred_element_type=jnp.float32)
            s = jnp.where(keep, s * scale, neg)          # scaled scores, masked_fill
            m_prev = m_ref[h]                            # [tq, 1]
            m_new = jnp.maximum(m_prev, jnp.max(s, axis=-1, keepdims=True))
            alpha = jnp.exp(m_prev - m_new)
            p = jnp.exp(s - m_new)
            l_ref[h] = alpha * l_ref[h] + jnp.sum(p, axis=-1, keepdims=True)
            hs = pl.ds(lo, dk)
            acc_ref[:, hs] = alpha * acc_ref[:, hs] + jnp.dot(
                p.astype(jnp.bfloat16), vb[:, lo:lo + dk],
                preferred_element_type=jnp.float32)
            m_ref[h] = m_new

        @pl.when(kv_step == pl.num_programs(2) - 1)
        def _():
            for h in range(num_heads):
                hs = pl.ds(h * dk, dk)
                acc_ref[:, hs] = acc_ref[:, hs] * pl.reciprocal(l_ref[h], approx=True)
            o_ref[0] = acc_ref[...].astype(o_ref.dtype)

    cost = pl.CostEstimate(
        flops=4 * B * Sq * Sk * D,
        transcendentals=B * num_heads * Sq * Sk,
        bytes_accessed=2 * (2 * B * Sq * D + 2 * B * Sk * D) + 4 * B * (Sq + Sk))

    return pl.pallas_call(
        kernel,
        grid=(B, gq, gk),
        in_specs=[
            pl.BlockSpec((1, tq, D), lambda b, qi, ki: (b, qi, 0)),
            pl.BlockSpec((1, tk, D), lambda b, qi, ki: (b, ki, 0)),
            pl.BlockSpec((1, tk, D), lambda b, qi, ki: (b, ki, 0)),
            pl.BlockSpec((1, tq, 1), lambda b, qi, ki: (b, qi, 0)),
            pl.BlockSpec((1, 1, tk), lambda b, qi, ki: (b, 0, ki)),
        ],
        out_specs=pl.BlockSpec((1, tq, D), lambda b, qi, ki: (b, qi, 0)),
        out_shape=jax.ShapeDtypeStruct((B, Sq, D), jnp.bfloat16),
        scratch_shapes=[pltpu.VMEM((num_heads, tq, 1), jnp.float32),   # m
                        pltpu.VMEM((num_heads, tq, 1), jnp.float32),   # l
                        pltpu.VMEM((tq, D), jnp.float32)],             # acc
        compiler_params=pltpu.CompilerParams(
            dimension_semantics=("parallel", "parallel", "arbitrary"),
            vmem_limit_bytes=_VMEM_LIMIT),
        cost_estimate=cost,
    )(q, k, v, q_valid, k_valid)


# ----------------------------------------------------------------------------
# Model building blocks
# ----------------------------------------------------------------------------

def multi_head_attention(p, q_in, kv_in, q_valid, k_valid, *, causal, num_heads,
                         residual, ln):
    """W_q/W_k/W_v projections -> flash attention -> W_o fused with residual+LN.
    Returns the flat [B*Sq, D] bf16 post-LayerNorm activation."""
    B, Sq, D = q_in.shape
    Sk = kv_in.shape[1]
    q = linear_pallas(q_in.reshape(B * Sq, D), p["wq"]).reshape(B, Sq, D)
    k = linear_pallas(kv_in.reshape(B * Sk, D), p["wk"]).reshape(B, Sk, D)
    v = linear_pallas(kv_in.reshape(B * Sk, D), p["wv"]).reshape(B, Sk, D)
    a = flash_attention_pallas(q, k, v, q_valid, k_valid,
                               causal=causal, num_heads=num_heads)
    return linear_pallas(a.reshape(B * Sq, D), p["wo"], p["bo"],
                         residual=residual, ln=ln)


def encoder_layer_forward(p, x, q_mask, k_mask, num_heads):
    B, S, D = x.shape
    x_flat = x.reshape(B * S, D)
    x1 = multi_head_attention(p["self_attn"], x, x, q_mask, k_mask,
                              causal=False, num_heads=num_heads,
                              residual=x_flat, ln=(p["ln1_g"], p["ln1_b"]))
    f = p["ffn"]
    h = linear_pallas(x1, f["w1"], f["b1"], gelu=True)
    x2 = linear_pallas(h, f["w2"], f["b2"],
                       residual=x1, ln=(p["ln2_g"], p["ln2_b"]))
    return x2.reshape(B, S, D)


def decoder_layer_forward(p, x, enc_out, dec_qmask, dec_kmask,
                          crs_qmask, crs_kmask, num_heads):
    B, St, D = x.shape
    x_flat = x.reshape(B * St, D)
    x1 = multi_head_attention(p["self_attn"], x, x, dec_qmask, dec_kmask,
                              causal=True, num_heads=num_heads,
                              residual=x_flat, ln=(p["ln1_g"], p["ln1_b"]))
    x2 = multi_head_attention(p["cross_attn"], x1.reshape(B, St, D), enc_out,
                              crs_qmask, crs_kmask, causal=False,
                              num_heads=num_heads,
                              residual=x1, ln=(p["ln2_g"], p["ln2_b"]))
    f = p["ffn"]
    h = linear_pallas(x2, f["w1"], f["b1"], gelu=True)
    x3 = linear_pallas(h, f["w2"], f["b2"],
                       residual=x2, ln=(p["ln3_g"], p["ln3_b"]))
    return x3.reshape(B, St, D)


def transformer_forward(params, src, tgt, num_heads):
    B, Ss = src.shape
    _, St = tgt.shape

    # --- compact validity vectors; the full masks are regenerated inside the
    #     attention kernel (no [B,S,S] float32 masks in HBM) ---
    src_valid = (src != 0).astype(jnp.float32)          # [B, Ss]
    tgt_valid = (tgt != 0).astype(jnp.float32)          # [B, St]
    enc_qmask = jnp.ones((B, Ss, 1), jnp.float32)
    enc_kmask = src_valid[:, None, :]                   # key padding
    dec_qmask = tgt_valid[:, :, None]                   # reference quirk: query rows
    dec_kmask = jnp.ones((B, 1, St), jnp.float32)
    crs_qmask = jnp.ones((B, St, 1), jnp.float32)
    crs_kmask = src_valid[:, None, :]

    # --- embeddings + positional encoding (reference quirk: pe sliced by batch);
    #     activations carried between kernels in bf16 ---
    src_x = (params["enc_emb"][src] + params["pe"][:B]).astype(jnp.bfloat16)
    tgt_x = (params["dec_emb"][tgt] + params["pe"][:B]).astype(jnp.bfloat16)

    enc_out = src_x
    for lp in params["enc_layers"]:
        enc_out = encoder_layer_forward(lp, enc_out, enc_qmask, enc_kmask, num_heads)

    dec_out = tgt_x
    for lp in params["dec_layers"]:
        dec_out = decoder_layer_forward(lp, dec_out, enc_out,
                                        dec_qmask, dec_kmask,
                                        crs_qmask, crs_kmask, num_heads)

    D = dec_out.shape[-1]
    logits = linear_pallas(dec_out.reshape(B * St, D), params["fc_w"],
                           params["fc_b"], out_dtype=jnp.float32)
    return logits.reshape(B, St, -1)


# ----------------------------------------------------------------------------
# Deterministic parameter initialization (weights stored bf16, [in, out])
# ----------------------------------------------------------------------------

def _w(key, fan_in, fan_out):
    return (jax.random.normal(key, (fan_in, fan_out), jnp.float32) * 0.02
            ).astype(jnp.bfloat16)


def _bias(key, fan_out):
    return jax.random.normal(key, (1, fan_out), jnp.float32) * 0.02


def _init_mha(key, d_model):
    k = jax.random.split(key, 5)
    return {"wq": _w(k[0], d_model, d_model),            # bias=False (torch)
            "wk": _w(k[1], d_model, d_model),
            "wv": _w(k[2], d_model, d_model),
            "wo": _w(k[3], d_model, d_model),
            "bo": _bias(k[4], d_model)}


def _init_ffn(key, d_model, exp_factor):
    k = jax.random.split(key, 4)
    return {"w1": _w(k[0], d_model, d_model * exp_factor),
            "b1": _bias(k[1], d_model * exp_factor),
            "w2": _w(k[2], d_model * exp_factor, d_model),
            "b2": _bias(k[3], d_model)}


def _ln_params(d_model):
    return jnp.ones((1, d_model), jnp.float32), jnp.zeros((1, d_model), jnp.float32)


def init_transformer(key, src_vocab, tgt_vocab, d_model, num_heads, num_layers,
                     exp_factor, max_seq_length):
    keys = jax.random.split(key, 3 + 2 * num_layers)
    params = {}
    params["enc_emb"] = jax.random.normal(keys[0], (src_vocab, d_model), jnp.float32) * 0.02
    params["dec_emb"] = jax.random.normal(keys[1], (tgt_vocab, d_model), jnp.float32) * 0.02

    # sinusoidal positional-encoding table, shape [max_len, 1, d_model]
    pos = jnp.arange(max_seq_length, dtype=jnp.float32)[:, None]
    div_term = jnp.exp(jnp.arange(0, d_model, 2, dtype=jnp.float32)
                       * (-math.log(10000.0) / d_model))
    pe = jnp.zeros((max_seq_length, 1, d_model), jnp.float32)
    pe = pe.at[:, 0, 0::2].set(jnp.sin(pos * div_term))
    pe = pe.at[:, 0, 1::2].set(jnp.cos(pos * div_term))
    params["pe"] = pe

    enc_layers, dec_layers = [], []
    for i in range(num_layers):
        ek = jax.random.split(keys[2 + i], 2)
        g1, b1 = _ln_params(d_model)
        g2, b2 = _ln_params(d_model)
        enc_layers.append({
            "self_attn": _init_mha(ek[0], d_model),
            "ffn": _init_ffn(ek[1], d_model, exp_factor),
            "ln1_g": g1, "ln1_b": b1, "ln2_g": g2, "ln2_b": b2,
        })
        dkk = jax.random.split(keys[2 + num_layers + i], 3)
        g1, b1 = _ln_params(d_model)
        g2, b2 = _ln_params(d_model)
        g3, b3 = _ln_params(d_model)
        dec_layers.append({
            "self_attn": _init_mha(dkk[0], d_model),
            "cross_attn": _init_mha(dkk[1], d_model),
            "ffn": _init_ffn(dkk[2], d_model, exp_factor),
            "ln1_g": g1, "ln1_b": b1, "ln2_g": g2, "ln2_b": b2,
            "ln3_g": g3, "ln3_b": b3,
        })
    params["enc_layers"] = enc_layers
    params["dec_layers"] = dec_layers

    kfw, kfb = jax.random.split(keys[2 + 2 * num_layers])
    params["fc_w"] = _w(kfw, d_model, tgt_vocab)
    params["fc_b"] = _bias(kfb, tgt_vocab)
    return params


# ----------------------------------------------------------------------------
# Main
# ----------------------------------------------------------------------------

if __name__ == "__main__":
    SRC_VOCAB, TGT_VOCAB = 50, 60
    D_MODEL, NUM_HEADS, NUM_LAYERS = 32, 4, 2
    EXP_FACTOR, MAX_SEQ_LEN = 2, 16
    B, S_SRC, S_TGT = 2, 8, 8

    key = jax.random.PRNGKey(0)
    kp, ks, kt = jax.random.split(key, 3)

    params = init_transformer(kp, SRC_VOCAB, TGT_VOCAB, D_MODEL, NUM_HEADS,
                              NUM_LAYERS, EXP_FACTOR, MAX_SEQ_LEN)

    src = jax.random.randint(ks, (B, S_SRC), 0, SRC_VOCAB, dtype=jnp.int32)
    tgt = jax.random.randint(kt, (B, S_TGT), 0, TGT_VOCAB, dtype=jnp.int32)

    fwd = jax.jit(transformer_forward, static_argnums=(3,))
    out = jax.block_until_ready(fwd(params, src, tgt, NUM_HEADS))

    assert out.shape == (B, S_TGT, TGT_VOCAB), out.shape
    assert bool(jnp.all(jnp.isfinite(out)))
    print("KERNEL_OK")
</pallas_src>

<mosaic_0001>
module attributes {stable_mosaic.version = 11 : i64} {
  func.func @kernel(%arg0: i32, %arg1: i32, %arg2: i32, %arg3: memref<16x32xbf16, #tpu.memory_space<vmem>>, %arg4: memref<32x64xbf16, #tpu.memory_space<vmem>>, %arg5: memref<1x64xf32, #tpu.memory_space<vmem>>, %arg6: memref<16x64xbf16, #tpu.memory_space<vmem>>, %arg7: memref<16x64xf32, #tpu.memory_space<vmem>>) attributes {dimension_semantics = [#tpu.dimension_semantics<parallel>, #tpu.dimension_semantics<parallel>, #tpu.dimension_semantics<arbitrary>], iteration_bounds = array<i64: 1, 1, 1>, scalar_prefetch = 0 : i64, scratch_operands = 1 : i64, tpu.core_type = #tpu.core_type<tc>, window_params = [{transform_indices = @transform_0, window_bounds = array<i64: 16, 32>}, {transform_indices = @transform_1, window_bounds = array<i64: 32, 64>}, {transform_indices = @transform_2, window_bounds = array<i64: 1, 64>}, {transform_indices = @transform_3, window_bounds = array<i64: 16, 64>}]} {
    %c0_i32 = arith.constant 0 : i32
    %0 = arith.cmpi eq, %arg2, %c0_i32 : i32
    %1 = arith.extui %0 : i1 to i32
    %c0_i32_0 = arith.constant 0 : i32
    %2 = arith.cmpi ne, %1, %c0_i32_0 : i32
    scf.if %2 {
      %cst_10 = arith.constant 0.000000e+00 : f32
      %12 = vector.broadcast %cst_10 : f32 to vector<16x64xf32>
      %c0_11 = arith.constant 0 : index
      %c0_12 = arith.constant 0 : index
      %13 = vector.load %arg7[%c0_11, %c0_12] : memref<16x64xf32, #tpu.memory_space<vmem>>, vector<16x64xf32>
      tpu.vector_store %arg7[%c0_11, %c0_12], %12 {strides = array<i32>} : memref<16x64xf32, #tpu.memory_space<vmem>>, vector<16x64xf32>,
    } else {
    }
    %c0 = arith.constant 0 : index
    %c0_1 = arith.constant 0 : index
    %3 = vector.load %arg7[%c0, %c0_1] : memref<16x64xf32, #tpu.memory_space<vmem>>, vector<16x64xf32>
    %c0_2 = arith.constant 0 : index
    %c0_3 = arith.constant 0 : index
    %4 = vector.load %arg3[%c0_2, %c0_3] : memref<16x32xbf16, #tpu.memory_space<vmem>>, vector<16x32xbf16>
    %c0_4 = arith.constant 0 : index
    %c0_5 = arith.constant 0 : index
    %5 = vector.load %arg4[%c0_4, %c0_5] : memref<32x64xbf16, #tpu.memory_space<vmem>>, vector<32x64xbf16>
    %cst = arith.constant dense<0.000000e+00> : vector<16x64xf32>
    %6 = tpu.matmul %4, %5, %cst {dimension_numbers = #tpu.dot_dimension_numbers<[1], [0], [0], [1], [0, 0, 1, 1], [], []>} : vector<16x32xbf16>, vector<32x64xbf16>, vector<16x64xf32> -> vector<16x64xf32>
    %7 = arith.addf %3, %6 : vector<16x64xf32>
    %c0_6 = arith.constant 0 : index
    %c0_7 = arith.constant 0 : index
    %8 = vector.load %arg7[%c0_6, %c0_7] : memref<16x64xf32, #tpu.memory_space<vmem>>, vector<16x64xf32>
    tpu.vector_store %arg7[%c0_6, %c0_7], %7 {strides = array<i32>} : memref<16x64xf32, #tpu.memory_space<vmem>>, vector<16x64xf32>,
    %c0_i32_8 = arith.constant 0 : i32
    %9 = arith.cmpi eq, %arg2, %c0_i32_8 : i32
    %10 = arith.extui %9 : i1 to i32
    %c0_i32_9 = arith.constant 0 : i32
    %11 = arith.cmpi ne, %10, %c0_i32_9 : i32
    scf.if %11 {
      %c0_10 = arith.constant 0 : index
      %c0_11 = arith.constant 0 : index
      %12 = vector.load %arg7[%c0_10, %c0_11] : memref<16x64xf32, #tpu.memory_space<vmem>>, vector<16x64xf32>
      %c0_12 = arith.constant 0 : index
      %c0_13 = arith.constant 0 : index
      %13 = vector.load %arg5[%c0_12, %c0_13] : memref<1x64xf32, #tpu.memory_space<vmem>>, vector<1x64xf32>
      %14 = vector.broadcast %13 : vector<1x64xf32> to vector<16x64xf32>
      %15 = arith.addf %12, %14 : vector<16x64xf32>
      %cst_14 = arith.constant 5.000000e-01 : f32
      %16 = vector.broadcast %cst_14 : f32 to vector<16x64xf32>
      %17 = arith.mulf %16, %15 : vector<16x64xf32>
      %cst_15 = arith.constant 0.707106769 : f32
      %18 = vector.broadcast %cst_15 : f32 to vector<16x64xf32>
      %19 = arith.mulf %15, %18 : vector<16x64xf32>
      %20 = math.erf %19 : vector<16x64xf32>
      %cst_16 = arith.constant 1.000000e+00 : f32
      %21 = vector.broadcast %cst_16 : f32 to vector<16x64xf32>
      %22 = arith.addf %21, %20 : vector<16x64xf32>
      %23 = arith.mulf %17, %22 : vector<16x64xf32>
      %24 = arith.truncf %23 : vector<16x64xf32> to vector<16x64xbf16>
      %c0_17 = arith.constant 0 : index
      %c0_18 = arith.constant 0 : index
      %25 = vector.load %arg6[%c0_17, %c0_18] : memref<16x64xbf16, #tpu.memory_space<vmem>>, vector<16x64xbf16>
      tpu.vector_store %arg6[%c0_17, %c0_18], %24 {strides = array<i32>} : memref<16x64xbf16, #tpu.memory_space<vmem>>, vector<16x64xbf16>,
    } else {
    }
    return
  }
  func.func @transform_0(%arg0: i32, %arg1: i32, %arg2: i32) -> (i32, i32) {
    %c0_i32 = arith.constant 0 : i32
    return %arg0, %arg2 : i32, i32
  }
  func.func @transform_1(%arg0: i32, %arg1: i32, %arg2: i32) -> (i32, i32) {
    %c0_i32 = arith.constant 0 : i32
    return %arg2, %arg1 : i32, i32
  }
  func.func @transform_2(%arg0: i32, %arg1: i32, %arg2: i32) -> (i32, i32) {
    %c0_i32 = arith.constant 0 : i32
    %c0_i32_0 = arith.constant 0 : i32
    return %c0_i32, %arg1 : i32, i32
  }
  func.func @transform_3(%arg0: i32, %arg1: i32, %arg2: i32) -> (i32, i32) {
    %c0_i32 = arith.constant 0 : i32
    return %arg0, %arg1 : i32, i32
  }
}

module attributes {stable_mosaic.version = 11 : i64} {
  func.func @kernel(%arg0: i32, %arg1: i32, %arg2: i32, %arg3: memref<16x32xbf16, #tpu.memory_space<vmem>>, %arg4: memref<32x32xbf16, #tpu.memory_space<vmem>>, %arg5: memref<16x32xbf16, #tpu.memory_space<vmem>>, %arg6: memref<16x32xf32, #tpu.memory_space<vmem>>) attributes {dimension_semantics = [#tpu.dimension_semantics<parallel>, #tpu.dimension_semantics<parallel>, #tpu.dimension_semantics<arbitrary>], iteration_bounds = array<i64: 1, 1, 1>, scalar_prefetch = 0 : i64, scratch_operands = 1 : i64, tpu.core_type = #tpu.core_type<tc>, window_params = [{transform_indices = @transform_0, window_bounds = array<i64: 16, 32>}, {transform_indices = @transform_1, window_bounds = array<i64: 32, 32>}, {transform_indices = @transform_2, window_bounds = array<i64: 16, 32>}]} {
    %c0_i32 = arith.constant 0 : i32
    %0 = arith.cmpi eq, %arg2, %c0_i32 : i32
    %1 = arith.extui %0 : i1 to i32
    %c0_i32_0 = arith.constant 0 : i32
    %2 = arith.cmpi ne, %1, %c0_i32_0 : i32
    scf.if %2 {
      %cst_10 = arith.constant 0.000000e+00 : f32
      %12 = vector.broadcast %cst_10 : f32 to vector<16x32xf32>
      %c0_11 = arith.constant 0 : index
      %c0_12 = arith.constant 0 : index
      %13 = vector.load %arg6[%c0_11, %c0_12] : memref<16x32xf32, #tpu.memory_space<vmem>>, vector<16x32xf32>
      tpu.vector_store %arg6[%c0_11, %c0_12], %12 {strides = array<i32>} : memref<16x32xf32, #tpu.memory_space<vmem>>, vector<16x32xf32>,
    } else {
    }
    %c0 = arith.constant 0 : index
    %c0_1 = arith.constant 0 : index
    %3 = vector.load %arg6[%c0, %c0_1] : memref<16x32xf32, #tpu.memory_space<vmem>>, vector<16x32xf32>
    %c0_2 = arith.constant 0 : index
    %c0_3 = arith.constant 0 : index
    %4 = vector.load %arg3[%c0_2, %c0_3] : memref<16x32xbf16, #tpu.memory_space<vmem>>, vector<16x32xbf16>
    %c0_4 = arith.constant 0 : index
    %c0_5 = arith.constant 0 : index
    %5 = vector.load %arg4[%c0_4, %c0_5] : memref<32x32xbf16, #tpu.memory_space<vmem>>, vector<32x32xbf16>
    %cst = arith.constant dense<0.000000e+00> : vector<16x32xf32>
    %6 = tpu.matmul %4, %5, %cst {dimension_numbers = #tpu.dot_dimension_numbers<[1], [0], [0], [1], [0, 0, 1, 1], [], []>} : vector<16x32xbf16>, vector<32x32xbf16>, vector<16x32xf32> -> vector<16x32xf32>
    %7 = arith.addf %3, %6 : vector<16x32xf32>
    %c0_6 = arith.constant 0 : index
    %c0_7 = arith.constant 0 : index
    %8 = vector.load %arg6[%c0_6, %c0_7] : memref<16x32xf32, #tpu.memory_space<vmem>>, vector<16x32xf32>
    tpu.vector_store %arg6[%c0_6, %c0_7], %7 {strides = array<i32>} : memref<16x32xf32, #tpu.memory_space<vmem>>, vector<16x32xf32>,
    %c0_i32_8 = arith.constant 0 : i32
    %9 = arith.cmpi eq, %arg2, %c0_i32_8 : i32
    %10 = arith.extui %9 : i1 to i32
    %c0_i32_9 = arith.constant 0 : i32
    %11 = arith.cmpi ne, %10, %c0_i32_9 : i32
    scf.if %11 {
      %c0_10 = arith.constant 0 : index
      %c0_11 = arith.constant 0 : index
      %12 = vector.load %arg6[%c0_10, %c0_11] : memref<16x32xf32, #tpu.memory_space<vmem>>, vector<16x32xf32>
      %13 = arith.truncf %12 : vector<16x32xf32> to vector<16x32xbf16>
      %c0_12 = arith.constant 0 : index
      %c0_13 = arith.constant 0 : index
      %14 = vector.load %arg5[%c0_12, %c0_13] : memref<16x32xbf16, #tpu.memory_space<vmem>>, vector<16x32xbf16>
      tpu.vector_store %arg5[%c0_12, %c0_13], %13 {strides = array<i32>} : memref<16x32xbf16, #tpu.memory_space<vmem>>, vector<16x32xbf16>,
    } else {
    }
    return
  }
  func.func @transform_0(%arg0: i32, %arg1: i32, %arg2: i32) -> (i32, i32) {
    %c0_i32 = arith.constant 0 : i32
    return %arg0, %arg2 : i32, i32
  }
  func.func @transform_1(%arg0: i32, %arg1: i32, %arg2: i32) -> (i32, i32) {
    %c0_i32 = arith.constant 0 : i32
    return %arg2, %arg1 : i32, i32
  }
  func.func @transform_2(%arg0: i32, %arg1: i32, %arg2: i32) -> (i32, i32) {
    %c0_i32 = arith.constant 0 : i32
    return %arg0, %arg1 : i32, i32
  }
}

module attributes {stable_mosaic.version = 11 : i64} {
  func.func @kernel(%arg0: i32, %arg1: i32, %arg2: i32, %arg3: memref<16x32xbf16, #tpu.memory_space<vmem>>, %arg4: memref<32x32xbf16, #tpu.memory_space<vmem>>, %arg5: memref<1x32xf32, #tpu.memory_space<vmem>>, %arg6: memref<16x32xbf16, #tpu.memory_space<vmem>>, %arg7: memref<1x32xf32, #tpu.memory_space<vmem>>, %arg8: memref<1x32xf32, #tpu.memory_space<vmem>>, %arg9: memref<16x32xbf16, #tpu.memory_space<vmem>>, %arg10: memref<16x32xf32, #tpu.memory_space<vmem>>) attributes {dimension_semantics = [#tpu.dimension_semantics<parallel>, #tpu.dimension_semantics<parallel>, #tpu.dimension_semantics<arbitrary>], iteration_bounds = array<i64: 1, 1, 1>, scalar_prefetch = 0 : i64, scratch_operands = 1 : i64, tpu.core_type = #tpu.core_type<tc>, window_params = [{transform_indices = @transform_0, window_bounds = array<i64: 16, 32>}, {transform_indices = @transform_1, window_bounds = array<i64: 32, 32>}, {transform_indices = @transform_2, window_bounds = array<i64: 1, 32>}, {transform_indices = @transform_3, window_bounds = array<i64: 16, 32>}, {transform_indices = @transform_4, window_bounds = array<i64: 1, 32>}, {transform_indices = @transform_5, window_bounds = array<i64: 1, 32>}, {transform_indices = @transform_6, window_bounds = array<i64: 16, 32>}]} {
    %c0_i32 = arith.constant 0 : i32
    %0 = arith.cmpi eq, %arg2, %c0_i32 : i32
    %1 = arith.extui %0 : i1 to i32
    %c0_i32_0 = arith.constant 0 : i32
    %2 = arith.cmpi ne, %1, %c0_i32_0 : i32
    scf.if %2 {
      %cst_10 = arith.constant 0.000000e+00 : f32
      %12 = vector.broadcast %cst_10 : f32 to vector<16x32xf32>
      %c0_11 = arith.constant 0 : index
      %c0_12 = arith.constant 0 : index
      %13 = vector.load %arg10[%c0_11, %c0_12] : memref<16x32xf32, #tpu.memory_space<vmem>>, vector<16x32xf32>
      tpu.vector_store %arg10[%c0_11, %c0_12], %12 {strides = array<i32>} : memref<16x32xf32, #tpu.memory_space<vmem>>, vector<16x32xf32>,
    } else {
    }
    %c0 = arith.constant 0 : index
    %c0_1 = arith.constant 0 : index
    %3 = vector.load %arg10[%c0, %c0_1] : memref<16x32xf32, #tpu.memory_space<vmem>>, vector<16x32xf32>
    %c0_2 = arith.constant 0 : index
    %c0_3 = arith.constant 0 : index
    %4 = vector.load %arg3[%c0_2, %c0_3] : memref<16x32xbf16, #tpu.memory_space<vmem>>, vector<16x32xbf16>
    %c0_4 = arith.constant 0 : index
    %c0_5 = arith.constant 0 : index
    %5 = vector.load %arg4[%c0_4, %c0_5] : memref<32x32xbf16, #tpu.memory_space<vmem>>, vector<32x32xbf16>
    %cst = arith.constant dense<0.000000e+00> : vector<16x32xf32>
    %6 = tpu.matmul %4, %5, %cst {dimension_numbers = #tpu.dot_dimension_numbers<[1], [0], [0], [1], [0, 0, 1, 1], [], []>} : vector<16x32xbf16>, vector<32x32xbf16>, vector<16x32xf32> -> vector<16x32xf32>
    %7 = arith.addf %3, %6 : vector<16x32xf32>
    %c0_6 = arith.constant 0 : index
    %c0_7 = arith.constant 0 : index
    %8 = vector.load %arg10[%c0_6, %c0_7] : memref<16x32xf32, #tpu.memory_space<vmem>>, vector<16x32xf32>
    tpu.vector_store %arg10[%c0_6, %c0_7], %7 {strides = array<i32>} : memref<16x32xf32, #tpu.memory_space<vmem>>, vector<16x32xf32>,
    %c0_i32_8 = arith.constant 0 : i32
    %9 = arith.cmpi eq, %arg2, %c0_i32_8 : i32
    %10 = arith.extui %9 : i1 to i32
    %c0_i32_9 = arith.constant 0 : i32
    %11 = arith.cmpi ne, %10, %c0_i32_9 : i32
    scf.if %11 {
      %c0_10 = arith.constant 0 : index
      %c0_11 = arith.constant 0 : index
      %12 = vector.load %arg10[%c0_10, %c0_11] : memref<16x32xf32, #tpu.memory_space<vmem>>, vector<16x32xf32>
      %c0_12 = arith.constant 0 : index
      %c0_13 = arith.constant 0 : index
      %13 = vector.load %arg5[%c0_12, %c0_13] : memref<1x32xf32, #tpu.memory_space<vmem>>, vector<1x32xf32>
      %14 = vector.broadcast %13 : vector<1x32xf32> to vector<16x32xf32>
      %15 = arith.addf %12, %14 : vector<16x32xf32>
      %c0_14 = arith.constant 0 : index
      %c0_15 = arith.constant 0 : index
      %16 = vector.load %arg6[%c0_14, %c0_15] : memref<16x32xbf16, #tpu.memory_space<vmem>>, vector<16x32xbf16>
      %17 = arith.extf %16 : vector<16x32xbf16> to vector<16x32xf32>
      %18 = arith.addf %15, %17 : vector<16x32xf32>
      %cst_16 = arith.constant dense<0.000000e+00> : vector<16xf32>
      %19 = vector.multi_reduction <add>, %18, %cst_16 [1] : vector<16x32xf32> to vector<16xf32>
      %20 = vector.shape_cast %19 : vector<16xf32> to vector<16x1xf32>
      %cst_17 = arith.constant 3.200000e+01 : f32
      %21 = vector.broadcast %cst_17 : f32 to vector<16x1xf32>
      %22 = arith.divf %20, %21 : vector<16x1xf32>
      %23 = vector.broadcast %22 : vector<16x1xf32> to vector<16x32xf32>
      %24 = arith.subf %18, %23 : vector<16x32xf32>
      %25 = arith.mulf %24, %24 : vector<16x32xf32>
      %cst_18 = arith.constant dense<0.000000e+00> : vector<16xf32>
      %26 = vector.multi_reduction <add>, %25, %cst_18 [1] : vector<16x32xf32> to vector<16xf32>
      %27 = vector.shape_cast %26 : vector<16xf32> to vector<16x1xf32>
      %cst_19 = arith.constant 3.200000e+01 : f32
      %28 = vector.broadcast %cst_19 : f32 to vector<16x1xf32>
      %29 = arith.divf %27, %28 : vector<16x1xf32>
      %30 = vector.broadcast %22 : vector<16x1xf32> to vector<16x32xf32>
      %31 = arith.subf %18, %30 : vector<16x32xf32>
      %cst_20 = arith.constant 9.99999974E-6 : f32
      %32 = vector.broadcast %cst_20 : f32 to vector<16x1xf32>
      %33 = arith.addf %29, %32 : vector<16x1xf32>
      %34 = math.rsqrt %33 : vector<16x1xf32>
      %35 = vector.broadcast %34 : vector<16x1xf32> to vector<16x32xf32>
      %36 = arith.mulf %31, %35 : vector<16x32xf32>
      %c0_21 = arith.constant 0 : index
      %c0_22 = arith.constant 0 : index
      %37 = vector.load %arg7[%c0_21, %c0_22] : memref<1x32xf32, #tpu.memory_space<vmem>>, vector<1x32xf32>
      %38 = vector.broadcast %37 : vector<1x32xf32> to vector<16x32xf32>
      %39 = arith.mulf %36, %38 : vector<16x32xf32>
      %c0_23 = arith.constant 0 : index
      %c0_24 = arith.constant 0 : index
      %40 = vector.load %arg8[%c0_23, %c0_24] : memref<1x32xf32, #tpu.memory_space<vmem>>, vector<1x32xf32>
      %41 = vector.broadcast %40 : vector<1x32xf32> to vector<16x32xf32>
      %42 = arith.addf %39, %41 : vector<16x32xf32>
      %43 = arith.truncf %42 : vector<16x32xf32> to vector<16x32xbf16>
      %c0_25 = arith.constant 0 : index
      %c0_26 = arith.constant 0 : index
      %44 = vector.load %arg9[%c0_25, %c0_26] : memref<16x32xbf16, #tpu.memory_space<vmem>>, vector<16x32xbf16>
      tpu.vector_store %arg9[%c0_25, %c0_26], %43 {strides = array<i32>} : memref<16x32xbf16, #tpu.memory_space<vmem>>, vector<16x32xbf16>,
    } else {
    }
    return
  }
  func.func @transform_0(%arg0: i32, %arg1: i32, %arg2: i32) -> (i32, i32) {
    %c0_i32 = arith.constant 0 : i32
    return %arg0, %arg2 : i32, i32
  }
  func.func @transform_1(%arg0: i32, %arg1: i32, %arg2: i32) -> (i32, i32) {
    %c0_i32 = arith.constant 0 : i32
    return %arg2, %arg1 : i32, i32
  }
  func.func @transform_2(%arg0: i32, %arg1: i32, %arg2: i32) -> (i32, i32) {
    %c0_i32 = arith.constant 0 : i32
    %c0_i32_0 = arith.constant 0 : i32
    return %c0_i32, %arg1 : i32, i32
  }
  func.func @transform_3(%arg0: i32, %arg1: i32, %arg2: i32) -> (i32, i32) {
    %c0_i32 = arith.constant 0 : i32
    return %arg0, %arg1 : i32, i32
  }
  func.func @transform_4(%arg0: i32, %arg1: i32, %arg2: i32) -> (i32, i32) {
    %c0_i32 = arith.constant 0 : i32
    %c0_i32_0 = arith.constant 0 : i32
    return %c0_i32, %arg1 : i32, i32
  }
  func.func @transform_5(%arg0: i32, %arg1: i32, %arg2: i32) -> (i32, i32) {
    %c0_i32 = arith.constant 0 : i32
    %c0_i32_0 = arith.constant 0 : i32
    return %c0_i32, %arg1 : i32, i32
  }
  func.func @transform_6(%arg0: i32, %arg1: i32, %arg2: i32) -> (i32, i32) {
    %c0_i32 = arith.constant 0 : i32
    return %arg0, %arg1 : i32, i32
  }
}

module attributes {stable_mosaic.version = 11 : i64} {
  func.func @kernel(%arg0: i32, %arg1: i32, %arg2: i32, %arg3: memref<1x8x32xbf16, #tpu.memory_space<vmem>>, %arg4: memref<1x8x32xbf16, #tpu.memory_space<vmem>>, %arg5: memref<1x8x32xbf16, #tpu.memory_space<vmem>>, %arg6: memref<1x8x1xf32, #tpu.memory_space<vmem>>, %arg7: memref<1x1x8xf32, #tpu.memory_space<vmem>>, %arg8: memref<1x8x32xbf16, #tpu.memory_space<vmem>>, %arg9: memref<4x8x1xf32, #tpu.memory_space<vmem>>, %arg10: memref<4x8x1xf32, #tpu.memory_space<vmem>>, %arg11: memref<8x32xf32, #tpu.memory_space<vmem>>) attributes {dimension_semantics = [#tpu.dimension_semantics<parallel>, #tpu.dimension_semantics<parallel>, #tpu.dimension_semantics<arbitrary>], iteration_bounds = array<i64: 2, 1, 1>, scalar_prefetch = 0 : i64, scratch_operands = 3 : i64, tpu.core_type = #tpu.core_type<tc>, window_params = [{transform_indices = @transform_0, window_bounds = array<i64: 1, 8, 32>}, {transform_indices = @transform_1, window_bounds = array<i64: 1, 8, 32>}, {transform_indices = @transform_2, window_bounds = array<i64: 1, 8, 32>}, {transform_indices = @transform_3, window_bounds = array<i64: 1, 8, 1>}, {transform_indices = @transform_4, window_bounds = array<i64: 1, 1, 8>}, {transform_indices = @transform_5, window_bounds = array<i64: 1, 8, 32>}]} {
    %c0_i32 = arith.constant 0 : i32
    %0 = arith.cmpi eq, %arg2, %c0_i32 : i32
    %1 = arith.extui %0 : i1 to i32
    %c0_i32_0 = arith.constant 0 : i32
    %2 = arith.cmpi ne, %1, %c0_i32_0 : i32
    scf.if %2 {
      %cst_100 = arith.constant 0xFF800000 : f32
      %171 = vector.broadcast %cst_100 : f32 to vector<4x8x1xf32>
      %c0_101 = arith.constant 0 : index
      %c0_102 = arith.constant 0 : index
      %c0_103 = arith.constant 0 : index
      %172 = vector.load %arg9[%c0_101, %c0_102, %c0_103] : memref<4x8x1xf32, #tpu.memory_space<vmem>>, vector<4x8x1xf32>
      tpu.vector_store %arg9[%c0_101, %c0_102, %c0_103], %171 {strides = array<i32>} : memref<4x8x1xf32, #tpu.memory_space<vmem>>, vector<4x8x1xf32>,
      %cst_104 = arith.constant 0.000000e+00 : f32
      %173 = vector.broadcast %cst_104 : f32 to vector<4x8x1xf32>
      %c0_105 = arith.constant 0 : index
      %c0_106 = arith.constant 0 : index
      %c0_107 = arith.constant 0 : index
      %174 = vector.load %arg10[%c0_105, %c0_106, %c0_107] : memref<4x8x1xf32, #tpu.memory_space<vmem>>, vector<4x8x1xf32>
      tpu.vector_store %arg10[%c0_105, %c0_106, %c0_107], %173 {strides = array<i32>} : memref<4x8x1xf32, #tpu.memory_space<vmem>>, vector<4x8x1xf32>,
      %cst_108 = arith.constant 0.000000e+00 : f32
      %175 = vector.broadcast %cst_108 : f32 to vector<8x32xf32>
      %c0_109 = arith.constant 0 : index
      %c0_110 = arith.constant 0 : index
      %176 = vector.load %arg11[%c0_109, %c0_110] : memref<8x32xf32, #tpu.memory_space<vmem>>, vector<8x32xf32>
      tpu.vector_store %arg11[%c0_109, %c0_110], %175 {strides = array<i32>} : memref<8x32xf32, #tpu.memory_space<vmem>>, vector<8x32xf32>,
    } else {
    }
    %c0 = arith.constant 0 : index
    %c0_1 = arith.constant 0 : index
    %c0_2 = arith.constant 0 : index
    %3 = vector.load %arg3[%c0, %c0_1, %c0_2] : memref<1x8x32xbf16, #tpu.memory_space<vmem>>, vector<1x8x32xbf16>
    %4 = vector.shape_cast %3 : vector<1x8x32xbf16> to vector<8x32xbf16>
    %c0_3 = arith.constant 0 : index
    %c0_4 = arith.constant 0 : index
    %c0_5 = arith.constant 0 : index
    %5 = vector.load %arg4[%c0_3, %c0_4, %c0_5] : memref<1x8x32xbf16, #tpu.memory_space<vmem>>, vector<1x8x32xbf16>
    %6 = vector.shape_cast %5 : vector<1x8x32xbf16> to vector<8x32xbf16>
    %c0_6 = arith.constant 0 : index
    %c0_7 = arith.constant 0 : index
    %c0_8 = arith.constant 0 : index
    %7 = vector.load %arg5[%c0_6, %c0_7, %c0_8] : memref<1x8x32xbf16, #tpu.memory_space<vmem>>, vector<1x8x32xbf16>
    %8 = vector.shape_cast %7 : vector<1x8x32xbf16> to vector<8x32xbf16>
    %c0_9 = arith.constant 0 : index
    %c0_10 = arith.constant 0 : index
    %c0_11 = arith.constant 0 : index
    %9 = vector.load %arg7[%c0_9, %c0_10, %c0_11] : memref<1x1x8xf32, #tpu.memory_space<vmem>>, vector<1x1x8xf32>
    %10 = vector.shape_cast %9 : vector<1x1x8xf32> to vector<1x8xf32>
    %cst = arith.constant 0.000000e+00 : f32
    %11 = vector.broadcast %cst : f32 to vector<1x8xf32>
    %12 = arith.cmpf one, %10, %11 : vector<1x8xf32>
    %c0_12 = arith.constant 0 : index
    %c0_13 = arith.constant 0 : index
    %c0_14 = arith.constant 0 : index
    %13 = vector.load %arg6[%c0_12, %c0_13, %c0_14] : memref<1x8x1xf32, #tpu.memory_space<vmem>>, vector<1x8x1xf32>
    %14 = vector.shape_cast %13 : vector<1x8x1xf32> to vector<8x1xf32>
    %cst_15 = arith.constant 0.000000e+00 : f32
    %15 = vector.broadcast %cst_15 : f32 to vector<8x1xf32>
    %16 = arith.cmpf one, %14, %15 : vector<8x1xf32>
    %17 = vector.broadcast %12 : vector<1x8xi1> to vector<8x8xi1>
    %18 = vector.broadcast %16 : vector<8x1xi1> to vector<8x8xi1>
    %19 = arith.andi %17, %18 : vector<8x8xi1>
    %20 = vector.extract_strided_slice %4 {offsets = [0, 0], sizes = [8, 8], strides = [1, 1]} : vector<8x32xbf16> to vector<8x8xbf16>
    %21 = vector.extract_strided_slice %6 {offsets = [0, 0], sizes = [8, 8], strides = [1, 1]} : vector<8x32xbf16> to vector<8x8xbf16>
    %cst_16 = arith.constant dense<0.000000e+00> : vector<8x8xf32>
    %22 = tpu.matmul %20, %21, %cst_16 {dimension_numbers = #tpu.dot_dimension_numbers<[1], [1], [0], [0], [0, 0, 1, 0], [], []>} : vector<8x8xbf16>, vector<8x8xbf16>, vector<8x8xf32> -> vector<8x8xf32>
    %cst_17 = arith.constant 0.353553385 : f32
    %23 = vector.broadcast %cst_17 : f32 to vector<8x8xf32>
    %24 = arith.mulf %22, %23 : vector<8x8xf32>
    %cst_18 = arith.constant -1.000000e+20 : f32
    %25 = vector.broadcast %cst_18 : f32 to vector<8x8xf32>
    %26 = arith.select %19, %24, %25 : vector<8x8xi1>, vector<8x8xf32>
    %c0_19 = arith.constant 0 : index
    %c0_20 = arith.constant 0 : index
    %c0_21 = arith.constant 0 : index
    %27 = vector.load %arg9[%c0_19, %c0_20, %c0_21] : memref<4x8x1xf32, #tpu.memory_space<vmem>>, vector<1x8x1xf32>
    %28 = vector.shape_cast %27 : vector<1x8x1xf32> to vector<8x1xf32>
    %cst_22 = arith.constant dense<0xFF800000> : vector<8xf32>
    %29 = vector.multi_reduction <maximumf>, %26, %cst_22 [1] : vector<8x8xf32> to vector<8xf32>
    %30 = vector.shape_cast %29 : vector<8xf32> to vector<8x1xf32>
    %31 = arith.maximumf %28, %30 : vector<8x1xf32>
    %32 = arith.subf %28, %31 : vector<8x1xf32>
    %33 = math.exp %32 : vector<8x1xf32>
    %34 = vector.broadcast %31 : vector<8x1xf32> to vector<8x8xf32>
    %35 = arith.subf %26, %34 : vector<8x8xf32>
    %36 = math.exp %35 : vector<8x8xf32>
    %c0_23 = arith.constant 0 : index
    %c0_24 = arith.constant 0 : index
    %c0_25 = arith.constant 0 : index
    %37 = vector.load %arg10[%c0_23, %c0_24, %c0_25] : memref<4x8x1xf32, #tpu.memory_space<vmem>>, vector<1x8x1xf32>
    %38 = vector.shape_cast %37 : vector<1x8x1xf32> to vector<8x1xf32>
    %39 = arith.mulf %33, %38 : vector<8x1xf32>
    %cst_26 = arith.constant dense<0.000000e+00> : vector<8xf32>
    %40 = vector.multi_reduction <add>, %36, %cst_26 [1] : vector<8x8xf32> to vector<8xf32>
    %41 = vector.shape_cast %40 : vector<8xf32> to vector<8x1xf32>
    %42 = arith.addf %39, %41 : vector<8x1xf32>
    %c0_27 = arith.constant 0 : index
    %c0_28 = arith.constant 0 : index
    %c0_29 = arith.constant 0 : index
    %43 = vector.load %arg10[%c0_27, %c0_28, %c0_29] : memref<4x8x1xf32, #tpu.memory_space<vmem>>, vector<1x8x1xf32>
    %44 = vector.shape_cast %43 : vector<1x8x1xf32> to vector<8x1xf32>
    %45 = vector.shape_cast %42 : vector<8x1xf32> to vector<1x8x1xf32>
    tpu.vector_store %arg10[%c0_27, %c0_28, %c0_29], %45 {strides = array<i32>} : memref<4x8x1xf32, #tpu.memory_space<vmem>>, vector<1x8x1xf32>,
    %c0_30 = arith.constant 0 : index
    %c0_31 = arith.constant 0 : index
    %46 = vector.load %arg11[%c0_30, %c0_31] : memref<8x32xf32, #tpu.memory_space<vmem>>, vector<8x8xf32>
    %47 = vector.broadcast %33 : vector<8x1xf32> to vector<8x8xf32>
    %48 = arith.mulf %47, %46 : vector<8x8xf32>
    %49 = arith.truncf %36 : vector<8x8xf32> to vector<8x8xbf16>
    %50 = vector.extract_strided_slice %8 {offsets = [0, 0], sizes = [8, 8], strides = [1, 1]} : vector<8x32xbf16> to vector<8x8xbf16>
    %cst_32 = arith.constant dense<0.000000e+00> : vector<8x8xf32>
    %51 = tpu.matmul %49, %50, %cst_32 {dimension_numbers = #tpu.dot_dimension_numbers<[1], [0], [0], [1], [0, 0, 1, 1], [], []>} : vector<8x8xbf16>, vector<8x8xbf16>, vector<8x8xf32> -> vector<8x8xf32>
    %52 = arith.addf %48, %51 : vector<8x8xf32>
    %c0_33 = arith.constant 0 : index
    %c0_34 = arith.constant 0 : index
    %53 = vector.load %arg11[%c0_33, %c0_34] : memref<8x32xf32, #tpu.memory_space<vmem>>, vector<8x8xf32>
    tpu.vector_store %arg11[%c0_33, %c0_34], %52 {strides = array<i32>} : memref<8x32xf32, #tpu.memory_space<vmem>>, vector<8x8xf32>,
    %c0_35 = arith.constant 0 : index
    %c0_36 = arith.constant 0 : index
    %c0_37 = arith.constant 0 : index
    %54 = vector.load %arg9[%c0_35, %c0_36, %c0_37] : memref<4x8x1xf32, #tpu.memory_space<vmem>>, vector<1x8x1xf32>
    %55 = vector.shape_cast %54 : vector<1x8x1xf32> to vector<8x1xf32>
    %56 = vector.shape_cast %31 : vector<8x1xf32> to vector<1x8x1xf32>
    tpu.vector_store %arg9[%c0_35, %c0_36, %c0_37], %56 {strides = array<i32>} : memref<4x8x1xf32, #tpu.memory_space<vmem>>, vector<1x8x1xf32>,
    %57 = vector.extract_strided_slice %4 {offsets = [0, 8], sizes = [8, 8], strides = [1, 1]} : vector<8x32xbf16> to vector<8x8xbf16>
    %58 = vector.extract_strided_slice %6 {offsets = [0, 8], sizes = [8, 8], strides = [1, 1]} : vector<8x32xbf16> to vector<8x8xbf16>
    %cst_38 = arith.constant dense<0.000000e+00> : vector<8x8xf32>
    %59 = tpu.matmul %57, %58, %cst_38 {dimension_numbers = #tpu.dot_dimension_numbers<[1], [1], [0], [0], [0, 0, 1, 0], [], []>} : vector<8x8xbf16>, vector<8x8xbf16>, vector<8x8xf32> -> vector<8x8xf32>
    %cst_39 = arith.constant 0.353553385 : f32
    %60 = vector.broadcast %cst_39 : f32 to vector<8x8xf32>
    %61 = arith.mulf %59, %60 : vector<8x8xf32>
    %cst_40 = arith.constant -1.000000e+20 : f32
    %62 = vector.broadcast %cst_40 : f32 to vector<8x8xf32>
    %63 = arith.select %19, %61, %62 : vector<8x8xi1>, vector<8x8xf32>
    %c1 = arith.constant 1 : index
    %c0_41 = arith.constant 0 : index
    %c0_42 = arith.constant 0 : index
    %64 = vector.load %arg9[%c1, %c0_41, %c0_42] : memref<4x8x1xf32, #tpu.memory_space<vmem>>, vector<1x8x1xf32>
    %65 = vector.shape_cast %64 : vector<1x8x1xf32> to vector<8x1xf32>
    %cst_43 = arith.constant dense<0xFF800000> : vector<8xf32>
    %66 = vector.multi_reduction <maximumf>, %63, %cst_43 [1] : vector<8x8xf32> to vector<8xf32>
    %67 = vector.shape_cast %66 : vector<8xf32> to vector<8x1xf32>
    %68 = arith.maximumf %65, %67 : vector<8x1xf32>
    %69 = arith.subf %65, %68 : vector<8x1xf32>
    %70 = math.exp %69 : vector<8x1xf32>
    %71 = vector.broadcast %68 : vector<8x1xf32> to vector<8x8xf32>
    %72 = arith.subf %63, %71 : vector<8x8xf32>
    %73 = math.exp %72 : vector<8x8xf32>
    %c1_44 = arith.constant 1 : index
    %c0_45 = arith.constant 0 : index
    %c0_46 = arith.constant 0 : index
    %74 = vector.load %arg10[%c1_44, %c0_45, %c0_46] : memref<4x8x1xf32, #tpu.memory_space<vmem>>, vector<1x8x1xf32>
    %75 = vector.shape_cast %74 : vector<1x8x1xf32> to vector<8x1xf32>
    %76 = arith.mulf %70, %75 : vector<8x1xf32>
    %cst_47 = arith.constant dense<0.000000e+00> : vector<8xf32>
    %77 = vector.multi_reduction <add>, %73, %cst_47 [1] : vector<8x8xf32> to vector<8xf32>
    %78 = vector.shape_cast %77 : vector<8xf32> to vector<8x1xf32>
    %79 = arith.addf %76, %78 : vector<8x1xf32>
    %c1_48 = arith.constant 1 : index
    %c0_49 = arith.constant 0 : index
    %c0_50 = arith.constant 0 : index
    %80 = vector.load %arg10[%c1_48, %c0_49, %c0_50] : memref<4x8x1xf32, #tpu.memory_space<vmem>>, vector<1x8x1xf32>
    %81 = vector.shape_cast %80 : vector<1x8x1xf32> to vector<8x1xf32>
    %82 = vector.shape_cast %79 : vector<8x1xf32> to vector<1x8x1xf32>
    tpu.vector_store %arg10[%c1_48, %c0_49, %c0_50], %82 {strides = array<i32>} : memref<4x8x1xf32, #tpu.memory_space<vmem>>, vector<1x8x1xf32>,
    %c0_51 = arith.constant 0 : index
    %c8 = arith.constant 8 : index
    %83 = vector.load %arg11[%c0_51, %c8] : memref<8x32xf32, #tpu.memory_space<vmem>>, vector<8x8xf32>
    %84 = vector.broadcast %70 : vector<8x1xf32> to vector<8x8xf32>
    %85 = arith.mulf %84, %83 : vector<8x8xf32>
    %86 = arith.truncf %73 : vector<8x8xf32> to vector<8x8xbf16>
    %87 = vector.extract_strided_slice %8 {offsets = [0, 8], sizes = [8, 8], strides = [1, 1]} : vector<8x32xbf16> to vector<8x8xbf16>
    %cst_52 = arith.constant dense<0.000000e+00> : vector<8x8xf32>
    %88 = tpu.matmul %86, %87, %cst_52 {dimension_numbers = #tpu.dot_dimension_numbers<[1], [0], [0], [1], [0, 0, 1, 1], [], []>} : vector<8x8xbf16>, vector<8x8xbf16>, vector<8x8xf32> -> vector<8x8xf32>
    %89 = arith.addf %85, %88 : vector<8x8xf32>
    %c0_53 = arith.constant 0 : index
    %c8_54 = arith.constant 8 : index
    %90 = vector.load %arg11[%c0_53, %c8_54] : memref<8x32xf32, #tpu.memory_space<vmem>>, vector<8x8xf32>
    tpu.vector_store %arg11[%c0_53, %c8_54], %89 {strides = array<i32>} : memref<8x32xf32, #tpu.memory_space<vmem>>, vector<8x8xf32>,
    %c1_55 = arith.constant 1 : index
    %c0_56 = arith.constant 0 : index
    %c0_57 = arith.constant 0 : index
    %91 = vector.load %arg9[%c1_55, %c0_56, %c0_57] : memref<4x8x1xf32, #tpu.memory_space<vmem>>, vector<1x8x1xf32>
    %92 = vector.shape_cast %91 : vector<1x8x1xf32> to vector<8x1xf32>
    %93 = vector.shape_cast %68 : vector<8x1xf32> to vector<1x8x1xf32>
    tpu.vector_store %arg9[%c1_55, %c0_56, %c0_57], %93 {strides = array<i32>} : memref<4x8x1xf32, #tpu.memory_space<vmem>>, vector<1x8x1xf32>,
    %94 = vector.extract_strided_slice %4 {offsets = [0, 16], sizes = [8, 8], strides = [1, 1]} : vector<8x32xbf16> to vector<8x8xbf16>
    %95 = vector.extract_strided_slice %6 {offsets = [0, 16], sizes = [8, 8], strides = [1, 1]} : vector<8x32xbf16> to vector<8x8xbf16>
    %cst_58 = arith.constant dense<0.000000e+00> : vector<8x8xf32>
    %96 = tpu.matmul %94, %95, %cst_58 {dimension_numbers = #tpu.dot_dimension_numbers<[1], [1], [0], [0], [0, 0, 1, 0], [], []>} : vector<8x8xbf16>, vector<8x8xbf16>, vector<8x8xf32> -> vector<8x8xf32>
    %cst_59 = arith.constant 0.353553385 : f32
    %97 = vector.broadcast %cst_59 : f32 to vector<8x8xf32>
    %98 = arith.mulf %96, %97 : vector<8x8xf32>
    %cst_60 = arith.constant -1.000000e+20 : f32
    %99 = vector.broadcast %cst_60 : f32 to vector<8x8xf32>
    %100 = arith.select %19, %98, %99 : vector<8x8xi1>, vector<8x8xf32>
    %c2 = arith.constant 2 : index
    %c0_61 = arith.constant 0 : index
    %c0_62 = arith.constant 0 : index
    %101 = vector.load %arg9[%c2, %c0_61, %c0_62] : memref<4x8x1xf32, #tpu.memory_space<vmem>>, vector<1x8x1xf32>
    %102 = vector.shape_cast %101 : vector<1x8x1xf32> to vector<8x1xf32>
    %cst_63 = arith.constant dense<0xFF800000> : vector<8xf32>
    %103 = vector.multi_reduction <maximumf>, %100, %cst_63 [1] : vector<8x8xf32> to vector<8xf32>
    %104 = vector.shape_cast %103 : vector<8xf32> to vector<8x1xf32>
    %105 = arith.maximumf %102, %104 : vector<8x1xf32>
    %106 = arith.subf %102, %105 : vector<8x1xf32>
    %107 = math.exp %106 : vector<8x1xf32>
    %108 = vector.broadcast %105 : vector<8x1xf32> to vector<8x8xf32>
    %109 = arith.subf %100, %108 : vector<8x8xf32>
    %110 = math.exp %109 : vector<8x8xf32>
    %c2_64 = arith.constant 2 : index
    %c0_65 = arith.constant 0 : index
    %c0_66 = arith.constant 0 : index
    %111 = vector.load %arg10[%c2_64, %c0_65, %c0_66] : memref<4x8x1xf32, #tpu.memory_space<vmem>>, vector<1x8x1xf32>
    %112 = vector.shape_cast %111 : vector<1x8x1xf32> to vector<8x1xf32>
    %113 = arith.mulf %107, %112 : vector<8x1xf32>
    %cst_67 = arith.constant dense<0.000000e+00> : vector<8xf32>
    %114 = vector.multi_reduction <add>, %110, %cst_67 [1] : vector<8x8xf32> to vector<8xf32>
    %115 = vector.shape_cast %114 : vector<8xf32> to vector<8x1xf32>
    %116 = arith.addf %113, %115 : vector<8x1xf32>
    %c2_68 = arith.constant 2 : index
    %c0_69 = arith.constant 0 : index
    %c0_70 = arith.constant 0 : index
    %117 = vector.load %arg10[%c2_68, %c0_69, %c0_70] : memref<4x8x1xf32, #tpu.memory_space<vmem>>, vector<1x8x1xf32>
    %118 = vector.shape_cast %117 : vector<1x8x1xf32> to vector<8x1xf32>
    %119 = vector.shape_cast %116 : vector<8x1xf32> to vector<1x8x1xf32>
    tpu.vector_store %arg10[%c2_68, %c0_69, %c0_70], %119 {strides = array<i32>} : memref<4x8x1xf32, #tpu.memory_space<vmem>>, vector<1x8x1xf32>,
    %c0_71 = arith.constant 0 : index
    %c16 = arith.constant 16 : index
    %120 = vector.load %arg11[%c0_71, %c16] : memref<8x32xf32, #tpu.memory_space<vmem>>, vector<8x8xf32>
    %121 = vector.broadcast %107 : vector<8x1xf32> to vector<8x8xf32>
    %122 = arith.mulf %121, %120 : vector<8x8xf32>
    %123 = arith.truncf %110 : vector<8x8xf32> to vector<8x8xbf16>
    %124 = vector.extract_strided_slice %8 {offsets = [0, 16], sizes = [8, 8], strides = [1, 1]} : vector<8x32xbf16> to vector<8x8xbf16>
    %cst_72 = arith.constant dense<0.000000e+00> : vector<8x8xf32>
    %125 = tpu.matmul %123, %124, %cst_72 {dimension_numbers = #tpu.dot_dimension_numbers<[1], [0], [0], [1], [0, 0, 1, 1], [], []>} : vector<8x8xbf16>, vector<8x8xbf16>, vector<8x8xf32> -> vector<8x8xf32>
    %126 = arith.addf %122, %125 : vector<8x8xf32>
    %c0_73 = arith.constant 0 : index
    %c16_74 = arith.constant 16 : index
    %127 = vector.load %arg11[%c0_73, %c16_74] : memref<8x32xf32, #tpu.memory_space<vmem>>, vector<8x8xf32>
    tpu.vector_store %arg11[%c0_73, %c16_74], %126 {strides = array<i32>} : memref<8x32xf32, #tpu.memory_space<vmem>>, vector<8x8xf32>,
    %c2_75 = arith.constant 2 : index
    %c0_76 = arith.constant 0 : index
    %c0_77 = arith.constant 0 : index
    %128 = vector.load %arg9[%c2_75, %c0_76, %c0_77] : memref<4x8x1xf32, #tpu.memory_space<vmem>>, vector<1x8x1xf32>
    %129 = vector.shape_cast %128 : vector<1x8x1xf32> to vector<8x1xf32>
    %130 = vector.shape_cast %105 : vector<8x1xf32> to vector<1x8x1xf32>
    tpu.vector_store %arg9[%c2_75, %c0_76, %c0_77], %130 {strides = array<i32>} : memref<4x8x1xf32, #tpu.memory_space<vmem>>, vector<1x8x1xf32>,
    %131 = vector.extract_strided_slice %4 {offsets = [0, 24], sizes = [8, 8], strides = [1, 1]} : vector<8x32xbf16> to vector<8x8xbf16>
    %132 = vector.extract_strided_slice %6 {offsets = [0, 24], sizes = [8, 8], strides = [1, 1]} : vector<8x32xbf16> to vector<8x8xbf16>
    %cst_78 = arith.constant dense<0.000000e+00> : vector<8x8xf32>
    %133 = tpu.matmul %131, %132, %cst_78 {dimension_numbers = #tpu.dot_dimension_numbers<[1], [1], [0], [0], [0, 0, 1, 0], [], []>} : vector<8x8xbf16>, vector<8x8xbf16>, vector<8x8xf32> -> vector<8x8xf32>
    %cst_79 = arith.constant 0.353553385 : f32
    %134 = vector.broadcast %cst_79 : f32 to vector<8x8xf32>
    %135 = arith.mulf %133, %134 : vector<8x8xf32>
    %cst_80 = arith.constant -1.000000e+20 : f32
    %136 = vector.broadcast %cst_80 : f32 to vector<8x8xf32>
    %137 = arith.select %19, %135, %136 : vector<8x8xi1>, vector<8x8xf32>
    %c3 = arith.constant 3 : index
    %c0_81 = arith.constant 0 : index
    %c0_82 = arith.constant 0 : index
    %138 = vector.load %arg9[%c3, %c0_81, %c0_82] : memref<4x8x1xf32, #tpu.memory_space<vmem>>, vector<1x8x1xf32>
    %139 = vector.shape_cast %138 : vector<1x8x1xf32> to vector<8x1xf32>
    %cst_83 = arith.constant dense<0xFF800000> : vector<8xf32>
    %140 = vector.multi_reduction <maximumf>, %137, %cst_83 [1] : vector<8x8xf32> to vector<8xf32>
    %141 = vector.shape_cast %140 : vector<8xf32> to vector<8x1xf32>
    %142 = arith.maximumf %139, %141 : vector<8x1xf32>
    %143 = arith.subf %139, %142 : vector<8x1xf32>
    %144 = math.exp %143 : vector<8x1xf32>
    %145 = vector.broadcast %142 : vector<8x1xf32> to vector<8x8xf32>
    %146 = arith.subf %137, %145 : vector<8x8xf32>
    %147 = math.exp %146 : vector<8x8xf32>
    %c3_84 = arith.constant 3 : index
    %c0_85 = arith.constant 0 : index
    %c0_86 = arith.constant 0 : index
    %148 = vector.load %arg10[%c3_84, %c0_85, %c0_86] : memref<4x8x1xf32, #tpu.memory_space<vmem>>, vector<1x8x1xf32>
    %149 = vector.shape_cast %148 : vector<1x8x1xf32> to vector<8x1xf32>
    %150 = arith.mulf %144, %149 : vector<8x1xf32>
    %cst_87 = arith.constant dense<0.000000e+00> : vector<8xf32>
    %151 = vector.multi_reduction <add>, %147, %cst_87 [1] : vector<8x8xf32> to vector<8xf32>
    %152 = vector.shape_cast %151 : vector<8xf32> to vector<8x1xf32>
    %153 = arith.addf %150, %152 : vector<8x1xf32>
    %c3_88 = arith.constant 3 : index
    %c0_89 = arith.constant 0 : index
    %c0_90 = arith.constant 0 : index
    %154 = vector.load %arg10[%c3_88, %c0_89, %c0_90] : memref<4x8x1xf32, #tpu.memory_space<vmem>>, vector<1x8x1xf32>
    %155 = vector.shape_cast %154 : vector<1x8x1xf32> to vector<8x1xf32>
    %156 = vector.shape_cast %153 : vector<8x1xf32> to vector<1x8x1xf32>
    tpu.vector_store %arg10[%c3_88, %c0_89, %c0_90], %156 {strides = array<i32>} : memref<4x8x1xf32, #tpu.memory_space<vmem>>, vector<1x8x1xf32>,
    %c0_91 = arith.constant 0 : index
    %c24 = arith.constant 24 : index
    %157 = vector.load %arg11[%c0_91, %c24] : memref<8x32xf32, #tpu.memory_space<vmem>>, vector<8x8xf32>
    %158 = vector.broadcast %144 : vector<8x1xf32> to vector<8x8xf32>
    %159 = arith.mulf %158, %157 : vector<8x8xf32>
    %160 = arith.truncf %147 : vector<8x8xf32> to vector<8x8xbf16>
    %161 = vector.extract_strided_slice %8 {offsets = [0, 24], sizes = [8, 8], strides = [1, 1]} : vector<8x32xbf16> to vector<8x8xbf16>
    %cst_92 = arith.constant dense<0.000000e+00> : vector<8x8xf32>
    %162 = tpu.matmul %160, %161, %cst_92 {dimension_numbers = #tpu.dot_dimension_numbers<[1], [0], [0], [1], [0, 0, 1, 1], [], []>} : vector<8x8xbf16>, vector<8x8xbf16>, vector<8x8xf32> -> vector<8x8xf32>
    %163 = arith.addf %159, %162 : vector<8x8xf32>
    %c0_93 = arith.constant 0 : index
    %c24_94 = arith.constant 24 : index
    %164 = vector.load %arg11[%c0_93, %c24_94] : memref<8x32xf32, #tpu.memory_space<vmem>>, vector<8x8xf32>
    tpu.vector_store %arg11[%c0_93, %c24_94], %163 {strides = array<i32>} : memref<8x32xf32, #tpu.memory_space<vmem>>, vector<8x8xf32>,
    %c3_95 = arith.constant 3 : index
    %c0_96 = arith.constant 0 : index
    %c0_97 = arith.constant 0 : index
    %165 = vector.load %arg9[%c3_95, %c0_96, %c0_97] : memref<4x8x1xf32, #tpu.memory_space<vmem>>, vector<1x8x1xf32>
    %166 = vector.shape_cast %165 : vector<1x8x1xf32> to vector<8x1xf32>
    %167 = vector.shape_cast %142 : vector<8x1xf32> to vector<1x8x1xf32>
    tpu.vector_store %arg9[%c3_95, %c0_96, %c0_97], %167 {strides = array<i32>} : memref<4x8x1xf32, #tpu.memory_space<vmem>>, vector<1x8x1xf32>,
    %c0_i32_98 = arith.constant 0 : i32
    %168 = arith.cmpi eq, %arg2, %c0_i32_98 : i32
    %169 = arith.extui %168 : i1 to i32
    %c0_i32_99 = arith.constant 0 : i32
    %170 = arith.cmpi ne, %169, %c0_i32_99 : i32
    scf.if %170 {
      %c0_100 = arith.constant 0 : index
      %c0_101 = arith.constant 0 : index
      %171 = vector.load %arg11[%c0_100, %c0_101] : memref<8x32xf32, #tpu.memory_space<vmem>>, vector<8x8xf32>
      %c0_102 = arith.constant 0 : index
      %c0_103 = arith.constant 0 : index
      %c0_104 = arith.constant 0 : index
      %172 = vector.load %arg10[%c0_102, %c0_103, %c0_104] : memref<4x8x1xf32, #tpu.memory_space<vmem>>, vector<1x8x1xf32>
      %173 = vector.shape_cast %172 : vector<1x8x1xf32> to vector<8x1xf32>
      %174 = tpu.reciprocal %173 {approx = true} : vector<8x1xf32> -> vector<8x1xf32>
      %175 = vector.broadcast %174 : vector<8x1xf32> to vector<8x8xf32>
      %176 = arith.mulf %171, %175 : vector<8x8xf32>
      %c0_105 = arith.constant 0 : index
      %c0_106 = arith.constant 0 : index
      %177 = vector.load %arg11[%c0_105, %c0_106] : memref<8x32xf32, #tpu.memory_space<vmem>>, vector<8x8xf32>
      tpu.vector_store %arg11[%c0_105, %c0_106], %176 {strides = array<i32>} : memref<8x32xf32, #tpu.memory_space<vmem>>, vector<8x8xf32>,
      %c0_107 = arith.constant 0 : index
      %c8_108 = arith.constant 8 : index
      %178 = vector.load %arg11[%c0_107, %c8_108] : memref<8x32xf32, #tpu.memory_space<vmem>>, vector<8x8xf32>
      %c1_109 = arith.constant 1 : index
      %c0_110 = arith.constant 0 : index
      %c0_111 = arith.constant 0 : index
      %179 = vector.load %arg10[%c1_109, %c0_110, %c0_111] : memref<4x8x1xf32, #tpu.memory_space<vmem>>, vector<1x8x1xf32>
      %180 = vector.shape_cast %179 : vector<1x8x1xf32> to vector<8x1xf32>
      %181 = tpu.reciprocal %180 {approx = true} : vector<8x1xf32> -> vector<8x1xf32>
      %182 = vector.broadcast %181 : vector<8x1xf32> to vector<8x8xf32>
      %183 = arith.mulf %178, %182 : vector<8x8xf32>
      %c0_112 = arith.constant 0 : index
      %c8_113 = arith.constant 8 : index
      %184 = vector.load %arg11[%c0_112, %c8_113] : memref<8x32xf32, #tpu.memory_space<vmem>>, vector<8x8xf32>
      tpu.vector_store %arg11[%c0_112, %c8_113], %183 {strides = array<i32>} : memref<8x32xf32, #tpu.memory_space<vmem>>, vector<8x8xf32>,
      %c0_114 = arith.constant 0 : index
      %c16_115 = arith.constant 16 : index
      %185 = vector.load %arg11[%c0_114, %c16_115] : memref<8x32xf32, #tpu.memory_space<vmem>>, vector<8x8xf32>
      %c2_116 = arith.constant 2 : index
      %c0_117 = arith.constant 0 : index
      %c0_118 = arith.constant 0 : index
      %186 = vector.load %arg10[%c2_116, %c0_117, %c0_118] : memref<4x8x1xf32, #tpu.memory_space<vmem>>, vector<1x8x1xf32>
      %187 = vector.shape_cast %186 : vector<1x8x1xf32> to vector<8x1xf32>
      %188 = tpu.reciprocal %187 {approx = true} : vector<8x1xf32> -> vector<8x1xf32>
      %189 = vector.broadcast %188 : vector<8x1xf32> to vector<8x8xf32>
      %190 = arith.mulf %185, %189 : vector<8x8xf32>
      %c0_119 = arith.constant 0 : index
      %c16_120 = arith.constant 16 : index
      %191 = vector.load %arg11[%c0_119, %c16_120] : memref<8x32xf32, #tpu.memory_space<vmem>>, vector<8x8xf32>
      tpu.vector_store %arg11[%c0_119, %c16_120], %190 {strides = array<i32>} : memref<8x32xf32, #tpu.memory_space<vmem>>, vector<8x8xf32>,
      %c0_121 = arith.constant 0 : index
      %c24_122 = arith.constant 24 : index
      %192 = vector.load %arg11[%c0_121, %c24_122] : memref<8x32xf32, #tpu.memory_space<vmem>>, vector<8x8xf32>
      %c3_123 = arith.constant 3 : index
      %c0_124 = arith.constant 0 : index
      %c0_125 = arith.constant 0 : index
      %193 = vector.load %arg10[%c3_123, %c0_124, %c0_125] : memref<4x8x1xf32, #tpu.memory_space<vmem>>, vector<1x8x1xf32>
      %194 = vector.shape_cast %193 : vector<1x8x1xf32> to vector<8x1xf32>
      %195 = tpu.reciprocal %194 {approx = true} : vector<8x1xf32> -> vector<8x1xf32>
      %196 = vector.broadcast %195 : vector<8x1xf32> to vector<8x8xf32>
      %197 = arith.mulf %192, %196 : vector<8x8xf32>
      %c0_126 = arith.constant 0 : index
      %c24_127 = arith.constant 24 : index
      %198 = vector.load %arg11[%c0_126, %c24_127] : memref<8x32xf32, #tpu.memory_space<vmem>>, vector<8x8xf32>
      tpu.vector_store %arg11[%c0_126, %c24_127], %197 {strides = array<i32>} : memref<8x32xf32, #tpu.memory_space<vmem>>, vector<8x8xf32>,
      %c0_128 = arith.constant 0 : index
      %c0_129 = arith.constant 0 : index
      %199 = vector.load %arg11[%c0_128, %c0_129] : memref<8x32xf32, #tpu.memory_space<vmem>>, vector<8x32xf32>
      %200 = arith.truncf %199 : vector<8x32xf32> to vector<8x32xbf16>
      %c0_130 = arith.constant 0 : index
      %c0_131 = arith.constant 0 : index
      %c0_132 = arith.constant 0 : index
      %201 = vector.load %arg8[%c0_130, %c0_131, %c0_132] : memref<1x8x32xbf16, #tpu.memory_space<vmem>>, vector<1x8x32xbf16>
      %202 = vector.shape_cast %201 : vector<1x8x32xbf16> to vector<8x32xbf16>
      %203 = vector.shape_cast %200 : vector<8x32xbf16> to vector<1x8x32xbf16>
      tpu.vector_store %arg8[%c0_130, %c0_131, %c0_132], %203 {strides = array<i32>} : memref<1x8x32xbf16, #tpu.memory_space<vmem>>, vector<1x8x32xbf16>,
    } else {
    }
    return
  }
  func.func @transform_0(%arg0: i32, %arg1: i32, %arg2: i32) -> (i32, i32, i32) {
    %c0_i32 = arith.constant 0 : i32
    %c0_i32_0 = arith.constant 0 : i32
    return %arg0, %arg1, %c0_i32 : i32, i32, i32
  }
  func.func @transform_1(%arg0: i32, %arg1: i32, %arg2: i32) -> (i32, i32, i32) {
    %c0_i32 = arith.constant 0 : i32
    %c0_i32_0 = arith.constant 0 : i32
    return %arg0, %arg2, %c0_i32 : i32, i32, i32
  }
  func.func @transform_2(%arg0: i32, %arg1: i32, %arg2: i32) -> (i32, i32, i32) {
    %c0_i32 = arith.constant 0 : i32
    %c0_i32_0 = arith.constant 0 : i32
    return %arg0, %arg2, %c0_i32 : i32, i32, i32
  }
  func.func @transform_3(%arg0: i32, %arg1: i32, %arg2: i32) -> (i32, i32, i32) {
    %c0_i32 = arith.constant 0 : i32
    %c0_i32_0 = arith.constant 0 : i32
    return %arg0, %arg1, %c0_i32 : i32, i32, i32
  }
  func.func @transform_4(%arg0: i32, %arg1: i32, %arg2: i32) -> (i32, i32, i32) {
    %c0_i32 = arith.constant 0 : i32
    %c0_i32_0 = arith.constant 0 : i32
    return %arg0, %c0_i32, %arg2 : i32, i32, i32
  }
  func.func @transform_5(%arg0: i32, %arg1: i32, %arg2: i32) -> (i32, i32, i32) {
    %c0_i32 = arith.constant 0 : i32
    %c0_i32_0 = arith.constant 0 : i32
    return %arg0, %arg1, %c0_i32 : i32, i32, i32
  }
}

module attributes {stable_mosaic.version = 11 : i64} {
  func.func @kernel(%arg0: i32, %arg1: i32, %arg2: i32, %arg3: memref<16x64xbf16, #tpu.memory_space<vmem>>, %arg4: memref<64x32xbf16, #tpu.memory_space<vmem>>, %arg5: memref<1x32xf32, #tpu.memory_space<vmem>>, %arg6: memref<16x32xbf16, #tpu.memory_space<vmem>>, %arg7: memref<1x32xf32, #tpu.memory_space<vmem>>, %arg8: memref<1x32xf32, #tpu.memory_space<vmem>>, %arg9: memref<16x32xbf16, #tpu.memory_space<vmem>>, %arg10: memref<16x32xf32, #tpu.memory_space<vmem>>) attributes {dimension_semantics = [#tpu.dimension_semantics<parallel>, #tpu.dimension_semantics<parallel>, #tpu.dimension_semantics<arbitrary>], iteration_bounds = array<i64: 1, 1, 1>, scalar_prefetch = 0 : i64, scratch_operands = 1 : i64, tpu.core_type = #tpu.core_type<tc>, window_params = [{transform_indices = @transform_0, window_bounds = array<i64: 16, 64>}, {transform_indices = @transform_1, window_bounds = array<i64: 64, 32>}, {transform_indices = @transform_2, window_bounds = array<i64: 1, 32>}, {transform_indices = @transform_3, window_bounds = array<i64: 16, 32>}, {transform_indices = @transform_4, window_bounds = array<i64: 1, 32>}, {transform_indices = @transform_5, window_bounds = array<i64: 1, 32>}, {transform_indices = @transform_6, window_bounds = array<i64: 16, 32>}]} {
    %c0_i32 = arith.constant 0 : i32
    %0 = arith.cmpi eq, %arg2, %c0_i32 : i32
    %1 = arith.extui %0 : i1 to i32
    %c0_i32_0 = arith.constant 0 : i32
    %2 = arith.cmpi ne, %1, %c0_i32_0 : i32
    scf.if %2 {
      %cst_10 = arith.constant 0.000000e+00 : f32
      %12 = vector.broadcast %cst_10 : f32 to vector<16x32xf32>
      %c0_11 = arith.constant 0 : index
      %c0_12 = arith.constant 0 : index
      %13 = vector.load %arg10[%c0_11, %c0_12] : memref<16x32xf32, #tpu.memory_space<vmem>>, vector<16x32xf32>
      tpu.vector_store %arg10[%c0_11, %c0_12], %12 {strides = array<i32>} : memref<16x32xf32, #tpu.memory_space<vmem>>, vector<16x32xf32>,
    } else {
    }
    %c0 = arith.constant 0 : index
    %c0_1 = arith.constant 0 : index
    %3 = vector.load %arg10[%c0, %c0_1] : memref<16x32xf32, #tpu.memory_space<vmem>>, vector<16x32xf32>
    %c0_2 = arith.constant 0 : index
    %c0_3 = arith.constant 0 : index
    %4 = vector.load %arg3[%c0_2, %c0_3] : memref<16x64xbf16, #tpu.memory_space<vmem>>, vector<16x64xbf16>
    %c0_4 = arith.constant 0 : index
    %c0_5 = arith.constant 0 : index
    %5 = vector.load %arg4[%c0_4, %c0_5] : memref<64x32xbf16, #tpu.memory_space<vmem>>, vector<64x32xbf16>
    %cst = arith.constant dense<0.000000e+00> : vector<16x32xf32>
    %6 = tpu.matmul %4, %5, %cst {dimension_numbers = #tpu.dot_dimension_numbers<[1], [0], [0], [1], [0, 0, 1, 1], [], []>} : vector<16x64xbf16>, vector<64x32xbf16>, vector<16x32xf32> -> vector<16x32xf32>
    %7 = arith.addf %3, %6 : vector<16x32xf32>
    %c0_6 = arith.constant 0 : index
    %c0_7 = arith.constant 0 : index
    %8 = vector.load %arg10[%c0_6, %c0_7] : memref<16x32xf32, #tpu.memory_space<vmem>>, vector<16x32xf32>
    tpu.vector_store %arg10[%c0_6, %c0_7], %7 {strides = array<i32>} : memref<16x32xf32, #tpu.memory_space<vmem>>, vector<16x32xf32>,
    %c0_i32_8 = arith.constant 0 : i32
    %9 = arith.cmpi eq, %arg2, %c0_i32_8 : i32
    %10 = arith.extui %9 : i1 to i32
    %c0_i32_9 = arith.constant 0 : i32
    %11 = arith.cmpi ne, %10, %c0_i32_9 : i32
    scf.if %11 {
      %c0_10 = arith.constant 0 : index
      %c0_11 = arith.constant 0 : index
      %12 = vector.load %arg10[%c0_10, %c0_11] : memref<16x32xf32, #tpu.memory_space<vmem>>, vector<16x32xf32>
      %c0_12 = arith.constant 0 : index
      %c0_13 = arith.constant 0 : index
      %13 = vector.load %arg5[%c0_12, %c0_13] : memref<1x32xf32, #tpu.memory_space<vmem>>, vector<1x32xf32>
      %14 = vector.broadcast %13 : vector<1x32xf32> to vector<16x32xf32>
      %15 = arith.addf %12, %14 : vector<16x32xf32>
      %c0_14 = arith.constant 0 : index
      %c0_15 = arith.constant 0 : index
      %16 = vector.load %arg6[%c0_14, %c0_15] : memref<16x32xbf16, #tpu.memory_space<vmem>>, vector<16x32xbf16>
      %17 = arith.extf %16 : vector<16x32xbf16> to vector<16x32xf32>
      %18 = arith.addf %15, %17 : vector<16x32xf32>
      %cst_16 = arith.constant dense<0.000000e+00> : vector<16xf32>
      %19 = vector.multi_reduction <add>, %18, %cst_16 [1] : vector<16x32xf32> to vector<16xf32>
      %20 = vector.shape_cast %19 : vector<16xf32> to vector<16x1xf32>
      %cst_17 = arith.constant 3.200000e+01 : f32
      %21 = vector.broadcast %cst_17 : f32 to vector<16x1xf32>
      %22 = arith.divf %20, %21 : vector<16x1xf32>
      %23 = vector.broadcast %22 : vector<16x1xf32> to vector<16x32xf32>
      %24 = arith.subf %18, %23 : vector<16x32xf32>
      %25 = arith.mulf %24, %24 : vector<16x32xf32>
      %cst_18 = arith.constant dense<0.000000e+00> : vector<16xf32>
      %26 = vector.multi_reduction <add>, %25, %cst_18 [1] : vector<16x32xf32> to vector<16xf32>
      %27 = vector.shape_cast %26 : vector<16xf32> to vector<16x1xf32>
      %cst_19 = arith.constant 3.200000e+01 : f32
      %28 = vector.broadcast %cst_19 : f32 to vector<16x1xf32>
      %29 = arith.divf %27, %28 : vector<16x1xf32>
      %30 = vector.broadcast %22 : vector<16x1xf32> to vector<16x32xf32>
      %31 = arith.subf %18, %30 : vector<16x32xf32>
      %cst_20 = arith.constant 9.99999974E-6 : f32
      %32 = vector.broadcast %cst_20 : f32 to vector<16x1xf32>
      %33 = arith.addf %29, %32 : vector<16x1xf32>
      %34 = math.rsqrt %33 : vector<16x1xf32>
      %35 = vector.broadcast %34 : vector<16x1xf32> to vector<16x32xf32>
      %36 = arith.mulf %31, %35 : vector<16x32xf32>
      %c0_21 = arith.constant 0 : index
      %c0_22 = arith.constant 0 : index
      %37 = vector.load %arg7[%c0_21, %c0_22] : memref<1x32xf32, #tpu.memory_space<vmem>>, vector<1x32xf32>
      %38 = vector.broadcast %37 : vector<1x32xf32> to vector<16x32xf32>
      %39 = arith.mulf %36, %38 : vector<16x32xf32>
      %c0_23 = arith.constant 0 : index
      %c0_24 = arith.constant 0 : index
      %40 = vector.load %arg8[%c0_23, %c0_24] : memref<1x32xf32, #tpu.memory_space<vmem>>, vector<1x32xf32>
      %41 = vector.broadcast %40 : vector<1x32xf32> to vector<16x32xf32>
      %42 = arith.addf %39, %41 : vector<16x32xf32>
      %43 = arith.truncf %42 : vector<16x32xf32> to vector<16x32xbf16>
      %c0_25 = arith.constant 0 : index
      %c0_26 = arith.constant 0 : index
      %44 = vector.load %arg9[%c0_25, %c0_26] : memref<16x32xbf16, #tpu.memory_space<vmem>>, vector<16x32xbf16>
      tpu.vector_store %arg9[%c0_25, %c0_26], %43 {strides = array<i32>} : memref<16x32xbf16, #tpu.memory_space<vmem>>, vector<16x32xbf16>,
    } else {
    }
    return
  }
  func.func @transform_0(%arg0: i32, %arg1: i32, %arg2: i32) -> (i32, i32) {
    %c0_i32 = arith.constant 0 : i32
    return %arg0, %arg2 : i32, i32
  }
  func.func @transform_1(%arg0: i32, %arg1: i32, %arg2: i32) -> (i32, i32) {
    %c0_i32 = arith.constant 0 : i32
    return %arg2, %arg1 : i32, i32
  }
  func.func @transform_2(%arg0: i32, %arg1: i32, %arg2: i32) -> (i32, i32) {
    %c0_i32 = arith.constant 0 : i32
    %c0_i32_0 = arith.constant 0 : i32
    return %c0_i32, %arg1 : i32, i32
  }
  func.func @transform_3(%arg0: i32, %arg1: i32, %arg2: i32) -> (i32, i32) {
    %c0_i32 = arith.constant 0 : i32
    return %arg0, %arg1 : i32, i32
  }
  func.func @transform_4(%arg0: i32, %arg1: i32, %arg2: i32) -> (i32, i32) {
    %c0_i32 = arith.constant 0 : i32
    %c0_i32_0 = arith.constant 0 : i32
    return %c0_i32, %arg1 : i32, i32
  }
  func.func @transform_5(%arg0: i32, %arg1: i32, %arg2: i32) -> (i32, i32) {
    %c0_i32 = arith.constant 0 : i32
    %c0_i32_0 = arith.constant 0 : i32
    return %c0_i32, %arg1 : i32, i32
  }
  func.func @transform_6(%arg0: i32, %arg1: i32, %arg2: i32) -> (i32, i32) {
    %c0_i32 = arith.constant 0 : i32
    return %arg0, %arg1 : i32, i32
  }
}

module attributes {stable_mosaic.version = 11 : i64} {
  func.func @kernel(%arg0: i32, %arg1: i32, %arg2: i32, %arg3: memref<16x32xbf16, #tpu.memory_space<vmem>>, %arg4: memref<32x60xbf16, #tpu.memory_space<vmem>>, %arg5: memref<1x60xf32, #tpu.memory_space<vmem>>, %arg6: memref<16x60xf32, #tpu.memory_space<vmem>>, %arg7: memref<16x60xf32, #tpu.memory_space<vmem>>) attributes {dimension_semantics = [#tpu.dimension_semantics<parallel>, #tpu.dimension_semantics<parallel>, #tpu.dimension_semantics<arbitrary>], iteration_bounds = array<i64: 1, 1, 1>, scalar_prefetch = 0 : i64, scratch_operands = 1 : i64, tpu.core_type = #tpu.core_type<tc>, window_params = [{transform_indices = @transform_0, window_bounds = array<i64: 16, 32>}, {transform_indices = @transform_1, window_bounds = array<i64: 32, 60>}, {transform_indices = @transform_2, window_bounds = array<i64: 1, 60>}, {transform_indices = @transform_3, window_bounds = array<i64: 16, 60>}]} {
    %c0_i32 = arith.constant 0 : i32
    %0 = arith.cmpi eq, %arg2, %c0_i32 : i32
    %1 = arith.extui %0 : i1 to i32
    %c0_i32_0 = arith.constant 0 : i32
    %2 = arith.cmpi ne, %1, %c0_i32_0 : i32
    scf.if %2 {
      %cst_10 = arith.constant 0.000000e+00 : f32
      %12 = vector.broadcast %cst_10 : f32 to vector<16x60xf32>
      %c0_11 = arith.constant 0 : index
      %c0_12 = arith.constant 0 : index
      %13 = vector.load %arg7[%c0_11, %c0_12] : memref<16x60xf32, #tpu.memory_space<vmem>>, vector<16x60xf32>
      tpu.vector_store %arg7[%c0_11, %c0_12], %12 {strides = array<i32>} : memref<16x60xf32, #tpu.memory_space<vmem>>, vector<16x60xf32>,
    } else {
    }
    %c0 = arith.constant 0 : index
    %c0_1 = arith.constant 0 : index
    %3 = vector.load %arg7[%c0, %c0_1] : memref<16x60xf32, #tpu.memory_space<vmem>>, vector<16x60xf32>
    %c0_2 = arith.constant 0 : index
    %c0_3 = arith.constant 0 : index
    %4 = vector.load %arg3[%c0_2, %c0_3] : memref<16x32xbf16, #tpu.memory_space<vmem>>, vector<16x32xbf16>
    %c0_4 = arith.constant 0 : index
    %c0_5 = arith.constant 0 : index
    %5 = vector.load %arg4[%c0_4, %c0_5] : memref<32x60xbf16, #tpu.memory_space<vmem>>, vector<32x60xbf16>
    %cst = arith.constant dense<0.000000e+00> : vector<16x60xf32>
    %6 = tpu.matmul %4, %5, %cst {dimension_numbers = #tpu.dot_dimension_numbers<[1], [0], [0], [1], [0, 0, 1, 1], [], []>} : vector<16x32xbf16>, vector<32x60xbf16>, vector<16x60xf32> -> vector<16x60xf32>
    %7 = arith.addf %3, %6 : vector<16x60xf32>
    %c0_6 = arith.constant 0 : index
    %c0_7 = arith.constant 0 : index
    %8 = vector.load %arg7[%c0_6, %c0_7] : memref<16x60xf32, #tpu.memory_space<vmem>>, vector<16x60xf32>
    tpu.vector_store %arg7[%c0_6, %c0_7], %7 {strides = array<i32>} : memref<16x60xf32, #tpu.memory_space<vmem>>, vector<16x60xf32>,
    %c0_i32_8 = arith.constant 0 : i32
    %9 = arith.cmpi eq, %arg2, %c0_i32_8 : i32
    %10 = arith.extui %9 : i1 to i32
    %c0_i32_9 = arith.constant 0 : i32
    %11 = arith.cmpi ne, %10, %c0_i32_9 : i32
    scf.if %11 {
      %c0_10 = arith.constant 0 : index
      %c0_11 = arith.constant 0 : index
      %12 = vector.load %arg7[%c0_10, %c0_11] : memref<16x60xf32, #tpu.memory_space<vmem>>, vector<16x60xf32>
      %c0_12 = arith.constant 0 : index
      %c0_13 = arith.constant 0 : index
      %13 = vector.load %arg5[%c0_12, %c0_13] : memref<1x60xf32, #tpu.memory_space<vmem>>, vector<1x60xf32>
      %14 = vector.broadcast %13 : vector<1x60xf32> to vector<16x60xf32>
      %15 = arith.addf %12, %14 : vector<16x60xf32>
      %c0_14 = arith.constant 0 : index
      %c0_15 = arith.constant 0 : index
      %16 = vector.load %arg6[%c0_14, %c0_15] : memref<16x60xf32, #tpu.memory_space<vmem>>, vector<16x60xf32>
      tpu.vector_store %arg6[%c0_14, %c0_15], %15 {strides = array<i32>} : memref<16x60xf32, #tpu.memory_space<vmem>>, vector<16x60xf32>,
    } else {
    }
    return
  }
  func.func @transform_0(%arg0: i32, %arg1: i32, %arg2: i32) -> (i32, i32) {
    %c0_i32 = arith.constant 0 : i32
    return %arg0, %arg2 : i32, i32
  }
  func.func @transform_1(%arg0: i32, %arg1: i32, %arg2: i32) -> (i32, i32) {
    %c0_i32 = arith.constant 0 : i32
    return %arg2, %arg1 : i32, i32
  }
  func.func @transform_2(%arg0: i32, %arg1: i32, %arg2: i32) -> (i32, i32) {
    %c0_i32 = arith.constant 0 : i32
    %c0_i32_0 = arith.constant 0 : i32
    return %c0_i32, %arg1 : i32, i32
  }
  func.func @transform_3(%arg0: i32, %arg1: i32, %arg2: i32) -> (i32, i32) {
    %c0_i32 = arith.constant 0 : i32
    return %arg0, %arg1 : i32, i32
  }
}

module attributes {stable_mosaic.version = 11 : i64} {
  func.func @kernel(%arg0: i32, %arg1: i32, %arg2: i32, %arg3: memref<1x8x32xbf16, #tpu.memory_space<vmem>>, %arg4: memref<1x8x32xbf16, #tpu.memory_space<vmem>>, %arg5: memref<1x8x32xbf16, #tpu.memory_space<vmem>>, %arg6: memref<1x8x1xf32, #tpu.memory_space<vmem>>, %arg7: memref<1x1x8xf32, #tpu.memory_space<vmem>>, %arg8: memref<1x8x32xbf16, #tpu.memory_space<vmem>>, %arg9: memref<4x8x1xf32, #tpu.memory_space<vmem>>, %arg10: memref<4x8x1xf32, #tpu.memory_space<vmem>>, %arg11: memref<8x32xf32, #tpu.memory_space<vmem>>) attributes {dimension_semantics = [#tpu.dimension_semantics<parallel>, #tpu.dimension_semantics<parallel>, #tpu.dimension_semantics<arbitrary>], iteration_bounds = array<i64: 2, 1, 1>, scalar_prefetch = 0 : i64, scratch_operands = 3 : i64, tpu.core_type = #tpu.core_type<tc>, window_params = [{transform_indices = @transform_0, window_bounds = array<i64: 1, 8, 32>}, {transform_indices = @transform_1, window_bounds = array<i64: 1, 8, 32>}, {transform_indices = @transform_2, window_bounds = array<i64: 1, 8, 32>}, {transform_indices = @transform_3, window_bounds = array<i64: 1, 8, 1>}, {transform_indices = @transform_4, window_bounds = array<i64: 1, 1, 8>}, {transform_indices = @transform_5, window_bounds = array<i64: 1, 8, 32>}]} {
    %c0_i32 = arith.constant 0 : i32
    %0 = arith.cmpi eq, %arg2, %c0_i32 : i32
    %1 = arith.extui %0 : i1 to i32
    %c0_i32_0 = arith.constant 0 : i32
    %2 = arith.cmpi ne, %1, %c0_i32_0 : i32
    scf.if %2 {
      %cst_101 = arith.constant 0xFF800000 : f32
      %181 = vector.broadcast %cst_101 : f32 to vector<4x8x1xf32>
      %c0_102 = arith.constant 0 : index
      %c0_103 = arith.constant 0 : index
      %c0_104 = arith.constant 0 : index
      %182 = vector.load %arg9[%c0_102, %c0_103, %c0_104] : memref<4x8x1xf32, #tpu.memory_space<vmem>>, vector<4x8x1xf32>
      tpu.vector_store %arg9[%c0_102, %c0_103, %c0_104], %181 {strides = array<i32>} : memref<4x8x1xf32, #tpu.memory_space<vmem>>, vector<4x8x1xf32>,
      %cst_105 = arith.constant 0.000000e+00 : f32
      %183 = vector.broadcast %cst_105 : f32 to vector<4x8x1xf32>
      %c0_106 = arith.constant 0 : index
      %c0_107 = arith.constant 0 : index
      %c0_108 = arith.constant 0 : index
      %184 = vector.load %arg10[%c0_106, %c0_107, %c0_108] : memref<4x8x1xf32, #tpu.memory_space<vmem>>, vector<4x8x1xf32>
      tpu.vector_store %arg10[%c0_106, %c0_107, %c0_108], %183 {strides = array<i32>} : memref<4x8x1xf32, #tpu.memory_space<vmem>>, vector<4x8x1xf32>,
      %cst_109 = arith.constant 0.000000e+00 : f32
      %185 = vector.broadcast %cst_109 : f32 to vector<8x32xf32>
      %c0_110 = arith.constant 0 : index
      %c0_111 = arith.constant 0 : index
      %186 = vector.load %arg11[%c0_110, %c0_111] : memref<8x32xf32, #tpu.memory_space<vmem>>, vector<8x32xf32>
      tpu.vector_store %arg11[%c0_110, %c0_111], %185 {strides = array<i32>} : memref<8x32xf32, #tpu.memory_space<vmem>>, vector<8x32xf32>,
    } else {
    }
    %c0 = arith.constant 0 : index
    %c0_1 = arith.constant 0 : index
    %c0_2 = arith.constant 0 : index
    %3 = vector.load %arg3[%c0, %c0_1, %c0_2] : memref<1x8x32xbf16, #tpu.memory_space<vmem>>, vector<1x8x32xbf16>
    %4 = vector.shape_cast %3 : vector<1x8x32xbf16> to vector<8x32xbf16>
    %c0_3 = arith.constant 0 : index
    %c0_4 = arith.constant 0 : index
    %c0_5 = arith.constant 0 : index
    %5 = vector.load %arg4[%c0_3, %c0_4, %c0_5] : memref<1x8x32xbf16, #tpu.memory_space<vmem>>, vector<1x8x32xbf16>
    %6 = vector.shape_cast %5 : vector<1x8x32xbf16> to vector<8x32xbf16>
    %c0_6 = arith.constant 0 : index
    %c0_7 = arith.constant 0 : index
    %c0_8 = arith.constant 0 : index
    %7 = vector.load %arg5[%c0_6, %c0_7, %c0_8] : memref<1x8x32xbf16, #tpu.memory_space<vmem>>, vector<1x8x32xbf16>
    %8 = vector.shape_cast %7 : vector<1x8x32xbf16> to vector<8x32xbf16>
    %c0_9 = arith.constant 0 : index
    %c0_10 = arith.constant 0 : index
    %c0_11 = arith.constant 0 : index
    %9 = vector.load %arg7[%c0_9, %c0_10, %c0_11] : memref<1x1x8xf32, #tpu.memory_space<vmem>>, vector<1x1x8xf32>
    %10 = vector.shape_cast %9 : vector<1x1x8xf32> to vector<1x8xf32>
    %cst = arith.constant 0.000000e+00 : f32
    %11 = vector.broadcast %cst : f32 to vector<1x8xf32>
    %12 = arith.cmpf one, %10, %11 : vector<1x8xf32>
    %c0_12 = arith.constant 0 : index
    %c0_13 = arith.constant 0 : index
    %c0_14 = arith.constant 0 : index
    %13 = vector.load %arg6[%c0_12, %c0_13, %c0_14] : memref<1x8x1xf32, #tpu.memory_space<vmem>>, vector<1x8x1xf32>
    %14 = vector.shape_cast %13 : vector<1x8x1xf32> to vector<8x1xf32>
    %cst_15 = arith.constant 0.000000e+00 : f32
    %15 = vector.broadcast %cst_15 : f32 to vector<8x1xf32>
    %16 = arith.cmpf one, %14, %15 : vector<8x1xf32>
    %17 = vector.broadcast %12 : vector<1x8xi1> to vector<8x8xi1>
    %18 = vector.broadcast %16 : vector<8x1xi1> to vector<8x8xi1>
    %19 = arith.andi %17, %18 : vector<8x8xi1>
    %c8_i32 = arith.constant 8 : i32
    %20 = arith.muli %arg1, %c8_i32 : i32
    %21 = tpu.iota {dimensions = array<i32: 0>} : vector<8x8xi32>
    %22 = vector.broadcast %20 : i32 to vector<8x8xi32>
    %23 = arith.addi %22, %21 : vector<8x8xi32>
    %c8_i32_16 = arith.constant 8 : i32
    %24 = arith.muli %arg2, %c8_i32_16 : i32
    %25 = tpu.iota {dimensions = array<i32: 1>} : vector<8x8xi32>
    %26 = vector.broadcast %24 : i32 to vector<8x8xi32>
    %27 = arith.addi %26, %25 : vector<8x8xi32>
    %28 = arith.cmpi sle, %27, %23 : vector<8x8xi32>
    %29 = arith.andi %19, %28 : vector<8x8xi1>
    %30 = vector.extract_strided_slice %4 {offsets = [0, 0], sizes = [8, 8], strides = [1, 1]} : vector<8x32xbf16> to vector<8x8xbf16>
    %31 = vector.extract_strided_slice %6 {offsets = [0, 0], sizes = [8, 8], strides = [1, 1]} : vector<8x32xbf16> to vector<8x8xbf16>
    %cst_17 = arith.constant dense<0.000000e+00> : vector<8x8xf32>
    %32 = tpu.matmul %30, %31, %cst_17 {dimension_numbers = #tpu.dot_dimension_numbers<[1], [1], [0], [0], [0, 0, 1, 0], [], []>} : vector<8x8xbf16>, vector<8x8xbf16>, vector<8x8xf32> -> vector<8x8xf32>
    %cst_18 = arith.constant 0.353553385 : f32
    %33 = vector.broadcast %cst_18 : f32 to vector<8x8xf32>
    %34 = arith.mulf %32, %33 : vector<8x8xf32>
    %cst_19 = arith.constant -1.000000e+20 : f32
    %35 = vector.broadcast %cst_19 : f32 to vector<8x8xf32>
    %36 = arith.select %29, %34, %35 : vector<8x8xi1>, vector<8x8xf32>
    %c0_20 = arith.constant 0 : index
    %c0_21 = arith.constant 0 : index
    %c0_22 = arith.constant 0 : index
    %37 = vector.load %arg9[%c0_20, %c0_21, %c0_22] : memref<4x8x1xf32, #tpu.memory_space<vmem>>, vector<1x8x1xf32>
    %38 = vector.shape_cast %37 : vector<1x8x1xf32> to vector<8x1xf32>
    %cst_23 = arith.constant dense<0xFF800000> : vector<8xf32>
    %39 = vector.multi_reduction <maximumf>, %36, %cst_23 [1] : vector<8x8xf32> to vector<8xf32>
    %40 = vector.shape_cast %39 : vector<8xf32> to vector<8x1xf32>
    %41 = arith.maximumf %38, %40 : vector<8x1xf32>
    %42 = arith.subf %38, %41 : vector<8x1xf32>
    %43 = math.exp %42 : vector<8x1xf32>
    %44 = vector.broadcast %41 : vector<8x1xf32> to vector<8x8xf32>
    %45 = arith.subf %36, %44 : vector<8x8xf32>
    %46 = math.exp %45 : vector<8x8xf32>
    %c0_24 = arith.constant 0 : index
    %c0_25 = arith.constant 0 : index
    %c0_26 = arith.constant 0 : index
    %47 = vector.load %arg10[%c0_24, %c0_25, %c0_26] : memref<4x8x1xf32, #tpu.memory_space<vmem>>, vector<1x8x1xf32>
    %48 = vector.shape_cast %47 : vector<1x8x1xf32> to vector<8x1xf32>
    %49 = arith.mulf %43, %48 : vector<8x1xf32>
    %cst_27 = arith.constant dense<0.000000e+00> : vector<8xf32>
    %50 = vector.multi_reduction <add>, %46, %cst_27 [1] : vector<8x8xf32> to vector<8xf32>
    %51 = vector.shape_cast %50 : vector<8xf32> to vector<8x1xf32>
    %52 = arith.addf %49, %51 : vector<8x1xf32>
    %c0_28 = arith.constant 0 : index
    %c0_29 = arith.constant 0 : index
    %c0_30 = arith.constant 0 : index
    %53 = vector.load %arg10[%c0_28, %c0_29, %c0_30] : memref<4x8x1xf32, #tpu.memory_space<vmem>>, vector<1x8x1xf32>
    %54 = vector.shape_cast %53 : vector<1x8x1xf32> to vector<8x1xf32>
    %55 = vector.shape_cast %52 : vector<8x1xf32> to vector<1x8x1xf32>
    tpu.vector_store %arg10[%c0_28, %c0_29, %c0_30], %55 {strides = array<i32>} : memref<4x8x1xf32, #tpu.memory_space<vmem>>, vector<1x8x1xf32>,
    %c0_31 = arith.constant 0 : index
    %c0_32 = arith.constant 0 : index
    %56 = vector.load %arg11[%c0_31, %c0_32] : memref<8x32xf32, #tpu.memory_space<vmem>>, vector<8x8xf32>
    %57 = vector.broadcast %43 : vector<8x1xf32> to vector<8x8xf32>
    %58 = arith.mulf %57, %56 : vector<8x8xf32>
    %59 = arith.truncf %46 : vector<8x8xf32> to vector<8x8xbf16>
    %60 = vector.extract_strided_slice %8 {offsets = [0, 0], sizes = [8, 8], strides = [1, 1]} : vector<8x32xbf16> to vector<8x8xbf16>
    %cst_33 = arith.constant dense<0.000000e+00> : vector<8x8xf32>
    %61 = tpu.matmul %59, %60, %cst_33 {dimension_numbers = #tpu.dot_dimension_numbers<[1], [0], [0], [1], [0, 0, 1, 1], [], []>} : vector<8x8xbf16>, vector<8x8xbf16>, vector<8x8xf32> -> vector<8x8xf32>
    %62 = arith.addf %58, %61 : vector<8x8xf32>
    %c0_34 = arith.constant 0 : index
    %c0_35 = arith.constant 0 : index
    %63 = vector.load %arg11[%c0_34, %c0_35] : memref<8x32xf32, #tpu.memory_space<vmem>>, vector<8x8xf32>
    tpu.vector_store %arg11[%c0_34, %c0_35], %62 {strides = array<i32>} : memref<8x32xf32, #tpu.memory_space<vmem>>, vector<8x8xf32>,
    %c0_36 = arith.constant 0 : index
    %c0_37 = arith.constant 0 : index
    %c0_38 = arith.constant 0 : index
    %64 = vector.load %arg9[%c0_36, %c0_37, %c0_38] : memref<4x8x1xf32, #tpu.memory_space<vmem>>, vector<1x8x1xf32>
    %65 = vector.shape_cast %64 : vector<1x8x1xf32> to vector<8x1xf32>
    %66 = vector.shape_cast %41 : vector<8x1xf32> to vector<1x8x1xf32>
    tpu.vector_store %arg9[%c0_36, %c0_37, %c0_38], %66 {strides = array<i32>} : memref<4x8x1xf32, #tpu.memory_space<vmem>>, vector<1x8x1xf32>,
    %67 = vector.extract_strided_slice %4 {offsets = [0, 8], sizes = [8, 8], strides = [1, 1]} : vector<8x32xbf16> to vector<8x8xbf16>
    %68 = vector.extract_strided_slice %6 {offsets = [0, 8], sizes = [8, 8], strides = [1, 1]} : vector<8x32xbf16> to vector<8x8xbf16>
    %cst_39 = arith.constant dense<0.000000e+00> : vector<8x8xf32>
    %69 = tpu.matmul %67, %68, %cst_39 {dimension_numbers = #tpu.dot_dimension_numbers<[1], [1], [0], [0], [0, 0, 1, 0], [], []>} : vector<8x8xbf16>, vector<8x8xbf16>, vector<8x8xf32> -> vector<8x8xf32>
    %cst_40 = arith.constant 0.353553385 : f32
    %70 = vector.broadcast %cst_40 : f32 to vector<8x8xf32>
    %71 = arith.mulf %69, %70 : vector<8x8xf32>
    %cst_41 = arith.constant -1.000000e+20 : f32
    %72 = vector.broadcast %cst_41 : f32 to vector<8x8xf32>
    %73 = arith.select %29, %71, %72 : vector<8x8xi1>, vector<8x8xf32>
    %c1 = arith.constant 1 : index
    %c0_42 = arith.constant 0 : index
    %c0_43 = arith.constant 0 : index
    %74 = vector.load %arg9[%c1, %c0_42, %c0_43] : memref<4x8x1xf32, #tpu.memory_space<vmem>>, vector<1x8x1xf32>
    %75 = vector.shape_cast %74 : vector<1x8x1xf32> to vector<8x1xf32>
    %cst_44 = arith.constant dense<0xFF800000> : vector<8xf32>
    %76 = vector.multi_reduction <maximumf>, %73, %cst_44 [1] : vector<8x8xf32> to vector<8xf32>
    %77 = vector.shape_cast %76 : vector<8xf32> to vector<8x1xf32>
    %78 = arith.maximumf %75, %77 : vector<8x1xf32>
    %79 = arith.subf %75, %78 : vector<8x1xf32>
    %80 = math.exp %79 : vector<8x1xf32>
    %81 = vector.broadcast %78 : vector<8x1xf32> to vector<8x8xf32>
    %82 = arith.subf %73, %81 : vector<8x8xf32>
    %83 = math.exp %82 : vector<8x8xf32>
    %c1_45 = arith.constant 1 : index
    %c0_46 = arith.constant 0 : index
    %c0_47 = arith.constant 0 : index
    %84 = vector.load %arg10[%c1_45, %c0_46, %c0_47] : memref<4x8x1xf32, #tpu.memory_space<vmem>>, vector<1x8x1xf32>
    %85 = vector.shape_cast %84 : vector<1x8x1xf32> to vector<8x1xf32>
    %86 = arith.mulf %80, %85 : vector<8x1xf32>
    %cst_48 = arith.constant dense<0.000000e+00> : vector<8xf32>
    %87 = vector.multi_reduction <add>, %83, %cst_48 [1] : vector<8x8xf32> to vector<8xf32>
    %88 = vector.shape_cast %87 : vector<8xf32> to vector<8x1xf32>
    %89 = arith.addf %86, %88 : vector<8x1xf32>
    %c1_49 = arith.constant 1 : index
    %c0_50 = arith.constant 0 : index
    %c0_51 = arith.constant 0 : index
    %90 = vector.load %arg10[%c1_49, %c0_50, %c0_51] : memref<4x8x1xf32, #tpu.memory_space<vmem>>, vector<1x8x1xf32>
    %91 = vector.shape_cast %90 : vector<1x8x1xf32> to vector<8x1xf32>
    %92 = vector.shape_cast %89 : vector<8x1xf32> to vector<1x8x1xf32>
    tpu.vector_store %arg10[%c1_49, %c0_50, %c0_51], %92 {strides = array<i32>} : memref<4x8x1xf32, #tpu.memory_space<vmem>>, vector<1x8x1xf32>,
    %c0_52 = arith.constant 0 : index
    %c8 = arith.constant 8 : index
    %93 = vector.load %arg11[%c0_52, %c8] : memref<8x32xf32, #tpu.memory_space<vmem>>, vector<8x8xf32>
    %94 = vector.broadcast %80 : vector<8x1xf32> to vector<8x8xf32>
    %95 = arith.mulf %94, %93 : vector<8x8xf32>
    %96 = arith.truncf %83 : vector<8x8xf32> to vector<8x8xbf16>
    %97 = vector.extract_strided_slice %8 {offsets = [0, 8], sizes = [8, 8], strides = [1, 1]} : vector<8x32xbf16> to vector<8x8xbf16>
    %cst_53 = arith.constant dense<0.000000e+00> : vector<8x8xf32>
    %98 = tpu.matmul %96, %97, %cst_53 {dimension_numbers = #tpu.dot_dimension_numbers<[1], [0], [0], [1], [0, 0, 1, 1], [], []>} : vector<8x8xbf16>, vector<8x8xbf16>, vector<8x8xf32> -> vector<8x8xf32>
    %99 = arith.addf %95, %98 : vector<8x8xf32>
    %c0_54 = arith.constant 0 : index
    %c8_55 = arith.constant 8 : index
    %100 = vector.load %arg11[%c0_54, %c8_55] : memref<8x32xf32, #tpu.memory_space<vmem>>, vector<8x8xf32>
    tpu.vector_store %arg11[%c0_54, %c8_55], %99 {strides = array<i32>} : memref<8x32xf32, #tpu.memory_space<vmem>>, vector<8x8xf32>,
    %c1_56 = arith.constant 1 : index
    %c0_57 = arith.constant 0 : index
    %c0_58 = arith.constant 0 : index
    %101 = vector.load %arg9[%c1_56, %c0_57, %c0_58] : memref<4x8x1xf32, #tpu.memory_space<vmem>>, vector<1x8x1xf32>
    %102 = vector.shape_cast %101 : vector<1x8x1xf32> to vector<8x1xf32>
    %103 = vector.shape_cast %78 : vector<8x1xf32> to vector<1x8x1xf32>
    tpu.vector_store %arg9[%c1_56, %c0_57, %c0_58], %103 {strides = array<i32>} : memref<4x8x1xf32, #tpu.memory_space<vmem>>, vector<1x8x1xf32>,
    %104 = vector.extract_strided_slice %4 {offsets = [0, 16], sizes = [8, 8], strides = [1, 1]} : vector<8x32xbf16> to vector<8x8xbf16>
    %105 = vector.extract_strided_slice %6 {offsets = [0, 16], sizes = [8, 8], strides = [1, 1]} : vector<8x32xbf16> to vector<8x8xbf16>
    %cst_59 = arith.constant dense<0.000000e+00> : vector<8x8xf32>
    %106 = tpu.matmul %104, %105, %cst_59 {dimension_numbers = #tpu.dot_dimension_numbers<[1], [1], [0], [0], [0, 0, 1, 0], [], []>} : vector<8x8xbf16>, vector<8x8xbf16>, vector<8x8xf32> -> vector<8x8xf32>
    %cst_60 = arith.constant 0.353553385 : f32
    %107 = vector.broadcast %cst_60 : f32 to vector<8x8xf32>
    %108 = arith.mulf %106, %107 : vector<8x8xf32>
    %cst_61 = arith.constant -1.000000e+20 : f32
    %109 = vector.broadcast %cst_61 : f32 to vector<8x8xf32>
    %110 = arith.select %29, %108, %109 : vector<8x8xi1>, vector<8x8xf32>
    %c2 = arith.constant 2 : index
    %c0_62 = arith.constant 0 : index
    %c0_63 = arith.constant 0 : index
    %111 = vector.load %arg9[%c2, %c0_62, %c0_63] : memref<4x8x1xf32, #tpu.memory_space<vmem>>, vector<1x8x1xf32>
    %112 = vector.shape_cast %111 : vector<1x8x1xf32> to vector<8x1xf32>
    %cst_64 = arith.constant dense<0xFF800000> : vector<8xf32>
    %113 = vector.multi_reduction <maximumf>, %110, %cst_64 [1] : vector<8x8xf32> to vector<8xf32>
    %114 = vector.shape_cast %113 : vector<8xf32> to vector<8x1xf32>
    %115 = arith.maximumf %112, %114 : vector<8x1xf32>
    %116 = arith.subf %112, %115 : vector<8x1xf32>
    %117 = math.exp %116 : vector<8x1xf32>
    %118 = vector.broadcast %115 : vector<8x1xf32> to vector<8x8xf32>
    %119 = arith.subf %110, %118 : vector<8x8xf32>
    %120 = math.exp %119 : vector<8x8xf32>
    %c2_65 = arith.constant 2 : index
    %c0_66 = arith.constant 0 : index
    %c0_67 = arith.constant 0 : index
    %121 = vector.load %arg10[%c2_65, %c0_66, %c0_67] : memref<4x8x1xf32, #tpu.memory_space<vmem>>, vector<1x8x1xf32>
    %122 = vector.shape_cast %121 : vector<1x8x1xf32> to vector<8x1xf32>
    %123 = arith.mulf %117, %122 : vector<8x1xf32>
    %cst_68 = arith.constant dense<0.000000e+00> : vector<8xf32>
    %124 = vector.multi_reduction <add>, %120, %cst_68 [1] : vector<8x8xf32> to vector<8xf32>
    %125 = vector.shape_cast %124 : vector<8xf32> to vector<8x1xf32>
    %126 = arith.addf %123, %125 : vector<8x1xf32>
    %c2_69 = arith.constant 2 : index
    %c0_70 = arith.constant 0 : index
    %c0_71 = arith.constant 0 : index
    %127 = vector.load %arg10[%c2_69, %c0_70, %c0_71] : memref<4x8x1xf32, #tpu.memory_space<vmem>>, vector<1x8x1xf32>
    %128 = vector.shape_cast %127 : vector<1x8x1xf32> to vector<8x1xf32>
    %129 = vector.shape_cast %126 : vector<8x1xf32> to vector<1x8x1xf32>
    tpu.vector_store %arg10[%c2_69, %c0_70, %c0_71], %129 {strides = array<i32>} : memref<4x8x1xf32, #tpu.memory_space<vmem>>, vector<1x8x1xf32>,
    %c0_72 = arith.constant 0 : index
    %c16 = arith.constant 16 : index
    %130 = vector.load %arg11[%c0_72, %c16] : memref<8x32xf32, #tpu.memory_space<vmem>>, vector<8x8xf32>
    %131 = vector.broadcast %117 : vector<8x1xf32> to vector<8x8xf32>
    %132 = arith.mulf %131, %130 : vector<8x8xf32>
    %133 = arith.truncf %120 : vector<8x8xf32> to vector<8x8xbf16>
    %134 = vector.extract_strided_slice %8 {offsets = [0, 16], sizes = [8, 8], strides = [1, 1]} : vector<8x32xbf16> to vector<8x8xbf16>
    %cst_73 = arith.constant dense<0.000000e+00> : vector<8x8xf32>
    %135 = tpu.matmul %133, %134, %cst_73 {dimension_numbers = #tpu.dot_dimension_numbers<[1], [0], [0], [1], [0, 0, 1, 1], [], []>} : vector<8x8xbf16>, vector<8x8xbf16>, vector<8x8xf32> -> vector<8x8xf32>
    %136 = arith.addf %132, %135 : vector<8x8xf32>
    %c0_74 = arith.constant 0 : index
    %c16_75 = arith.constant 16 : index
    %137 = vector.load %arg11[%c0_74, %c16_75] : memref<8x32xf32, #tpu.memory_space<vmem>>, vector<8x8xf32>
    tpu.vector_store %arg11[%c0_74, %c16_75], %136 {strides = array<i32>} : memref<8x32xf32, #tpu.memory_space<vmem>>, vector<8x8xf32>,
    %c2_76 = arith.constant 2 : index
    %c0_77 = arith.constant 0 : index
    %c0_78 = arith.constant 0 : index
    %138 = vector.load %arg9[%c2_76, %c0_77, %c0_78] : memref<4x8x1xf32, #tpu.memory_space<vmem>>, vector<1x8x1xf32>
    %139 = vector.shape_cast %138 : vector<1x8x1xf32> to vector<8x1xf32>
    %140 = vector.shape_cast %115 : vector<8x1xf32> to vector<1x8x1xf32>
    tpu.vector_store %arg9[%c2_76, %c0_77, %c0_78], %140 {strides = array<i32>} : memref<4x8x1xf32, #tpu.memory_space<vmem>>, vector<1x8x1xf32>,
    %141 = vector.extract_strided_slice %4 {offsets = [0, 24], sizes = [8, 8], strides = [1, 1]} : vector<8x32xbf16> to vector<8x8xbf16>
    %142 = vector.extract_strided_slice %6 {offsets = [0, 24], sizes = [8, 8], strides = [1, 1]} : vector<8x32xbf16> to vector<8x8xbf16>
    %cst_79 = arith.constant dense<0.000000e+00> : vector<8x8xf32>
    %143 = tpu.matmul %141, %142, %cst_79 {dimension_numbers = #tpu.dot_dimension_numbers<[1], [1], [0], [0], [0, 0, 1, 0], [], []>} : vector<8x8xbf16>, vector<8x8xbf16>, vector<8x8xf32> -> vector<8x8xf32>
    %cst_80 = arith.constant 0.353553385 : f32
    %144 = vector.broadcast %cst_80 : f32 to vector<8x8xf32>
    %145 = arith.mulf %143, %144 : vector<8x8xf32>
    %cst_81 = arith.constant -1.000000e+20 : f32
    %146 = vector.broadcast %cst_81 : f32 to vector<8x8xf32>
    %147 = arith.select %29, %145, %146 : vector<8x8xi1>, vector<8x8xf32>
    %c3 = arith.constant 3 : index
    %c0_82 = arith.constant 0 : index
    %c0_83 = arith.constant 0 : index
    %148 = vector.load %arg9[%c3, %c0_82, %c0_83] : memref<4x8x1xf32, #tpu.memory_space<vmem>>, vector<1x8x1xf32>
    %149 = vector.shape_cast %148 : vector<1x8x1xf32> to vector<8x1xf32>
    %cst_84 = arith.constant dense<0xFF800000> : vector<8xf32>
    %150 = vector.multi_reduction <maximumf>, %147, %cst_84 [1] : vector<8x8xf32> to vector<8xf32>
    %151 = vector.shape_cast %150 : vector<8xf32> to vector<8x1xf32>
    %152 = arith.maximumf %149, %151 : vector<8x1xf32>
    %153 = arith.subf %149, %152 : vector<8x1xf32>
    %154 = math.exp %153 : vector<8x1xf32>
    %155 = vector.broadcast %152 : vector<8x1xf32> to vector<8x8xf32>
    %156 = arith.subf %147, %155 : vector<8x8xf32>
    %157 = math.exp %156 : vector<8x8xf32>
    %c3_85 = arith.constant 3 : index
    %c0_86 = arith.constant 0 : index
    %c0_87 = arith.constant 0 : index
    %158 = vector.load %arg10[%c3_85, %c0_86, %c0_87] : memref<4x8x1xf32, #tpu.memory_space<vmem>>, vector<1x8x1xf32>
    %159 = vector.shape_cast %158 : vector<1x8x1xf32> to vector<8x1xf32>
    %160 = arith.mulf %154, %159 : vector<8x1xf32>
    %cst_88 = arith.constant dense<0.000000e+00> : vector<8xf32>
    %161 = vector.multi_reduction <add>, %157, %cst_88 [1] : vector<8x8xf32> to vector<8xf32>
    %162 = vector.shape_cast %161 : vector<8xf32> to vector<8x1xf32>
    %163 = arith.addf %160, %162 : vector<8x1xf32>
    %c3_89 = arith.constant 3 : index
    %c0_90 = arith.constant 0 : index
    %c0_91 = arith.constant 0 : index
    %164 = vector.load %arg10[%c3_89, %c0_90, %c0_91] : memref<4x8x1xf32, #tpu.memory_space<vmem>>, vector<1x8x1xf32>
    %165 = vector.shape_cast %164 : vector<1x8x1xf32> to vector<8x1xf32>
    %166 = vector.shape_cast %163 : vector<8x1xf32> to vector<1x8x1xf32>
    tpu.vector_store %arg10[%c3_89, %c0_90, %c0_91], %166 {strides = array<i32>} : memref<4x8x1xf32, #tpu.memory_space<vmem>>, vector<1x8x1xf32>,
    %c0_92 = arith.constant 0 : index
    %c24 = arith.constant 24 : index
    %167 = vector.load %arg11[%c0_92, %c24] : memref<8x32xf32, #tpu.memory_space<vmem>>, vector<8x8xf32>
    %168 = vector.broadcast %154 : vector<8x1xf32> to vector<8x8xf32>
    %169 = arith.mulf %168, %167 : vector<8x8xf32>
    %170 = arith.truncf %157 : vector<8x8xf32> to vector<8x8xbf16>
    %171 = vector.extract_strided_slice %8 {offsets = [0, 24], sizes = [8, 8], strides = [1, 1]} : vector<8x32xbf16> to vector<8x8xbf16>
    %cst_93 = arith.constant dense<0.000000e+00> : vector<8x8xf32>
    %172 = tpu.matmul %170, %171, %cst_93 {dimension_numbers = #tpu.dot_dimension_numbers<[1], [0], [0], [1], [0, 0, 1, 1], [], []>} : vector<8x8xbf16>, vector<8x8xbf16>, vector<8x8xf32> -> vector<8x8xf32>
    %173 = arith.addf %169, %172 : vector<8x8xf32>
    %c0_94 = arith.constant 0 : index
    %c24_95 = arith.constant 24 : index
    %174 = vector.load %arg11[%c0_94, %c24_95] : memref<8x32xf32, #tpu.memory_space<vmem>>, vector<8x8xf32>
    tpu.vector_store %arg11[%c0_94, %c24_95], %173 {strides = array<i32>} : memref<8x32xf32, #tpu.memory_space<vmem>>, vector<8x8xf32>,
    %c3_96 = arith.constant 3 : index
    %c0_97 = arith.constant 0 : index
    %c0_98 = arith.constant 0 : index
    %175 = vector.load %arg9[%c3_96, %c0_97, %c0_98] : memref<4x8x1xf32, #tpu.memory_space<vmem>>, vector<1x8x1xf32>
    %176 = vector.shape_cast %175 : vector<1x8x1xf32> to vector<8x1xf32>
    %177 = vector.shape_cast %152 : vector<8x1xf32> to vector<1x8x1xf32>
    tpu.vector_store %arg9[%c3_96, %c0_97, %c0_98], %177 {strides = array<i32>} : memref<4x8x1xf32, #tpu.memory_space<vmem>>, vector<1x8x1xf32>,
    %c0_i32_99 = arith.constant 0 : i32
    %178 = arith.cmpi eq, %arg2, %c0_i32_99 : i32
    %179 = arith.extui %178 : i1 to i32
    %c0_i32_100 = arith.constant 0 : i32
    %180 = arith.cmpi ne, %179, %c0_i32_100 : i32
    scf.if %180 {
      %c0_101 = arith.constant 0 : index
      %c0_102 = arith.constant 0 : index
      %181 = vector.load %arg11[%c0_101, %c0_102] : memref<8x32xf32, #tpu.memory_space<vmem>>, vector<8x8xf32>
      %c0_103 = arith.constant 0 : index
      %c0_104 = arith.constant 0 : index
      %c0_105 = arith.constant 0 : index
      %182 = vector.load %arg10[%c0_103, %c0_104, %c0_105] : memref<4x8x1xf32, #tpu.memory_space<vmem>>, vector<1x8x1xf32>
      %183 = vector.shape_cast %182 : vector<1x8x1xf32> to vector<8x1xf32>
      %184 = tpu.reciprocal %183 {approx = true} : vector<8x1xf32> -> vector<8x1xf32>
      %185 = vector.broadcast %184 : vector<8x1xf32> to vector<8x8xf32>
      %186 = arith.mulf %181, %185 : vector<8x8xf32>
      %c0_106 = arith.constant 0 : index
      %c0_107 = arith.constant 0 : index
      %187 = vector.load %arg11[%c0_106, %c0_107] : memref<8x32xf32, #tpu.memory_space<vmem>>, vector<8x8xf32>
      tpu.vector_store %arg11[%c0_106, %c0_107], %186 {strides = array<i32>} : memref<8x32xf32, #tpu.memory_space<vmem>>, vector<8x8xf32>,
      %c0_108 = arith.constant 0 : index
      %c8_109 = arith.constant 8 : index
      %188 = vector.load %arg11[%c0_108, %c8_109] : memref<8x32xf32, #tpu.memory_space<vmem>>, vector<8x8xf32>
      %c1_110 = arith.constant 1 : index
      %c0_111 = arith.constant 0 : index
      %c0_112 = arith.constant 0 : index
      %189 = vector.load %arg10[%c1_110, %c0_111, %c0_112] : memref<4x8x1xf32, #tpu.memory_space<vmem>>, vector<1x8x1xf32>
      %190 = vector.shape_cast %189 : vector<1x8x1xf32> to vector<8x1xf32>
      %191 = tpu.reciprocal %190 {approx = true} : vector<8x1xf32> -> vector<8x1xf32>
      %192 = vector.broadcast %191 : vector<8x1xf32> to vector<8x8xf32>
      %193 = arith.mulf %188, %192 : vector<8x8xf32>
      %c0_113 = arith.constant 0 : index
      %c8_114 = arith.constant 8 : index
      %194 = vector.load %arg11[%c0_113, %c8_114] : memref<8x32xf32, #tpu.memory_space<vmem>>, vector<8x8xf32>
      tpu.vector_store %arg11[%c0_113, %c8_114], %193 {strides = array<i32>} : memref<8x32xf32, #tpu.memory_space<vmem>>, vector<8x8xf32>,
      %c0_115 = arith.constant 0 : index
      %c16_116 = arith.constant 16 : index
      %195 = vector.load %arg11[%c0_115, %c16_116] : memref<8x32xf32, #tpu.memory_space<vmem>>, vector<8x8xf32>
      %c2_117 = arith.constant 2 : index
      %c0_118 = arith.constant 0 : index
      %c0_119 = arith.constant 0 : index
      %196 = vector.load %arg10[%c2_117, %c0_118, %c0_119] : memref<4x8x1xf32, #tpu.memory_space<vmem>>, vector<1x8x1xf32>
      %197 = vector.shape_cast %196 : vector<1x8x1xf32> to vector<8x1xf32>
      %198 = tpu.reciprocal %197 {approx = true} : vector<8x1xf32> -> vector<8x1xf32>
      %199 = vector.broadcast %198 : vector<8x1xf32> to vector<8x8xf32>
      %200 = arith.mulf %195, %199 : vector<8x8xf32>
      %c0_120 = arith.constant 0 : index
      %c16_121 = arith.constant 16 : index
      %201 = vector.load %arg11[%c0_120, %c16_121] : memref<8x32xf32, #tpu.memory_space<vmem>>, vector<8x8xf32>
      tpu.vector_store %arg11[%c0_120, %c16_121], %200 {strides = array<i32>} : memref<8x32xf32, #tpu.memory_space<vmem>>, vector<8x8xf32>,
      %c0_122 = arith.constant 0 : index
      %c24_123 = arith.constant 24 : index
      %202 = vector.load %arg11[%c0_122, %c24_123] : memref<8x32xf32, #tpu.memory_space<vmem>>, vector<8x8xf32>
      %c3_124 = arith.constant 3 : index
      %c0_125 = arith.constant 0 : index
      %c0_126 = arith.constant 0 : index
      %203 = vector.load %arg10[%c3_124, %c0_125, %c0_126] : memref<4x8x1xf32, #tpu.memory_space<vmem>>, vector<1x8x1xf32>
      %204 = vector.shape_cast %203 : vector<1x8x1xf32> to vector<8x1xf32>
      %205 = tpu.reciprocal %204 {approx = true} : vector<8x1xf32> -> vector<8x1xf32>
      %206 = vector.broadcast %205 : vector<8x1xf32> to vector<8x8xf32>
      %207 = arith.mulf %202, %206 : vector<8x8xf32>
      %c0_127 = arith.constant 0 : index
      %c24_128 = arith.constant 24 : index
      %208 = vector.load %arg11[%c0_127, %c24_128] : memref<8x32xf32, #tpu.memory_space<vmem>>, vector<8x8xf32>
      tpu.vector_store %arg11[%c0_127, %c24_128], %207 {strides = array<i32>} : memref<8x32xf32, #tpu.memory_space<vmem>>, vector<8x8xf32>,
      %c0_129 = arith.constant 0 : index
      %c0_130 = arith.constant 0 : index
      %209 = vector.load %arg11[%c0_129, %c0_130] : memref<8x32xf32, #tpu.memory_space<vmem>>, vector<8x32xf32>
      %210 = arith.truncf %209 : vector<8x32xf32> to vector<8x32xbf16>
      %c0_131 = arith.constant 0 : index
      %c0_132 = arith.constant 0 : index
      %c0_133 = arith.constant 0 : index
      %211 = vector.load %arg8[%c0_131, %c0_132, %c0_133] : memref<1x8x32xbf16, #tpu.memory_space<vmem>>, vector<1x8x32xbf16>
      %212 = vector.shape_cast %211 : vector<1x8x32xbf16> to vector<8x32xbf16>
      %213 = vector.shape_cast %210 : vector<8x32xbf16> to vector<1x8x32xbf16>
      tpu.vector_store %arg8[%c0_131, %c0_132, %c0_133], %213 {strides = array<i32>} : memref<1x8x32xbf16, #tpu.memory_space<vmem>>, vector<1x8x32xbf16>,
    } else {
    }
    return
  }
  func.func @transform_0(%arg0: i32, %arg1: i32, %arg2: i32) -> (i32, i32, i32) {
    %c0_i32 = arith.constant 0 : i32
    %c0_i32_0 = arith.constant 0 : i32
    return %arg0, %arg1, %c0_i32 : i32, i32, i32
  }
  func.func @transform_1(%arg0: i32, %arg1: i32, %arg2: i32) -> (i32, i32, i32) {
    %c0_i32 = arith.constant 0 : i32
    %c0_i32_0 = arith.constant 0 : i32
    return %arg0, %arg2, %c0_i32 : i32, i32, i32
  }
  func.func @transform_2(%arg0: i32, %arg1: i32, %arg2: i32) -> (i32, i32, i32) {
    %c0_i32 = arith.constant 0 : i32
    %c0_i32_0 = arith.constant 0 : i32
    return %arg0, %arg2, %c0_i32 : i32, i32, i32
  }
  func.func @transform_3(%arg0: i32, %arg1: i32, %arg2: i32) -> (i32, i32, i32) {
    %c0_i32 = arith.constant 0 : i32
    %c0_i32_0 = arith.constant 0 : i32
    return %arg0, %arg1, %c0_i32 : i32, i32, i32
  }
  func.func @transform_4(%arg0: i32, %arg1: i32, %arg2: i32) -> (i32, i32, i32) {
    %c0_i32 = arith.constant 0 : i32
    %c0_i32_0 = arith.constant 0 : i32
    return %arg0, %c0_i32, %arg2 : i32, i32, i32
  }
  func.func @transform_5(%arg0: i32, %arg1: i32, %arg2: i32) -> (i32, i32, i32) {
    %c0_i32 = arith.constant 0 : i32
    %c0_i32_0 = arith.constant 0 : i32
    return %arg0, %arg1, %c0_i32 : i32, i32, i32
  }
}

</mosaic_0001>

<bundles_post_ra>
// kernel: transformer_forward.44
= control target key start
LH: loop header
LB: loop body
LE: loop exit
PB: predicated region body
PF: predicated region fallthrough
CT: control target
= control target key end

     0   :  { %vm19_vm0 = vcmask 523264   ;;  %v202_v1 = vmov 0.0   ;;  %vm47_vm1 = vcmask 261120   ;;  %vm171_vm9 = vcmask 519168   ;;  %s258_s1 = inlined_call_operand.vmem [shape: bf16[32,64], index: 1, kind: input, shape index: {}]   ;;  %s259_s2 = inlined_call_operand.vmem [shape: f32[1,64], index: 2, kind: input, shape index: {}]   ;;  %s260_s0 = inlined_call_operand.vmem [shape: bf16[16,32], index: 0, kind: input, shape index: {}]   ;;  %s261_s3 = inlined_call_operand.vmem [shape: bf16[16,64], index: 3, kind: output, shape index: {}]  }
   0x1   :  { %v195_v0 = vld [vmem:[%s258_s1 + $0x8] sm:$0xff]  ;;  %20 = vst.msk [vmem:[#allocation2] sm:$0xff] %vm19_vm0, %v202_v1  ;;  %v194_v2 = vld [vmem:[%s258_s1] sm:$0xff] }
   0x2   :  { %21 = vst.msk [vmem:[#allocation2 + $0x8] sm:$0xff] %vm19_vm0, %v202_v1  ;;  %57 = vmatpush.bf16.msra.mxu0 %v195_v0  ;;  %v193_v3 = vld [vmem:[%s260_s0] sm:$0xff] }
   0x3   :  { %v197_v8 = vld [vmem:[%s259_s2] ss:$0 sm:$0xff] }
   0x6   :  { %58 = vmatpush.bf16.msra.mxu0 %v194_v2 }
   0x8   :  { %v22_v4 = vld [vmem:[#allocation2] sm:$0xff] }
   0x9   :  { %190 = vmatmul.msk.bf16.vlgmr.msra.gmra.mxu0 %vm47_vm1, %v193_v3  ;;  %v23_v7 = vld [vmem:[#allocation2 + $0x8] sm:$0xff] }
  0x86   :  { %v60_v5 = vpop.f32.mrf.mxu0 }
  0x87   :  { %v65_v6 = vadd.f32 %v60_v5, %v22_v4 }
  0x89   :  { %68 = vst.msk [vmem:[#allocation2] sm:$0xff] %vm19_vm0, %v65_v6 }
  0x8e   :  { %v62_v9 = vpop.f32.mrf.mxu0 }
  0x8f   :  { %v66_v10 = vadd.f32 %v62_v9, %v23_v7 }
  0x90   :  { %v73_v11 = vld [vmem:[#allocation2] sm:$0xff] }
  0x91   :  { %v238_v12 = vadd.f32 %v197_v8, %v73_v11  ;;  %69 = vst.msk [vmem:[#allocation2 + $0x8] sm:$0xff] %vm19_vm0, %v66_v10 }
  0x93   :  { %v83_v13 = vmul.f32 0.70710677, %v238_v12 }
  0x95   :  { %v85_v14 = vmul.f32 %v83_v13, %v83_v13 }
  0x97   :  { %v86_v15 = vmin.f32 %v85_v14, 16.0 }
  0x98   :  { %v74_v16 = vld [vmem:[#allocation2 + $0x8] sm:$0xff] }
  0x99   :  { %v87_v17 = vmul.f32 2.1237322e-06, %v86_v15  ;;  %v98_v18 = vmul.f32 3.8918573e-05, %v86_v15  ;;  %v242_v19 = vadd.f32 %v197_v8, %v74_v16 }
  0x9b   :  { %v88_v20 = vadd.f32 0.00028619796, %v87_v17  ;;  %v99_v21 = vadd.f32 0.001143296, %v98_v18  ;;  %v245_v22 = vmul.f32 0.70710677, %v242_v19 }
  0x9c   :  { %v81_v18 = vmul.f32 0.5, %v238_v12  ;;  %v82_v12 = vmul.f32 0.5, %v242_v19 }
  0x9d   :  { %v89_v23 = vmul.f32 %v88_v20, %v86_v15  ;;  %v100_v24 = vmul.f32 %v99_v21, %v86_v15  ;;  %v125_v25 = vmul.f32 %v245_v22, %v245_v22 }
  0x9f   :  { %v101_v26 = vadd.f32 0.014752088, %v100_v24  ;;  %v90_v27 = vadd.f32 0.0036580483, %v89_v23  ;;  %v126_v28 = vmin.f32 %v125_v25, 16.0 }
  0xa1   :  { %v102_v29 = vmul.f32 %v101_v26, %v86_v15  ;;  %v127_v30 = vmul.f32 2.1237322e-06, %v126_v28  ;;  %v138_v31 = vmul.f32 3.8918573e-05, %v126_v28  ;;  %v91_v33 = vmul.f32 %v90_v27, %v86_v15 }
  0xa3   :  { %v103_v32 = vadd.f32 0.112945676, %v102_v29  ;;  %v128_v34 = vadd.f32 0.00028619796, %v127_v30  ;;  %v139_v35 = vadd.f32 0.001143296, %v138_v31 }
  0xa4   :  { %v92_v40 = vadd.f32 0.05243302, %v91_v33 }
  0xa5   :  { %v104_v36 = vmul.f32 %v103_v32, %v86_v15  ;;  %v129_v37 = vmul.f32 %v128_v34, %v126_v28  ;;  %v140_v38 = vmul.f32 %v139_v35, %v126_v28 }
  0xa6   :  { %v93_v46 = vmul.f32 %v92_v40, %v86_v15 }
  0xa7   :  { %v105_v39 = vadd.f32 0.4994258, %v104_v36  ;;  %v141_v41 = vadd.f32 0.014752088, %v140_v38  ;;  %v130_v43 = vadd.f32 0.0036580483, %v129_v37 }
  0xa8   :  { %v94_v50 = vadd.f32 0.18741608, %v93_v46 }
  0xa9   :  { %v106_v42 = vmul.f32 %v105_v39, %v86_v15  ;;  %v142_v44 = vmul.f32 %v141_v41, %v126_v28  ;;  %v131_v48 = vmul.f32 %v130_v43, %v126_v28 }
  0xaa   :  { %v95_v55 = vmul.f32 %v94_v50, %v86_v15 }
  0xab   :  { %v107_v45 = vadd.f32 1.0, %v106_v42  ;;  %v143_v47 = vadd.f32 0.112945676, %v142_v44  ;;  %v132_v52 = vadd.f32 0.05243302, %v131_v48 }
  0xac   :  { %v96_v61 = vadd.f32 1.1283791, %v95_v55 }
  0xad   :  { %198 = vrcp.f32 %v107_v45  ;;  %v144_v49 = vmul.f32 %v143_v47, %v126_v28  ;;  %v133_v58 = vmul.f32 %v132_v52, %v126_v28  ;;  %v119_v60 = vand.u32 2147483648, %v107_v45 }
  0xae   :  { %v117_v63 = vand.u32 2147483647, %v107_v45  ;;  %vm113_vm3 = vweird.f32 %v107_v45  ;;  %v97_v4 = vmul.f32 %v96_v61, %v83_v13 }
  0xaf   :  { %v145_v51 = vadd.f32 0.4994258, %v144_v49  ;;  %v134_v0 = vadd.f32 0.18741608, %v133_v58  ;;  %v120_v2 = vor.u32 1.1754944e-38, %v119_v60 }
  0xb0   :  { %vm118_vm5 = vcmp.eq.f32.partialorder %v117_v63, 8.507059e+37 }
  0xb1   :  { %v146_v53 = vmul.f32 %v145_v51, %v126_v28  ;;  %v135_v7 = vmul.f32 %v134_v0, %v126_v28 }
  0xb3   :  { %v199_v54 = vpop.eup %198  ;;  %v147_v57 = vadd.f32 1.0, %v146_v53  ;;  %v136_v15 = vadd.f32 1.1283791, %v135_v7 }
  0xb4   :  { %v109_v56 = vmul.f32 %v199_v54, %v107_v45  ;;  %vm114_vm2 = vweird.f32 %v199_v54 }
  0xb5   :  { %200 = vrcp.f32 %v147_v57  ;;  %vm115_vm4 = vmor %vm113_vm3, %vm114_vm2  ;;  %v159_v14 = vand.u32 2147483648, %v147_v57  ;;  %v157_v17 = vand.u32 2147483647, %v147_v57  ;;  %vm153_vm7 = vweird.f32 %v147_v57 }
  0xb6   :  { %v110_v59 = vsub.f32 1.0, %v109_v56  ;;  %v137_v24 = vmul.f32 %v136_v15, %v245_v22 }
  0xb7   :  { %v160_v13 = vor.u32 1.1754944e-38, %v159_v14  ;;  %vm158_vm10 = vcmp.eq.f32.partialorder %v157_v17, 8.507059e+37 }
  0xb8   :  { %v111_v62 = vmul.f32 %v199_v54, %v110_v59 }
  0xba   :  { %v112_v1 = vadd.f32 %v199_v54, %v111_v62 }
  0xbb   :  { %v201_v3 = vpop.eup %200 }
  0xbc   :  { %v116_v5 = vsel %vm115_vm4, %v199_v54, %v112_v1  ;;  %v149_v8 = vmul.f32 %v201_v3, %v147_v57  ;;  %vm154_vm6 = vweird.f32 %v201_v3 }
  0xbd   :  { %v121_v6 = vsel %vm118_vm5, %v120_v2, %v116_v5  ;;  %vm155_vm8 = vmor %vm153_vm7, %vm154_vm6 }
  0xbe   :  { %v122_v9 = vmul.f32 %v121_v6, %v97_v4  ;;  %v150_v10 = vsub.f32 1.0, %v149_v8 }
  0xc0   :  { %v191_v11 = vclamps-f32 %v122_v9, 1.0  ;;  %v151_v16 = vmul.f32 %v201_v3, %v150_v10 }
  0xc2   :  { %v165_v20 = vadd.f32 1.0, %v191_v11  ;;  %v152_v21 = vadd.f32 %v201_v3, %v151_v16 }
  0xc4   :  { %v167_v23 = vmul.f32 %v165_v20, %v81_v18  ;;  %v156_v25 = vsel %vm155_vm8, %v201_v3, %v152_v21 }
  0xc5   :  { %v161_v27 = vsel %vm158_vm10, %v160_v13, %v156_v25 }
  0xc6   :  { %v169_v26 = vpack.c.bf16 %v167_v23, %v167_v23  ;;  %v162_v28 = vmul.f32 %v161_v27, %v137_v24 }
  0xc8   :  { %172 = vst.msk [vmem:[%s261_s3] sm:$0xf] %vm171_vm9, %v169_v26  ;;  %v192_v29 = vclamps-f32 %v162_v28, 1.0 }
  0xca   :  { %v166_v30 = vadd.f32 1.0, %v192_v29 }
  0xcc   :  { %v168_v31 = vmul.f32 %v166_v30, %v82_v12 }
  0xce   :  { %v170_v32 = vpack.c.bf16 %v168_v31, %v168_v31 }
  0xd0   :  { %173 = vst.msk [vmem:[%s261_s3 + $0x4] sm:$0xf] %vm171_vm9, %v170_v32 }

// kernel: transformer_forward.39
= control target key start
LH: loop header
LB: loop body
LE: loop exit
PB: predicated region body
PF: predicated region fallthrough
CT: control target
= control target key end

     0   :  { %vm16_vm0 = vcmask 261120   ;;  %v97_v1 = vmov 0.0   ;;  %vm73_vm1 = vcmask 257024   ;;  %s133_s1 = inlined_call_operand.vmem [shape: bf16[32,32], index: 1, kind: input, shape index: {}]   ;;  %s134_s0 = inlined_call_operand.vmem [shape: bf16[16,32], index: 0, kind: input, shape index: {}]   ;;  %s135_s2 = inlined_call_operand.vmem [shape: bf16[16,32], index: 2, kind: output, shape index: {}]  }
   0x1   :  { %v95_v0 = vld [vmem:[%s133_s1 + $0x8] sm:$0xff]  ;;  %17 = vst.msk [vmem:[#allocation2] sm:$0xff] %vm16_vm0, %v97_v1  ;;  %v94_v2 = vld [vmem:[%s133_s1] sm:$0xff] }
   0x2   :  { %18 = vst.msk [vmem:[#allocation2 + $0x8] sm:$0xff] %vm16_vm0, %v97_v1  ;;  %54 = vmatpush.bf16.msra.mxu0 %v95_v0  ;;  %v93_v3 = vld [vmem:[%s134_s0] sm:$0xff] }
   0x6   :  { %55 = vmatpush.bf16.msra.mxu0 %v94_v2 }
   0x8   :  { %v19_v4 = vld [vmem:[#allocation2] sm:$0xff] }
   0x9   :  { %92 = vmatmul.msk.bf16.vlgmr.msra.gmra.mxu0 %vm16_vm0, %v93_v3  ;;  %v20_v7 = vld [vmem:[#allocation2 + $0x8] sm:$0xff] }
  0x86   :  { %v57_v5 = vpop.f32.mrf.mxu0 }
  0x87   :  { %v62_v6 = vadd.f32 %v57_v5, %v19_v4 }
  0x89   :  { %64 = vst.msk [vmem:[#allocation2] sm:$0xff] %vm16_vm0, %v62_v6 }
  0x8e   :  { %v59_v8 = vpop.f32.mrf.mxu0 }
  0x8f   :  { %v63_v9 = vadd.f32 %v59_v8, %v20_v7 }
  0x90   :  { %v69_v10 = vld [vmem:[#allocation2] sm:$0xff] }
  0x91   :  { %v71_v11 = vpack.c.bf16 %v69_v10, %v69_v10  ;;  %65 = vst.msk [vmem:[#allocation2 + $0x8] sm:$0xff] %vm16_vm0, %v63_v9 }
  0x93   :  { %74 = vst.msk [vmem:[%s135_s2] sm:$0xf] %vm73_vm1, %v71_v11 }
  0x98   :  { %v70_v12 = vld [vmem:[#allocation2 + $0x8] sm:$0xff] }
  0x99   :  { %v72_v13 = vpack.c.bf16 %v70_v12, %v70_v12 }
  0x9b   :  { %75 = vst.msk [vmem:[%s135_s2 + $0x4] sm:$0xf] %vm73_vm1, %v72_v13 }

// kernel: transformer_forward.43
= control target key start
LH: loop header
LB: loop body
LE: loop exit
PB: predicated region body
PF: predicated region fallthrough
CT: control target
= control target key end

     0   :  { %vm28_vm0 = vcmask 261120   ;;  %v198_v1 = vmov 0.0   ;;  %v199_v22 = vmov 32.0   ;;  %vm160_vm6 = vcmask 257024   ;;  %s271_s1 = inlined_call_operand.vmem [shape: bf16[32,32], index: 1, kind: input, shape index: {}]   ;;  %s272_s0 = inlined_call_operand.vmem [shape: bf16[16,32], index: 0, kind: input, shape index: {}]   ;;  %s273_s2 = inlined_call_operand.vmem [shape: f32[1,32], index: 2, kind: input, shape index: {}]   ;;  %s274_s3 = inlined_call_operand.vmem [shape: bf16[16,32], index: 3, kind: input, shape index: {}]   ;;  %s275_s4 = inlined_call_operand.vmem [shape: f32[1,32], index: 4, kind: input, shape index: {}]   ;;  %s276_s5 = inlined_call_operand.vmem [shape: f32[1,32], index: 5, kind: input, shape index: {}]   ;;  %s277_s6 = inlined_call_operand.vmem [shape: bf16[16,32], index: 6, kind: output, shape index: {}]  }
   0x1   :  { %v182_v0 = vld [vmem:[%s271_s1 + $0x8] sm:$0xff]  ;;  %29 = vst.msk [vmem:[#allocation2] sm:$0xff] %vm28_vm0, %v198_v1  ;;  %v181_v2 = vld [vmem:[%s271_s1] sm:$0xff]  ;;  %192 = vrcp.f32 %v199_v22 }
   0x2   :  { %30 = vst.msk [vmem:[#allocation2 + $0x8] sm:$0xff] %vm28_vm0, %v198_v1  ;;  %66 = vmatpush.bf16.msra.mxu0 %v182_v0  ;;  %v180_v3 = vld [vmem:[%s272_s0] sm:$0xff] }
   0x3   :  { %v184_v8 = vld [vmem:[%s274_s3] sm:$0xff]  }
   0x4   :  { %v189_v9 = vld [vmem:[%s273_s2] ss:$0 sm:$0xff]  ;;  %v185_v12 = vunpack.c.l.bf16 %v184_v8  ;;  %v186_v17 = vunpack.c.h.bf16 %v184_v8 }
   0x5   :  { %v190_v53 = vld [vmem:[%s275_s4] ss:$0 sm:$0xff] }
   0x6   :  { %67 = vmatpush.bf16.msra.mxu0 %v181_v2  ;;  %v191_v56 = vld [vmem:[%s276_s5] ss:$0 sm:$0xff] }
   0x7   :  { %v193_v23 = vpop.eup %192 }
   0x8   :  { %v31_v4 = vld [vmem:[#allocation2] sm:$0xff]  ;;  %v102_v24 = vmul.f32 32.0, %v193_v23  ;;  %vm106_vm1 = vweird.f32 %v193_v23 }
   0x9   :  { %179 = vmatmul.msk.bf16.vlgmr.msra.gmra.mxu0 %vm28_vm0, %v180_v3  ;;  %v32_v7 = vld [vmem:[#allocation2 + $0x8] sm:$0xff] }
   0xa   :  { %v103_v25 = vsub.f32 1.0, %v102_v24 }
   0xc   :  { %v104_v26 = vmul.f32 %v193_v23, %v103_v25 }
   0xe   :  { %v105_v27 = vadd.f32 %v193_v23, %v104_v26 }
  0x10   :  { %v107_v28 = vsel %vm106_vm1, %v193_v23, %v105_v27 }
  0x86   :  { %v69_v5 = vpop.f32.mrf.mxu0 }
  0x87   :  { %v74_v6 = vadd.f32 %v69_v5, %v31_v4 }
  0x89   :  { %76 = vst.msk [vmem:[#allocation2] sm:$0xff] %vm28_vm0, %v74_v6 }
  0x8e   :  { %v71_v10 = vpop.f32.mrf.mxu0 }
  0x8f   :  { %v75_v11 = vadd.f32 %v71_v10, %v32_v7 }
  0x90   :  { %v81_v13 = vld [vmem:[#allocation2] sm:$0xff] }
  0x91   :  { %77 = vst.msk [vmem:[#allocation2 + $0x8] sm:$0xff] %vm28_vm0, %v75_v11  ;;  %v87_v14 = vadd.f32 %v189_v9, %v81_v13 }
  0x93   :  { %v93_v15 = vadd.f32 %v185_v12, %v87_v14 }
  0x95   :  { %v95_v16 = vsel %vm28_vm0, %v93_v15, 0.0 }
  0x96   :  { %96 = vadd.xlane.f32.xlu0 %v95_v16 }
  0x98   :  { %v82_v18 = vld [vmem:[#allocation2 + $0x8] sm:$0xff] }
  0x99   :  { %v88_v19 = vadd.f32 %v189_v9, %v82_v18 }
  0x9b   :  { %v94_v20 = vadd.f32 %v186_v17, %v88_v19 }
  0x9d   :  { %v98_v21 = vsel %vm28_vm0, %v94_v20, 0.0 }
  0x9e   :  { %99 = vadd.xlane.f32.xlu0 %v98_v21 }
 0x109   :  { %v97_v29 = vpop.xlane.xlu0 %96 }
 0x10a   :  { %v108_v30 = vmul.f32 %v107_v28, %v97_v29 }
 0x10c   :  { %v110_v31 = vsub.f32 %v93_v15, %v108_v30 }
 0x10e   :  { %v112_v32 = vmul.f32 %v110_v31, %v110_v31 }
 0x110   :  { %v114_v33 = vsel %vm28_vm0, %v112_v32, 0.0 }
 0x111   :  { %115 = vadd.xlane.f32.xlu1 %v114_v33  ;;  %v100_v34 = vpop.xlane.xlu0 %99 }
 0x112   :  { %v109_v35 = vmul.f32 %v107_v28, %v100_v34 }
 0x114   :  { %v111_v36 = vsub.f32 %v94_v20, %v109_v35 }
 0x116   :  { %v113_v37 = vmul.f32 %v111_v36, %v111_v36 }
 0x118   :  { %v117_v38 = vsel %vm28_vm0, %v113_v37, 0.0 }
 0x119   :  { %118 = vadd.xlane.f32.xlu1 %v117_v38 }
 0x184   :  { %v116_v39 = vpop.xlane.xlu1 %115 }
 0x185   :  { %v120_v40 = vmul.f32 %v116_v39, %v107_v28 }
 0x187   :  { %v122_v41 = vadd.f32 1e-05, %v120_v40 }
 0x189   :  { %194 = vrsqrt.f32 %v122_v41  ;;  %vm130_vm3 = vweird.f32 %v122_v41 }
 0x18c   :  { %v119_v42 = vpop.xlane.xlu1 %118 }
 0x18d   :  { %v121_v43 = vmul.f32 %v119_v42, %v107_v28 }
 0x18f   :  { %v195_v44 = vpop.eup %194  ;;  %v123_v45 = vadd.f32 1e-05, %v121_v43 }
 0x190   :  { %v125_v46 = vmul.f32 %v195_v44, %v122_v41  ;;  %vm131_vm2 = vweird.f32 %v195_v44 }
 0x191   :  { %196 = vrsqrt.f32 %v123_v45  ;;  %vm132_vm4 = vmor %vm130_vm3, %vm131_vm2  ;;  %vm140_vm7 = vweird.f32 %v123_v45 }
 0x192   :  { %v126_v47 = vmul.f32 %v195_v44, %v125_v46 }
 0x194   :  { %v127_v48 = vmul.f32 0.5, %v126_v47 }
 0x196   :  { %v128_v49 = vsub.f32 1.5, %v127_v48 }
 0x197   :  { %v197_v50 = vpop.eup %196 }
 0x198   :  { %v129_v51 = vmul.f32 %v195_v44, %v128_v49  ;;  %v135_v52 = vmul.f32 %v197_v50, %v123_v45  ;;  %vm141_vm5 = vweird.f32 %v197_v50 }
 0x199   :  { %vm142_vm8 = vmor %vm140_vm7, %vm141_vm5 }
 0x19a   :  { %v133_v54 = vsel %vm132_vm4, %v195_v44, %v129_v51  ;;  %v136_v55 = vmul.f32 %v197_v50, %v135_v52 }
 0x19b   :  { %v144_v57 = vmul.f32 %v133_v54, %v110_v31 }
 0x19c   :  { %v137_v58 = vmul.f32 0.5, %v136_v55 }
 0x19d   :  { %v150_v59 = vmul.f32 %v190_v53, %v144_v57 }
 0x19e   :  { %v138_v60 = vsub.f32 1.5, %v137_v58 }
 0x19f   :  { %v156_v61 = vadd.f32 %v191_v56, %v150_v59 }
 0x1a0   :  { %v139_v62 = vmul.f32 %v197_v50, %v138_v60 }
 0x1a1   :  { %v158_v63 = vpack.c.bf16 %v156_v61, %v156_v61 }
 0x1a2   :  { %v143_v0 = vsel %vm142_vm8, %v197_v50, %v139_v62 }
 0x1a3   :  { %161 = vst.msk [vmem:[%s277_s6] sm:$0xf] %vm160_vm6, %v158_v63  ;;  %v145_v1 = vmul.f32 %v143_v0, %v111_v36 }
 0x1a5   :  { %v151_v2 = vmul.f32 %v190_v53, %v145_v1 }
 0x1a7   :  { %v157_v3 = vadd.f32 %v191_v56, %v151_v2 }
 0x1a9   :  { %v159_v4 = vpack.c.bf16 %v157_v3, %v157_v3 }
 0x1ab   :  { %162 = vst.msk [vmem:[%s277_s6 + $0x4] sm:$0xf] %vm160_vm6, %v159_v4 }

// kernel: transformer_forward.42
= control target key start
LH: loop header
LB: loop body
LE: loop exit
PB: predicated region body
PF: predicated region fallthrough
CT: control target
= control target key end

     0   :  { %s1070_s18 = smov 0   ;;  %s1072_s19 = smov 0   ;;  %s1211_s0 = inlined_call_operand.vmem [shape: bf16[2,8,32], index: 0, kind: input, shape index: {}]   ;;  %s1212_s1 = inlined_call_operand.vmem [shape: bf16[2,8,32], index: 1, kind: input, shape index: {}]   ;;  %s1213_s2 = inlined_call_operand.vmem [shape: bf16[2,8,32], index: 2, kind: input, shape index: {}]   ;;  %s1214_s3 = inlined_call_operand.vmem [shape: f32[2,8,1], index: 3, kind: input, shape index: {}]   ;;  %s1215_s4 = inlined_call_operand.vmem [shape: f32[2,1,8], index: 4, kind: input, shape index: {}]   ;;  %s1216_s5 = inlined_call_operand.vmem [shape: bf16[2,8,32], index: 5, kind: output, shape index: {}]  }
   0x1   :  { %s1074_s20 = smov 0  }
   0x2 LB: > { %s34_s21 = sadd.s32 1, %s1025_s19  ;;  %p931_p0 = scmp.ge.s32.totalorder %s1029_s20, 1  ;;  %s1029_s20 = sphi %s1074_s20, %s15_s20   ;;  %s1025_s19 = sphi %s1072_s19, %s1220_s19   ;;  %s1021_s18 = sphi %s1070_s18, %s1219_s18  }
   0x3   : > { %p36_p1 = scmp.ge.s32.totalorder %s34_s21, 2  ;;  %p267_p2 = scmp.lt.s32.totalorder %s1029_s20, 3 }
   0x5   : > { %s1222_s21 = smov (%p36_p1, %s34_s21), 0  ;;  %p268_p3 = pnand %p931_p0, %p267_p2 }
   0x6   : > { %p326_p4 = scmp.lt.s32.totalorder (!%p268_p3), %s1021_s18, 1  ;;  %s1032_s8 = smov (!%p268_p3), 120  }
   0x7   : > { %271 = sbr.rel (%p268_p3) target bundleno = 1125 (0x465), region = 40  ;;  %s1033_s9 = smov (!%p268_p3), 112  }
   0x8   : > { %s1034_s10 = smov (!%p268_p3), 104   ;;  %s1037_s17 = smov (!%p268_p3), 8  }
   0xc   : > { %v1031_v0 = vmov 0   ;;  %s1224_s18 = smov (!%p326_p4, %s1021_s18), 1  ;;  %vm399_vm0 = vcmask 64512   ;;  %vm372_vm2 = vcmask 7168   ;;  %v1035_v10 = vmov -inf  }
   0xd   : > { %980 = vset.pattern.permute.xlu0 %v1031_v0  ;;  %981 = vset.pattern.permute.xlu1 %v1031_v0  ;;  %s1091_s22 = sshll.u32 %s1224_s18, 2  ;;  %s935_s23 = sshll.u32 %s1224_s18, 3  ;;  %373 = vst.msk [vmem:[#allocation2] sm:$0xff] %vm372_vm2, %v1035_v10  ;;  %v1036_v24 = vmov 0.0   ;;  %vm456_vm7 = vcmask 1043456   ;;  %vm381_vm8 = vcmask 261120  }
   0xe   : > { %982 = vset.pattern.permute.xlu2 %v1031_v0  ;;  %s339_s26 = scalar_lea.vmem %s1212_s1, %s1091_s22  ;;  %s332_s29 = scalar_lea.vmem %s1211_s0, %s1091_s22  ;;  %374 = vst.msk [vmem:[#allocation2 + $0x8] sm:$0xff] %vm372_vm2, %v1035_v10  ;;  %vm569_vm9 = vcmask 130112   ;;  %vm656_vm10 = vcmask 195712   ;;  %vm743_vm11 = vcmask 261312   ;;  %vm791_vm12 = vcmask 257024  }
   0xf   : > { %v384_v1 = vld [vmem:[%s339_s26] sm:$0xf]  ;;  %s353_s7 = scalar_lea.vmem %s1214_s3, %s935_s23  ;;  %375 = vst.msk [vmem:[#allocation2 + $0x10] sm:$0xff] %vm372_vm2, %v1035_v10  ;;  %s359_s13 = scalar_lea.vmem %s1215_s4, %s1224_s18 }
  0x10   : > { %v404_v2 = vsel %vm399_vm0, %v384_v1, 0  ;;  %v482_v3 = vunpack.c.l.b16 %v384_v1  ;;  %v383_v4 = vld [vmem:[%s332_s29] sm:$0xf]  ;;  %376 = vst.msk [vmem:[#allocation2 + $0x18] sm:$0xff] %vm372_vm2, %v1035_v10  ;;  %s346_s16 = scalar_lea.vmem %s1213_s2, %s1091_s22  ;;  %s1038_s18 = smov 24  }
  0x11   : > { %v388_v5 = vld [vmem:[%s353_s7] sm:$0xff]  ;;  %413 = vmatpush.bf16.xpose.msra.mxu0 %v404_v2  ;;  %v477_v6 = vunpack.c.l.b16 %v383_v4  ;;  %377 = vst.msk [vmem:[#allocation3] sm:$0xff] %vm372_vm2, %v1036_v24  ;;  %s1039_s23 = smov 16   ;;  %s366_s26 = scalar_lea.vmem %s1216_s5, %s1091_s22 }
  0x12   : > { %vm389_vm1 = vcmp.ne.f32.partialorder %v388_v5, 0.0  ;;  %v483_v7 = vpack.c.b16 %v482_v3, %v482_v3  ;;  %v386_v11 = vld [vmem:[%s359_s13] sm:$0x1]  ;;  %378 = vst.msk [vmem:[#allocation3 + $0x8] sm:$0xff] %vm372_vm2, %v1036_v24 }
  0x13   : > { %v393_v8 = vsel %vm389_vm1, 1, %v1031_v0  ;;  %v478_v9 = vpack.c.b16 %v477_v6, %v477_v6  ;;  %vm387_vm3 = vcmp.ne.f32.partialorder %v386_v11, 0.0  ;;  %379 = vst.msk [vmem:[#allocation3 + $0x10] sm:$0xff] %vm372_vm2, %v1036_v24  ;;  %v385_v33 = vld [vmem:[%s346_s16] sm:$0xf] }
  0x14   : > { %395 = vperm.xlu0 %980, %v393_v8   ;;  %484 = vrot.lane.b32.xlu1 %v483_v7, %s1032_s8  ;;  %v390_v14 = vsel %vm387_vm3, 1, %v1031_v0  ;;  %380 = vst.msk [vmem:[#allocation3 + $0x18] sm:$0xff] %vm372_vm2, %v1036_v24  ;;  %v421_v25 = vld [vmem:[#allocation2] sm:$0xff]  ;;  %v458_v35 = vsel %vm456_vm7, %v385_v33, 0  ;;  %v541_v37 = vunpack.c.l.b16 %v385_v33 }
  0x15   : > { %479 = vrot.lane.b32.xlu2 %v478_v9, %s1032_s8  ;;  %v391_v16 = vperm.slane %v390_v14, 0  ;;  %467 = vmatpush.bf16.msra.mxu1 %v458_v35  ;;  %382 = vst.msk [vmem:[#allocation4] sm:$0xff] %vm381_vm8, %v1036_v24  ;;  %v508_v47 = vld [vmem:[#allocation2 + $0x8] sm:$0xff] }
  0x16   : > { %v542_v38 = vpack.c.b16 %v541_v37, %v541_v37 }
  0x17   : > { %vm392_vm4 = vcmp.eq.s32.totalorder %v391_v16, 1 }
  0x18   : > { %937 = vmatmul.msk.bf16.vlgmr.msra.gmra.mxu0 %vm399_vm0, %v383_v4 }
  0x1c   : > { %v445_v59 = vld [vmem:[#allocation4] sm:$0xff] }
  0x1d   : > { %574 = vrot.lane.b32.xlu2 %v483_v7, %s1033_s9 }
  0x25   : > { %661 = vrot.lane.b32.xlu2 %v483_v7, %s1034_s10 }
  0x6f   : > { %v480_v15 = vpop.permute.xlu2 %479 }
  0x77   : > { %v575_v34 = vpop.permute.xlu2 %574 }
  0x78   : > { %v580_v36 = vsel %vm399_vm0, %v575_v34, 0 }
  0x79   : > { %589 = vmatpush.bf16.xpose.msrb.mxu1 %v580_v36 }
  0x7f   : > { %v662_v42 = vpop.permute.xlu2 %661 }
  0x80   : > { %v667_v43 = vsel %vm399_vm0, %v662_v42, 0 }
  0x81   : > { %676 = vmatpush.bf16.xpose.msrb.mxu0 %v667_v43 }
  0x86   : > { %v485_v12 = vpop.permute.xlu1 %484  ;;  %v396_v17 = vpop.permute.xlu0 %395 }
  0x87   : > { %v490_v13 = vsel %vm399_vm0, %v485_v12, 0  ;;  %vm397_vm5 = vcmp.eq.s32.totalorder %v396_v17, 1  ;;  %v685_v12 = vld [vmem:[#allocation2 + $0x18] sm:$0xff] }
  0x88   : > { %499 = vmatpush.bf16.xpose.msra.mxu2 %v490_v13  ;;  %vm1121_vm6 = vmand %vm392_vm4, %vm397_vm5 }
  0x8f   : > { %939 = vmatmul.msk.bf16.vlgmr.msra.gmra.mxu2 %vm399_vm0, %v480_v15  ;;  %v598_v15 = vld [vmem:[#allocation2 + $0x10] sm:$0xff] }
  0x95   : > { %v415_v19 = vpop.f32.mrf.mxu0 }
  0x96   : > { %v419_v20 = vmul.f32 0.35355338, %v415_v19 }
  0x98   : > { %v420_v21 = vsel %vm1121_vm6, %v419_v20, -1e+20 }
  0x99   : > { %v422_v22 = vsel %vm399_vm0, %v420_v21, -inf }
  0x9a   : > { %423 = vmax.xlane.f32.xlu0 %v422_v22 }
  0x9d   : > { %v417_v23 = vpop.f32.mrf.mxu0 }
 0x10d   : > { %v424_v26 = vpop.xlane.xlu0 %423 }
 0x10e   : > { %v425_v27 = vmax.f32 %v421_v25, %v424_v26 }
 0x110   : > { %475 = vst.msk [vmem:[#allocation2] sm:$0xff] %vm372_vm2, %v425_v27  ;;  %431 = vperm.xlu1 %981, %v425_v27   ;;  %v426_v39 = vsub.f32 %v421_v25, %v425_v27 }
 0x112   : > { %v501_v28 = vpop.f32.mrf.mxu2  ;;  %v427_v40 = vmul.f32 1.442695, %v426_v39 }
 0x113   : > { %v505_v29 = vmul.f32 0.35355338, %v501_v28 }
 0x114   : > { %983 = vpow2.f32 %v427_v40 }
 0x115   : > { %v1135_v30 = vsel %vm1121_vm6, %v505_v29, -1e+20 }
 0x116   : > { %v509_v31 = vsel %vm399_vm0, %v1135_v30, -inf }
 0x117   : > { %510 = vmax.xlane.f32.xlu2 %v509_v31 }
 0x118   : > { %572 = vrot.lane.b32.xlu1 %v478_v9, %s1033_s9 }
 0x11a   : > { %v503_v32 = vpop.f32.mrf.mxu2  ;;  %v1149_v41 = vpop.eup %983 }
 0x120   : > { %659 = vrot.lane.b32.xlu1 %v478_v9, %s1034_s10 }
 0x12f   : > { %543 = vrot.lane.b32.xlu2 %v542_v38, %s1032_s8 }
 0x137   : > { %717 = vrot.lane.b32.xlu2 %v542_v38, %s1034_s10 }
 0x13f   : > { %448 = vperm.xlu2 %982, %v1149_v41  }
 0x182   : > { %v432_v44 = vpop.permute.xlu1 %431 }
 0x183   : > { %v434_v45 = vsub.f32 %v420_v21, %v432_v44 }
 0x185   : > { %v435_v46 = vmul.f32 1.442695, %v434_v45 }
 0x187   : > { %985 = vpow2.f32 %v435_v46  ;;  %v437_v46 = vld [vmem:[#allocation3] sm:$0xff] }
 0x18a   : > { %v511_v48 = vpop.xlane.xlu2 %510  ;;  %v573_v49 = vpop.permute.xlu1 %572 }
 0x18b   : > { %v512_v50 = vmax.f32 %v508_v47, %v511_v48 }
 0x18d   : > { %v986_v51 = vpop.eup %985  ;;  %v513_v52 = vsub.f32 %v508_v47, %v512_v50  ;;  %571 = vst.msk [vmem:[#allocation2 + $0x8] sm:$0xff] %vm372_vm2, %v512_v50  ;;  %v438_v47 = vmul.f32 %v1149_v41, %v437_v46 }
 0x18e   : > { %v452_v53 = vpack.c.bf16 %v986_v51, %v986_v51  ;;  %v439_v23 = vsel %vm399_vm0, %v986_v51, 0.0  ;;  %v525_v51 = vld [vmem:[#allocation3 + $0x8] sm:$0xff] }
 0x18f   : > { %v514_v54 = vmul.f32 1.442695, %v513_v52 }
 0x190   : > { %938 = vmatmul.msk.bf16.vlgmr.msra.gmra.mxu1 %vm399_vm0, %v452_v53 }
 0x191   : > { %987 = vpow2.f32 %v514_v54 }
 0x192   : > { %v660_v55 = vpop.permute.xlu1 %659  ;;  %v544_v57 = vpop.permute.xlu2 %543 }
 0x193   : > { %943 = vmatmul.msk.bf16.vlgmr.msrb.gmra.mxu0 %vm399_vm0, %v660_v55  ;;  %v549_v11 = vsel %vm456_vm7, %v544_v57, 0 }
 0x194   : > { %558 = vmatpush.bf16.msra.mxu3 %v549_v11  ;;  %v615_v11 = vld [vmem:[#allocation3 + $0x10] sm:$0xff] }
 0x197   : > { %v1156_v56 = vpop.eup %987 }
 0x198   : > { %535 = vperm.xlu2 %982, %v1156_v56   ;;  %v526_v54 = vmul.f32 %v1156_v56, %v525_v51 }
 0x19a   : > { %v718_v58 = vpop.permute.xlu2 %717 }
 0x19b   : > { %v723_v31 = vsel %vm456_vm7, %v718_v58, 0 }
 0x19c   : > { %732 = vmatpush.bf16.msrb.mxu2 %v723_v31 }
 0x1a0   : > { %941 = vmatmul.msk.bf16.vlgmr.msrb.gmra.mxu1 %vm399_vm0, %v573_v49 }
 0x1a2   : > { %v449_v60 = vpop.permute.xlu2 %448 }
 0x1a3   : > { %v451_v61 = vmul.f32 %v449_v60, %v445_v59 }
 0x20d   : > { %v469_v62 = vpop.f32.mrf.mxu1 }
 0x20e   : > { %v473_v63 = vadd.f32 %v469_v62, %v451_v61  ;;  %v702_v61 = vld [vmem:[#allocation3 + $0x18] sm:$0xff] }
 0x210   : > { %474 = vst.msk [vmem:[#allocation4] sm:$0xff] %vm399_vm0, %v473_v63  ;;  %v678_v0 = vpop.f32.mrf.mxu0 }
 0x211   : > { %v682_v1 = vmul.f32 0.35355338, %v678_v0 }
 0x213   : > { %v683_v2 = vsel %vm1121_vm6, %v682_v1, -1e+20  ;;  %v536_v1 = vpop.permute.xlu2 %535 }
 0x214   : > { %v686_v3 = vsel %vm399_vm0, %v683_v2, -inf }
 0x215   : > { %v471_v4 = vpop.f32.mrf.mxu1  ;;  %687 = vmax.xlane.f32.xlu0 %v686_v3 }
 0x217   : > { %v532_v56 = vld [vmem:[#allocation4] sm:$0xff] }
 0x218   : > { %v680_v5 = vpop.f32.mrf.mxu0 }
 0x21d   : > { %v591_v6 = vpop.f32.mrf.mxu1 }
 0x21e   : > { %v595_v7 = vmul.f32 0.35355338, %v591_v6 }
 0x220   : > { %v596_v8 = vsel %vm1121_vm6, %v595_v7, -1e+20 }
 0x221   : > { %v599_v9 = vsel %vm399_vm0, %v596_v8, -inf }
 0x222   : > { %600 = vmax.xlane.f32.xlu1 %v599_v9 }
 0x225   : > { %v593_v10 = vpop.f32.mrf.mxu1 }
 0x229   : > { %518 = vperm.xlu0 %980, %v512_v50  }
 0x231   : > { %630 = vrot.lane.b32.xlu0 %v542_v38, %s1033_s9 }
 0x288   : > { %v688_v13 = vpop.xlane.xlu0 %687 }
 0x289   : > { %v689_v14 = vmax.f32 %v685_v12, %v688_v13 }
 0x28b   : > { %745 = vst.msk [vmem:[#allocation2 + $0x18] sm:$0xff] %vm372_vm2, %v689_v14  ;;  %695 = vperm.xlu0 %980, %v689_v14   ;;  %v690_v27 = vsub.f32 %v685_v12, %v689_v14 }
 0x28d   : > { %v691_v28 = vmul.f32 1.442695, %v690_v27 }
 0x295   : > { %v601_v16 = vpop.xlane.xlu1 %600 }
 0x296   : > { %v602_v17 = vmax.f32 %v598_v15, %v601_v16 }
 0x298   : > { %658 = vst.msk [vmem:[#allocation2 + $0x10] sm:$0xff] %vm372_vm2, %v602_v17  ;;  %608 = vperm.xlu1 %981, %v602_v17   ;;  %v603_v24 = vsub.f32 %v598_v15, %v602_v17 }
 0x29a   : > { %v604_v25 = vmul.f32 1.442695, %v603_v24 }
 0x29b   : > { %v519_v18 = vpop.permute.xlu0 %518 }
 0x29c   : > { %v521_v19 = vsub.f32 %v1135_v30, %v519_v18 }
 0x29e   : > { %v522_v20 = vmul.f32 1.442695, %v521_v19 }
 0x2a0   : > { %989 = vpow2.f32 %v522_v20 }
 0x2a1   : > { %991 = vpow2.f32 %v604_v25 }
 0x2a2   : > { %993 = vpow2.f32 %v691_v28 }
 0x2a3   : > { %v631_v32 = vpop.permute.xlu0 %630 }
 0x2a4   : > { %v636_v33 = vsel %vm456_vm7, %v631_v32, 0 }
 0x2a5   : > { %645 = vmatpush.bf16.msrb.mxu3 %v636_v33 }
 0x2a6   : > { %v990_v21 = vpop.eup %989 }
 0x2a7   : > { %v539_v22 = vpack.c.bf16 %v990_v21, %v990_v21  ;;  %v527_v26 = vsel %vm399_vm0, %v990_v21, 0.0  ;;  %v1175_v29 = vpop.eup %991 }
 0x2a8   : > { %v994_v30 = vpop.eup %993  ;;  %v616_v12 = vmul.f32 %v1175_v29, %v615_v11 }
 0x2a9   : > { %940 = vmatmul.msk.bf16.vlgmr.msra.gmra.mxu3 %vm399_vm0, %v539_v22  ;;  %v703_v62 = vmul.f32 %v994_v30, %v702_v61 }
 0x2b5   : > { %440 = vadd.xlane.f32.xlu0 %v439_v23 }
 0x2c2   : > { %528 = vadd.xlane.f32.xlu1 %v527_v26 }
 0x2c9   : > { %625 = vperm.xlu0 %980, %v1175_v29  }
 0x2d1   : > { %712 = vperm.xlu0 %980, %v994_v30  }
 0x2fd   : > { %v696_v34 = vpop.permute.xlu0 %695 }
 0x2fe   : > { %v698_v35 = vsub.f32 %v683_v2, %v696_v34  ;;  %v538_v2 = vmul.f32 %v536_v1, %v532_v56 }
 0x300   : > { %v699_v36 = vmul.f32 1.442695, %v698_v35 }
 0x302   : > { %995 = vpow2.f32 %v699_v36 }
 0x308   : > { %v996_v37 = vpop.eup %995 }
 0x309   : > { %v704_v38 = vsel %vm399_vm0, %v996_v37, 0.0  ;;  %v716_v39 = vpack.c.bf16 %v996_v37, %v996_v37 }
 0x30a   : > { %v609_v40 = vpop.permute.xlu1 %608  ;;  %705 = vadd.xlane.f32.xlu1 %v704_v38 }
 0x30b   : > { %v611_v42 = vsub.f32 %v596_v8, %v609_v40  ;;  %944 = vmatmul.msk.bf16.vlgmr.msrb.gmra.mxu2 %vm399_vm0, %v716_v39 }
 0x30d   : > { %v612_v43 = vmul.f32 1.442695, %v611_v42 }
 0x30f   : > { %997 = vpow2.f32 %v612_v43 }
 0x315   : > { %v998_v44 = vpop.eup %997 }
 0x316   : > { %v629_v45 = vpack.c.bf16 %v998_v44, %v998_v44  ;;  %v617_v60 = vsel %vm399_vm0, %v998_v44, 0.0 }
 0x318   : > { %942 = vmatmul.msk.bf16.vlgmr.msrb.gmra.mxu3 %vm399_vm0, %v629_v45 }
 0x328   : > { %v441_v48 = vpop.xlane.xlu0 %440 }
 0x329   : > { %v442_v49 = vadd.f32 %v441_v48, %v438_v47 }
 0x32b   : > { %444 = vst.msk [vmem:[#allocation3] sm:$0xff] %vm372_vm2, %v442_v49 }
 0x32c   : > { %v560_v50 = vpop.f32.mrf.mxu3 }
 0x32d   : > { %565 = vrot.lane.b32.xlu2 %v560_v50, %s1037_s17 }
 0x332   : > { %v750_v52 = vld [vmem:[#allocation3] sm:$0xff] }
 0x333   : > { %999 = vrcp.f32 %v750_v52 }
 0x334   : > { %v562_v53 = vpop.f32.mrf.mxu3 }
 0x335   : > { %v529_v55 = vpop.xlane.xlu1 %528 }
 0x336   : > { %v530_v57 = vadd.f32 %v529_v55, %v526_v54 }
 0x338   : > { %531 = vst.msk [vmem:[#allocation3 + $0x8] sm:$0xff] %vm372_vm2, %v530_v57 }
 0x339   : > { %v1000_v58 = vpop.eup %999 }
 0x33a   : > { %754 = vperm.xlu0 %980, %v1000_v58  }
 0x33b   : > { %v626_v18 = vpop.permute.xlu0 %625 }
 0x33f   : > { %v760_v41 = vld [vmem:[#allocation3 + $0x8] sm:$0xff] }
 0x340   : > { %1001 = vrcp.f32 %v760_v41 }
 0x343   : > { %v713_v22 = vpop.permute.xlu0 %712 }
 0x346   : > { %v1002_v59 = vpop.eup %1001 }
 0x347   : > { %764 = vperm.xlu0 %980, %v1002_v59  }
 0x356   : > { %618 = vadd.xlane.f32.xlu2 %v617_v60 }
 0x37d   : > { %v706_v63 = vpop.xlane.xlu1 %705 }
 0x37e   : > { %v707_v0 = vadd.f32 %v706_v63, %v703_v62 }
 0x380   : > { %708 = vst.msk [vmem:[#allocation3 + $0x18] sm:$0xff] %vm372_vm2, %v707_v0 }
 0x387   : > { %v566_v3 = vpop.permute.xlu2 %565  ;;  %v780_v4 = vld [vmem:[#allocation3 + $0x18] sm:$0xff] }
 0x388   : > { %v568_v5 = vadd.f32 %v566_v3, %v538_v2  ;;  %1003 = vrcp.f32 %v780_v4 }
 0x38a   : > { %570 = vst.msk [vmem:[#allocation4] sm:$0xff] %vm569_vm9, %v568_v5 }
 0x38e   : > { %v1004_v6 = vpop.eup %1003  ;;  %v734_v7 = vpop.f32.mrf.mxu2 }
 0x38f   : > { %739 = vrot.lane.b32.xlu2 %v734_v7, %s1038_s18  ;;  %784 = vperm.xlu0 %980, %v1004_v6  }
 0x391   : > { %v622_v17 = vld [vmem:[#allocation4] sm:$0xff] }
 0x392   : > { %v628_v19 = vmul.f32 %v626_v18, %v622_v17 }
 0x396   : > { %v736_v8 = vpop.f32.mrf.mxu2 }
 0x39b   : > { %v647_v9 = vpop.f32.mrf.mxu3 }
 0x39c   : > { %652 = vrot.lane.b32.xlu1 %v647_v9, %s1039_s23 }
 0x3a3   : > { %v649_v10 = vpop.f32.mrf.mxu3 }
 0x3ac   : > { %v755_v27 = vpop.permute.xlu0 %754 }
 0x3b9   : > { %v765_v30 = vpop.permute.xlu0 %764 }
 0x3c9   : > { %v619_v13 = vpop.xlane.xlu2 %618 }
 0x3ca   : > { %v620_v14 = vadd.f32 %v619_v13, %v616_v12 }
 0x3cc   : > { %621 = vst.msk [vmem:[#allocation3 + $0x10] sm:$0xff] %vm372_vm2, %v620_v14 }
 0x3d3   : > { %v770_v15 = vld [vmem:[#allocation3 + $0x10] sm:$0xff] }
 0x3d4   : > { %1005 = vrcp.f32 %v770_v15 }
 0x3da   : > { %v1006_v16 = vpop.eup %1005 }
 0x3db   : > { %774 = vperm.xlu1 %981, %v1006_v16  }
 0x3e9   : > { %v740_v25 = vpop.permute.xlu2 %739 }
 0x401   : > { %v785_v36 = vpop.permute.xlu0 %784 }
 0x40e   : > { %v653_v20 = vpop.permute.xlu1 %652 }
 0x40f   : > { %v655_v21 = vadd.f32 %v653_v20, %v628_v19 }
 0x411   : > { %657 = vst.msk [vmem:[#allocation4] sm:$0xff] %vm656_vm10, %v655_v21 }
 0x418   : > { %v709_v23 = vld [vmem:[#allocation4] sm:$0xff] }
 0x419   : > { %v715_v24 = vmul.f32 %v713_v22, %v709_v23 }
 0x41b   : > { %v742_v26 = vadd.f32 %v740_v25, %v715_v24 }
 0x41d   : > { %744 = vst.msk [vmem:[#allocation4] sm:$0xff] %vm743_vm11, %v742_v26 }
 0x424   : > { %v749_v28 = vld [vmem:[#allocation4] sm:$0xff] }
 0x425   : > { %v757_v29 = vmul.f32 %v755_v27, %v749_v28 }
 0x427   : > { %758 = vst.msk [vmem:[#allocation4] sm:$0xff] %vm399_vm0, %v757_v29 }
 0x42e   : > { %v759_v31 = vld [vmem:[#allocation4] sm:$0xff] }
 0x42f   : > { %v767_v32 = vmul.f32 %v765_v30, %v759_v31 }
 0x431   : > { %768 = vst.msk [vmem:[#allocation4] sm:$0xff] %vm569_vm9, %v767_v32 }
 0x438   : > { %v769_v34 = vld [vmem:[#allocation4] sm:$0xff] }
 0x44d   : > { %v775_v33 = vpop.permute.xlu1 %774 }
 0x44e   : > { %v777_v35 = vmul.f32 %v775_v33, %v769_v34 }
 0x450   : > { %778 = vst.msk [vmem:[#allocation4] sm:$0xff] %vm656_vm10, %v777_v35 }
 0x457   : > { %v779_v37 = vld [vmem:[#allocation4] sm:$0xff] }
 0x458   : > { %v787_v38 = vmul.f32 %v785_v36, %v779_v37 }
 0x45a   : > { %788 = vst.msk [vmem:[#allocation4] sm:$0xff] %vm743_vm11, %v787_v38 }
 0x461   : > { %v789_v39 = vld [vmem:[#allocation4] sm:$0xff] }
 0x462   : > { %v790_v40 = vpack.c.bf16 %v789_v39, %v789_v39 }
 0x464   : > { %792 = vst.msk [vmem:[%s366_s26] sm:$0xf] %vm791_vm12, %v790_v40 }
 0x465 PF: > { %s15_s20 = sadd.s32 1, %s1029_s20   ;;  %s1219_s18 = smov %s1025_s19 }
 0x466   : > { %p12_p5 = scmp.ge.s32.totalorder %s15_s20, 4   ;;  %s1220_s19 = smov %s1222_s21 }
 0x468   :  { %14 = sbr.rel (!%p12_p5) target bundleno = 2 (0x2), region = 96 }

// kernel: transformer_forward.77
= control target key start
LH: loop header
LB: loop body
LE: loop exit
PB: predicated region body
PF: predicated region fallthrough
CT: control target
= control target key end

     0   :  { %vm20_vm0 = vcmask 490496   ;;  %v149_v1 = vmov 0.0   ;;  %s194_s0 = inlined_call_operand.vmem [shape: bf16[16,32], index: 0, kind: input, shape index: {}]   ;;  %s195_s1 = inlined_call_operand.vmem [shape: bf16[32,60], index: 1, kind: input, shape index: {}]   ;;  %s196_s2 = inlined_call_operand.vmem [shape: f32[1,60], index: 2, kind: input, shape index: {}]   ;;  %s197_s3 = inlined_call_operand.hbm [shape: f32[16,60], index: 3, kind: output, shape index: {}]  }
   0x1   :  { %v117_v0 = vld [vmem:[%s195_s1 + $0x8] sm:$0xff]  ;;  %21 = vst.msk [vmem:[#allocation2] sm:$0xff] %vm20_vm0, %v149_v1 }
   0x2   :  { %8 = vsyncpa [#allocation4], 0  ;;  %58 = vmatpush.bf16.msra.mxu0 %v117_v0  ;;  %v116_v2 = vld [vmem:[%s195_s1] sm:$0xff]  ;;  %22 = vst.msk [vmem:[#allocation2 + $0x8] sm:$0xff] %vm20_vm0, %v149_v1  ;;  %vm48_vm1 = vcmask 261120   ;;  %s90_s22 = sshll.u32 %s197_s3, 4  ;;  %s91_s22 = int_to_ptr.hbm [resolvable:$true] %s90_s22 }
   0x3   :  { %v115_v3 = vld [vmem:[%s194_s0] sm:$0xff]  ;;  %s150_s0 = smov [#allocation3]   ;;  %s152_s23 = smov 8  }
   0x4   :  { %v122_v8 = vld [vmem:[%s196_s2] ss:$0 sm:$0xff]  ;;  %s88_s1 = sshll.u32 %s150_s0, 4  ;;  %s151_s2 = smov 128   ;;  %s89_s1 = int_to_ptr.vmem [resolvable:$true] %s88_s1 }
   0x6   :  { %59 = vmatpush.bf16.msra.mxu0 %v116_v2 }
   0x8   :  { %v23_v4 = vld [vmem:[#allocation2] sm:$0xff] }
   0x9   :  { %114 = vmatmul.msk.bf16.vlgmr.msra.gmra.mxu0 %vm48_vm1, %v115_v3  ;;  %v24_v7 = vld [vmem:[#allocation2 + $0x8] sm:$0xff] }
  0x86   :  { %v61_v5 = vpop.f32.mrf.mxu0 }
  0x87   :  { %v66_v6 = vadd.f32 %v61_v5, %v23_v4 }
  0x89   :  { %69 = vst.msk [vmem:[#allocation2] sm:$0xff] %vm20_vm0, %v66_v6 }
  0x8e   :  { %v63_v9 = vpop.f32.mrf.mxu0 }
  0x8f   :  { %v67_v10 = vadd.f32 %v63_v9, %v24_v7 }
  0x90   :  { %v74_v11 = vld [vmem:[#allocation2] sm:$0xff] }
  0x91   :  { %70 = vst.msk [vmem:[#allocation2 + $0x8] sm:$0xff] %vm20_vm0, %v67_v10  ;;  %v80_v12 = vadd.f32 %v122_v8, %v74_v11 }
  0x93   :  { %82 = vst.msk [vmem:[#allocation3] sm:$0xff] %vm20_vm0, %v80_v12 }
  0x98   :  { %v75_v13 = vld [vmem:[#allocation2 + $0x8] sm:$0xff] }
  0x99   :  { %v81_v14 = vadd.f32 %v122_v8, %v75_v13 }
  0x9b   :  { %83 = vst.msk [vmem:[#allocation3 + $0x8] sm:$0xff] %vm20_vm0, %v81_v14 }
  0x9c   :  { %96 = dma.vmem_to_hbm [thread:$0]  %s89_s1, 256, %s91_s22, [#allocation4], %s151_s2, %s151_s2, %s152_s23  }
  0x9d   :  { %147 = dma.done.wait [#allocation4], 256  }
  0x9e   :  { %148 = vsyncadd [#allocation4], 4294967040 }
  0x9f   :  { %101 = vsyncpa [#allocation4], 1 }

// kernel: transformer_forward.45
= control target key start
LH: loop header
LB: loop body
LE: loop exit
PB: predicated region body
PF: predicated region fallthrough
CT: control target
= control target key end

     0   :  { %vm28_vm0 = vcmask 261120   ;;  %v225_v1 = vmov 0.0   ;;  %vm72_vm1 = vcmask 523264   ;;  %v226_v24 = vmov 32.0   ;;  %s303_s1 = inlined_call_operand.vmem [shape: bf16[64,32], index: 1, kind: input, shape index: {}]   ;;  %s304_s0 = inlined_call_operand.vmem [shape: bf16[16,64], index: 0, kind: input, shape index: {}]   ;;  %s305_s2 = inlined_call_operand.vmem [shape: f32[1,32], index: 2, kind: input, shape index: {}]   ;;  %s306_s3 = inlined_call_operand.vmem [shape: bf16[16,32], index: 3, kind: input, shape index: {}]   ;;  %s307_s4 = inlined_call_operand.vmem [shape: f32[1,32], index: 4, kind: input, shape index: {}]   ;;  %s308_s5 = inlined_call_operand.vmem [shape: f32[1,32], index: 5, kind: input, shape index: {}]   ;;  %s309_s6 = inlined_call_operand.vmem [shape: bf16[16,32], index: 6, kind: output, shape index: {}]  }
   0x1   :  { %v209_v0 = vld [vmem:[%s303_s1 + $0x18] sm:$0xff]  ;;  %29 = vst.msk [vmem:[#allocation2] sm:$0xff] %vm28_vm0, %v225_v1  ;;  %v208_v2 = vld [vmem:[%s303_s1 + $0x10] sm:$0xff]  ;;  %v207_v3 = vld [vmem:[%s303_s1 + $0x8] sm:$0xff]  ;;  %219 = vrcp.f32 %v226_v24  ;;  %vm177_vm7 = vcmask 257024  }
   0x2   :  { %30 = vst.msk [vmem:[#allocation2 + $0x8] sm:$0xff] %vm28_vm0, %v225_v1  ;;  %80 = vmatpush.bf16.msra.mxu0 %v209_v0  ;;  %v206_v4 = vld [vmem:[%s303_s1] sm:$0xff] }
   0x3   :  { %v205_v5 = vld [vmem:[%s304_s0] sm:$0xff] }
   0x4   :  { %v211_v10 = vld [vmem:[%s306_s3] sm:$0xff]  }
   0x5   :  { %v216_v11 = vld [vmem:[%s305_s2] ss:$0 sm:$0xff]  ;;  %v212_v14 = vunpack.c.l.bf16 %v211_v10  ;;  %v213_v19 = vunpack.c.h.bf16 %v211_v10 }
   0x6   :  { %81 = vmatpush.bf16.msra.mxu0 %v208_v2  ;;  %v217_v55 = vld [vmem:[%s307_s4] ss:$0 sm:$0xff] }
   0x7   :  { %v220_v25 = vpop.eup %219  ;;  %v218_v58 = vld [vmem:[%s308_s5] ss:$0 sm:$0xff] }
   0x8   :  { %v31_v6 = vld [vmem:[#allocation2] sm:$0xff]  ;;  %v119_v26 = vmul.f32 32.0, %v220_v25  ;;  %vm123_vm2 = vweird.f32 %v220_v25 }
   0x9   :  { %v32_v9 = vld [vmem:[#allocation2 + $0x8] sm:$0xff] }
   0xa   :  { %82 = vmatpush.bf16.msra.mxu0 %v207_v3  ;;  %v120_v27 = vsub.f32 1.0, %v119_v26 }
   0xc   :  { %v121_v28 = vmul.f32 %v220_v25, %v120_v27 }
   0xe   :  { %83 = vmatpush.bf16.msra.mxu0 %v206_v4  ;;  %v122_v29 = vadd.f32 %v220_v25, %v121_v28 }
  0x10   :  { %v124_v30 = vsel %vm123_vm2, %v220_v25, %v122_v29 }
  0x11   :  { %204 = vmatmul.msk.bf16.vlgmr.msra.gmra.mxu0 %vm72_vm1, %v205_v5 }
  0x8e   :  { %v85_v7 = vpop.f32.mrf.mxu0 }
  0x8f   :  { %v90_v8 = vadd.f32 %v85_v7, %v31_v6 }
  0x91   :  { %93 = vst.msk [vmem:[#allocation2] sm:$0xff] %vm28_vm0, %v90_v8 }
  0x96   :  { %v87_v12 = vpop.f32.mrf.mxu0 }
  0x97   :  { %v91_v13 = vadd.f32 %v87_v12, %v32_v9 }
  0x98   :  { %v98_v15 = vld [vmem:[#allocation2] sm:$0xff] }
  0x99   :  { %94 = vst.msk [vmem:[#allocation2 + $0x8] sm:$0xff] %vm28_vm0, %v91_v13  ;;  %v104_v16 = vadd.f32 %v216_v11, %v98_v15 }
  0x9b   :  { %v110_v17 = vadd.f32 %v212_v14, %v104_v16 }
  0x9d   :  { %v112_v18 = vsel %vm28_vm0, %v110_v17, 0.0 }
  0x9e   :  { %113 = vadd.xlane.f32.xlu0 %v112_v18 }
  0xa0   :  { %v99_v20 = vld [vmem:[#allocation2 + $0x8] sm:$0xff] }
  0xa1   :  { %v105_v21 = vadd.f32 %v216_v11, %v99_v20 }
  0xa3   :  { %v111_v22 = vadd.f32 %v213_v19, %v105_v21 }
  0xa5   :  { %v115_v23 = vsel %vm28_vm0, %v111_v22, 0.0 }
  0xa6   :  { %116 = vadd.xlane.f32.xlu0 %v115_v23 }
 0x111   :  { %v114_v31 = vpop.xlane.xlu0 %113 }
 0x112   :  { %v125_v32 = vmul.f32 %v124_v30, %v114_v31 }
 0x114   :  { %v127_v33 = vsub.f32 %v110_v17, %v125_v32 }
 0x116   :  { %v129_v34 = vmul.f32 %v127_v33, %v127_v33 }
 0x118   :  { %v131_v35 = vsel %vm28_vm0, %v129_v34, 0.0 }
 0x119   :  { %132 = vadd.xlane.f32.xlu1 %v131_v35  ;;  %v117_v36 = vpop.xlane.xlu0 %116 }
 0x11a   :  { %v126_v37 = vmul.f32 %v124_v30, %v117_v36 }
 0x11c   :  { %v128_v38 = vsub.f32 %v111_v22, %v126_v37 }
 0x11e   :  { %v130_v39 = vmul.f32 %v128_v38, %v128_v38 }
 0x120   :  { %v134_v40 = vsel %vm28_vm0, %v130_v39, 0.0 }
 0x121   :  { %135 = vadd.xlane.f32.xlu1 %v134_v40 }
 0x18c   :  { %v133_v41 = vpop.xlane.xlu1 %132 }
 0x18d   :  { %v137_v42 = vmul.f32 %v133_v41, %v124_v30 }
 0x18f   :  { %v139_v43 = vadd.f32 1e-05, %v137_v42 }
 0x191   :  { %221 = vrsqrt.f32 %v139_v43  ;;  %vm147_vm4 = vweird.f32 %v139_v43 }
 0x194   :  { %v136_v44 = vpop.xlane.xlu1 %135 }
 0x195   :  { %v138_v45 = vmul.f32 %v136_v44, %v124_v30 }
 0x197   :  { %v222_v46 = vpop.eup %221  ;;  %v140_v47 = vadd.f32 1e-05, %v138_v45 }
 0x198   :  { %v142_v48 = vmul.f32 %v222_v46, %v139_v43  ;;  %vm148_vm3 = vweird.f32 %v222_v46 }
 0x199   :  { %223 = vrsqrt.f32 %v140_v47  ;;  %vm149_vm5 = vmor %vm147_vm4, %vm148_vm3  ;;  %vm157_vm8 = vweird.f32 %v140_v47 }
 0x19a   :  { %v143_v49 = vmul.f32 %v222_v46, %v142_v48 }
 0x19c   :  { %v144_v50 = vmul.f32 0.5, %v143_v49 }
 0x19e   :  { %v145_v51 = vsub.f32 1.5, %v144_v50 }
 0x19f   :  { %v224_v52 = vpop.eup %223 }
 0x1a0   :  { %v146_v53 = vmul.f32 %v222_v46, %v145_v51  ;;  %v152_v54 = vmul.f32 %v224_v52, %v140_v47  ;;  %vm158_vm6 = vweird.f32 %v224_v52 }
 0x1a1   :  { %vm159_vm9 = vmor %vm157_vm8, %vm158_vm6 }
 0x1a2   :  { %v150_v56 = vsel %vm149_vm5, %v222_v46, %v146_v53  ;;  %v153_v57 = vmul.f32 %v224_v52, %v152_v54 }
 0x1a3   :  { %v161_v59 = vmul.f32 %v150_v56, %v127_v33 }
 0x1a4   :  { %v154_v60 = vmul.f32 0.5, %v153_v57 }
 0x1a5   :  { %v167_v61 = vmul.f32 %v217_v55, %v161_v59 }
 0x1a6   :  { %v155_v62 = vsub.f32 1.5, %v154_v60 }
 0x1a7   :  { %v173_v63 = vadd.f32 %v218_v58, %v167_v61 }
 0x1a8   :  { %v156_v0 = vmul.f32 %v224_v52, %v155_v62 }
 0x1a9   :  { %v175_v1 = vpack.c.bf16 %v173_v63, %v173_v63 }
 0x1aa   :  { %v160_v2 = vsel %vm159_vm9, %v224_v52, %v156_v0 }
 0x1ab   :  { %178 = vst.msk [vmem:[%s309_s6] sm:$0xf] %vm177_vm7, %v175_v1  ;;  %v162_v3 = vmul.f32 %v160_v2, %v128_v38 }
 0x1ad   :  { %v168_v4 = vmul.f32 %v217_v55, %v162_v3 }
 0x1af   :  { %v174_v5 = vadd.f32 %v218_v58, %v168_v4 }
 0x1b1   :  { %v176_v6 = vpack.c.bf16 %v174_v5, %v174_v5 }
 0x1b3   :  { %179 = vst.msk [vmem:[%s309_s6 + $0x4] sm:$0xf] %vm177_vm7, %v176_v6 }

// kernel: transformer_forward.56
= control target key start
LH: loop header
LB: loop body
LE: loop exit
PB: predicated region body
PF: predicated region fallthrough
CT: control target
= control target key end

     0   :  { %s1082_s18 = smov 0   ;;  %s1084_s19 = smov 0   ;;  %s1223_s0 = inlined_call_operand.vmem [shape: bf16[2,8,32], index: 0, kind: input, shape index: {}]   ;;  %s1224_s1 = inlined_call_operand.vmem [shape: bf16[2,8,32], index: 1, kind: input, shape index: {}]   ;;  %s1225_s2 = inlined_call_operand.vmem [shape: bf16[2,8,32], index: 2, kind: input, shape index: {}]   ;;  %s1226_s3 = inlined_call_operand.vmem [shape: f32[2,8,1], index: 3, kind: input, shape index: {}]   ;;  %s1227_s4 = inlined_call_operand.vmem [shape: f32[2,1,8], index: 4, kind: input, shape index: {}]   ;;  %s1228_s5 = inlined_call_operand.vmem [shape: bf16[2,8,32], index: 5, kind: output, shape index: {}]  }
   0x1   :  { %s1086_s20 = smov 0  }
   0x2 LB: > { %s34_s21 = sadd.s32 1, %s1037_s19  ;;  %p943_p0 = scmp.ge.s32.totalorder %s1041_s20, 1  ;;  %s1041_s20 = sphi %s1086_s20, %s15_s20   ;;  %s1037_s19 = sphi %s1084_s19, %s1232_s19   ;;  %s1033_s18 = sphi %s1082_s18, %s1231_s18  }
   0x3   : > { %p36_p1 = scmp.ge.s32.totalorder %s34_s21, 2  ;;  %p267_p2 = scmp.lt.s32.totalorder %s1041_s20, 3 }
   0x5   : > { %s1234_s21 = smov (%p36_p1, %s34_s21), 0  ;;  %p268_p3 = pnand %p943_p0, %p267_p2 }
   0x6   : > { %p326_p4 = scmp.lt.s32.totalorder (!%p268_p3), %s1033_s18, 1  ;;  %s1044_s8 = smov (!%p268_p3), 120  }
   0x7   : > { %271 = sbr.rel (%p268_p3) target bundleno = 1125 (0x465), region = 40  ;;  %s1045_s9 = smov (!%p268_p3), 112  }
   0x8   : > { %s1046_s10 = smov (!%p268_p3), 104   ;;  %s1049_s17 = smov (!%p268_p3), 8  }
   0xc   : > { %v1043_v0 = vmov 0   ;;  %s1236_s18 = smov (!%p326_p4, %s1033_s18), 1  ;;  %vm411_vm0 = vcmask 64512   ;;  %vm372_vm2 = vcmask 7168   ;;  %v1047_v10 = vmov -inf  }
   0xd   : > { %992 = vset.pattern.permute.xlu0 %v1043_v0  ;;  %993 = vset.pattern.permute.xlu1 %v1043_v0  ;;  %s1103_s22 = sshll.u32 %s1236_s18, 2  ;;  %s947_s23 = sshll.u32 %s1236_s18, 3  ;;  %373 = vst.msk [vmem:[#allocation2] sm:$0xff] %vm372_vm2, %v1047_v10  ;;  %v400_v15 = vlaneseq  ;;  %v1048_v27 = vmov 0.0   ;;  %vm468_vm9 = vcmask 1043456   ;;  %vm381_vm10 = vcmask 261120  }
   0xe   : > { %994 = vset.pattern.permute.xlu2 %v1043_v0  ;;  %s339_s26 = scalar_lea.vmem %s1224_s1, %s1103_s22  ;;  %s332_s29 = scalar_lea.vmem %s1223_s0, %s1103_s22  ;;  %374 = vst.msk [vmem:[#allocation2 + $0x8] sm:$0xff] %vm372_vm2, %v1047_v10  ;;  %vm581_vm11 = vcmask 130112   ;;  %vm668_vm12 = vcmask 195712   ;;  %vm755_vm13 = vcmask 261312   ;;  %vm803_vm14 = vcmask 257024  }
   0xf   : > { %v384_v1 = vld [vmem:[%s339_s26] sm:$0xf]  ;;  %s353_s7 = scalar_lea.vmem %s1226_s3, %s947_s23  ;;  %s359_s13 = scalar_lea.vmem %s1227_s4, %s1236_s18  ;;  %375 = vst.msk [vmem:[#allocation2 + $0x10] sm:$0xff] %vm372_vm2, %v1047_v10  ;;  %v401_v19 = vshrl.u32 %v400_v15, 7  ;;  %v406_v20 = vand.u32 127, %v400_v15 }
  0x10   : > { %v416_v2 = vsel %vm411_vm0, %v384_v1, 0  ;;  %v494_v3 = vunpack.c.l.b16 %v384_v1  ;;  %v383_v4 = vld [vmem:[%s332_s29] sm:$0xf]  ;;  %376 = vst.msk [vmem:[#allocation2 + $0x18] sm:$0xff] %vm372_vm2, %v1047_v10  ;;  %s346_s16 = scalar_lea.vmem %s1225_s2, %s1103_s22  ;;  %s1050_s18 = smov 24  }
  0x11   : > { %v388_v5 = vld [vmem:[%s353_s7] sm:$0xff]  ;;  %425 = vmatpush.bf16.xpose.msra.mxu0 %v416_v2  ;;  %v489_v6 = vunpack.c.l.b16 %v383_v4  ;;  %vm409_vm6 = vcmp.le.s32.totalorder %v406_v20, %v401_v19  ;;  %377 = vst.msk [vmem:[#allocation3] sm:$0xff] %vm372_vm2, %v1048_v27  ;;  %s1051_s23 = smov 16   ;;  %s366_s26 = scalar_lea.vmem %s1228_s5, %s1103_s22 }
  0x12   : > { %vm389_vm1 = vcmp.ne.f32.partialorder %v388_v5, 0.0  ;;  %v495_v7 = vpack.c.b16 %v494_v3, %v494_v3  ;;  %v386_v11 = vld [vmem:[%s359_s13] sm:$0x1]  ;;  %378 = vst.msk [vmem:[#allocation3 + $0x8] sm:$0xff] %vm372_vm2, %v1048_v27 }
  0x13   : > { %v393_v8 = vsel %vm389_vm1, 1, %v1043_v0  ;;  %v490_v9 = vpack.c.b16 %v489_v6, %v489_v6  ;;  %vm387_vm3 = vcmp.ne.f32.partialorder %v386_v11, 0.0  ;;  %379 = vst.msk [vmem:[#allocation3 + $0x10] sm:$0xff] %vm372_vm2, %v1048_v27  ;;  %v385_v36 = vld [vmem:[%s346_s16] sm:$0xf] }
  0x14   : > { %395 = vperm.xlu0 %992, %v393_v8   ;;  %496 = vrot.lane.b32.xlu1 %v495_v7, %s1044_s8  ;;  %v390_v14 = vsel %vm387_vm3, 1, %v1043_v0  ;;  %380 = vst.msk [vmem:[#allocation3 + $0x18] sm:$0xff] %vm372_vm2, %v1048_v27  ;;  %v433_v28 = vld [vmem:[#allocation2] sm:$0xff]  ;;  %v470_v38 = vsel %vm468_vm9, %v385_v36, 0  ;;  %v553_v40 = vunpack.c.l.b16 %v385_v36 }
  0x15   : > { %491 = vrot.lane.b32.xlu2 %v490_v9, %s1044_s8  ;;  %v391_v16 = vperm.slane %v390_v14, 0  ;;  %479 = vmatpush.bf16.msra.mxu1 %v470_v38  ;;  %382 = vst.msk [vmem:[#allocation4] sm:$0xff] %vm381_vm10, %v1048_v27  ;;  %v520_v50 = vld [vmem:[#allocation2 + $0x8] sm:$0xff] }
  0x16   : > { %v554_v41 = vpack.c.b16 %v553_v40, %v553_v40 }
  0x17   : > { %vm392_vm4 = vcmp.eq.s32.totalorder %v391_v16, 1  ;;  %v697_v15 = vld [vmem:[#allocation2 + $0x18] sm:$0xff] }
  0x18   : > { %949 = vmatmul.msk.bf16.vlgmr.msra.gmra.mxu0 %vm411_vm0, %v383_v4 }
  0x1c   : > { %v457_v62 = vld [vmem:[#allocation4] sm:$0xff] }
  0x1d   : > { %586 = vrot.lane.b32.xlu2 %v495_v7, %s1045_s9 }
  0x25   : > { %673 = vrot.lane.b32.xlu2 %v495_v7, %s1046_s10 }
  0x6f   : > { %v492_v17 = vpop.permute.xlu2 %491 }
  0x77   : > { %v587_v37 = vpop.permute.xlu2 %586 }
  0x78   : > { %v592_v39 = vsel %vm411_vm0, %v587_v37, 0 }
  0x79   : > { %601 = vmatpush.bf16.xpose.msrb.mxu1 %v592_v39 }
  0x7f   : > { %v674_v45 = vpop.permute.xlu2 %673 }
  0x80   : > { %v679_v46 = vsel %vm411_vm0, %v674_v45, 0 }
  0x81   : > { %688 = vmatpush.bf16.xpose.msrb.mxu0 %v679_v46 }
  0x86   : > { %v497_v12 = vpop.permute.xlu1 %496  ;;  %v396_v18 = vpop.permute.xlu0 %395 }
  0x87   : > { %v502_v13 = vsel %vm411_vm0, %v497_v12, 0  ;;  %vm397_vm5 = vcmp.eq.s32.totalorder %v396_v18, 1  ;;  %v610_v18 = vld [vmem:[#allocation2 + $0x10] sm:$0xff] }
  0x88   : > { %511 = vmatpush.bf16.xpose.msra.mxu2 %v502_v13  ;;  %vm398_vm7 = vmand %vm392_vm4, %vm397_vm5 }
  0x89   : > { %vm1133_vm8 = vmand %vm398_vm7, %vm409_vm6 }
  0x8f   : > { %951 = vmatmul.msk.bf16.vlgmr.msra.gmra.mxu2 %vm411_vm0, %v492_v17 }
  0x95   : > { %v427_v22 = vpop.f32.mrf.mxu0 }
  0x96   : > { %v431_v23 = vmul.f32 0.35355338, %v427_v22 }
  0x98   : > { %v432_v24 = vsel %vm1133_vm8, %v431_v23, -1e+20 }
  0x99   : > { %v434_v25 = vsel %vm411_vm0, %v432_v24, -inf }
  0x9a   : > { %435 = vmax.xlane.f32.xlu0 %v434_v25 }
  0x9d   : > { %v429_v26 = vpop.f32.mrf.mxu0 }
 0x10d   : > { %v436_v29 = vpop.xlane.xlu0 %435 }
 0x10e   : > { %v437_v30 = vmax.f32 %v433_v28, %v436_v29 }
 0x110   : > { %487 = vst.msk [vmem:[#allocation2] sm:$0xff] %vm372_vm2, %v437_v30  ;;  %443 = vperm.xlu1 %993, %v437_v30   ;;  %v438_v42 = vsub.f32 %v433_v28, %v437_v30 }
 0x112   : > { %v513_v31 = vpop.f32.mrf.mxu2  ;;  %v439_v43 = vmul.f32 1.442695, %v438_v42 }
 0x113   : > { %v517_v32 = vmul.f32 0.35355338, %v513_v31 }
 0x114   : > { %995 = vpow2.f32 %v439_v43 }
 0x115   : > { %v1147_v33 = vsel %vm1133_vm8, %v517_v32, -1e+20 }
 0x116   : > { %v521_v34 = vsel %vm411_vm0, %v1147_v33, -inf }
 0x117   : > { %522 = vmax.xlane.f32.xlu2 %v521_v34 }
 0x118   : > { %584 = vrot.lane.b32.xlu1 %v490_v9, %s1045_s9 }
 0x11a   : > { %v515_v35 = vpop.f32.mrf.mxu2  ;;  %v1161_v44 = vpop.eup %995 }
 0x120   : > { %671 = vrot.lane.b32.xlu1 %v490_v9, %s1046_s10 }
 0x12f   : > { %555 = vrot.lane.b32.xlu2 %v554_v41, %s1044_s8 }
 0x137   : > { %729 = vrot.lane.b32.xlu2 %v554_v41, %s1046_s10 }
 0x13f   : > { %460 = vperm.xlu2 %994, %v1161_v44  }
 0x182   : > { %v444_v47 = vpop.permute.xlu1 %443 }
 0x183   : > { %v446_v48 = vsub.f32 %v432_v24, %v444_v47 }
 0x185   : > { %v447_v49 = vmul.f32 1.442695, %v446_v48 }
 0x187   : > { %997 = vpow2.f32 %v447_v49  ;;  %v449_v49 = vld [vmem:[#allocation3] sm:$0xff] }
 0x18a   : > { %v523_v51 = vpop.xlane.xlu2 %522  ;;  %v585_v52 = vpop.permute.xlu1 %584 }
 0x18b   : > { %v524_v53 = vmax.f32 %v520_v50, %v523_v51 }
 0x18d   : > { %v998_v54 = vpop.eup %997  ;;  %v525_v55 = vsub.f32 %v520_v50, %v524_v53  ;;  %583 = vst.msk [vmem:[#allocation2 + $0x8] sm:$0xff] %vm372_vm2, %v524_v53  ;;  %v450_v50 = vmul.f32 %v1161_v44, %v449_v49 }
 0x18e   : > { %v464_v56 = vpack.c.bf16 %v998_v54, %v998_v54  ;;  %v451_v26 = vsel %vm411_vm0, %v998_v54, 0.0  ;;  %v537_v54 = vld [vmem:[#allocation3 + $0x8] sm:$0xff] }
 0x18f   : > { %v526_v57 = vmul.f32 1.442695, %v525_v55 }
 0x190   : > { %950 = vmatmul.msk.bf16.vlgmr.msra.gmra.mxu1 %vm411_vm0, %v464_v56 }
 0x191   : > { %999 = vpow2.f32 %v526_v57 }
 0x192   : > { %v672_v58 = vpop.permute.xlu1 %671  ;;  %v556_v60 = vpop.permute.xlu2 %555 }
 0x193   : > { %955 = vmatmul.msk.bf16.vlgmr.msrb.gmra.mxu0 %vm411_vm0, %v672_v58  ;;  %v561_v14 = vsel %vm468_vm9, %v556_v60, 0 }
 0x194   : > { %570 = vmatpush.bf16.msra.mxu3 %v561_v14  ;;  %v627_v14 = vld [vmem:[#allocation3 + $0x10] sm:$0xff] }
 0x197   : > { %v1168_v59 = vpop.eup %999 }
 0x198   : > { %547 = vperm.xlu2 %994, %v1168_v59   ;;  %v538_v57 = vmul.f32 %v1168_v59, %v537_v54 }
 0x19a   : > { %v730_v61 = vpop.permute.xlu2 %729 }
 0x19b   : > { %v735_v34 = vsel %vm468_vm9, %v730_v61, 0 }
 0x19c   : > { %744 = vmatpush.bf16.msrb.mxu2 %v735_v34 }
 0x1a0   : > { %953 = vmatmul.msk.bf16.vlgmr.msrb.gmra.mxu1 %vm411_vm0, %v585_v52 }
 0x1a2   : > { %v461_v63 = vpop.permute.xlu2 %460 }
 0x1a3   : > { %v463_v0 = vmul.f32 %v461_v63, %v457_v62 }
 0x20d   : > { %v481_v1 = vpop.f32.mrf.mxu1 }
 0x20e   : > { %v485_v2 = vadd.f32 %v481_v1, %v463_v0  ;;  %v714_v0 = vld [vmem:[#allocation3 + $0x18] sm:$0xff] }
 0x210   : > { %486 = vst.msk [vmem:[#allocation4] sm:$0xff] %vm411_vm0, %v485_v2  ;;  %v690_v3 = vpop.f32.mrf.mxu0 }
 0x211   : > { %v694_v4 = vmul.f32 0.35355338, %v690_v3 }
 0x213   : > { %v695_v5 = vsel %vm1133_vm8, %v694_v4, -1e+20  ;;  %v548_v4 = vpop.permute.xlu2 %547 }
 0x214   : > { %v698_v6 = vsel %vm411_vm0, %v695_v5, -inf }
 0x215   : > { %v483_v7 = vpop.f32.mrf.mxu1  ;;  %699 = vmax.xlane.f32.xlu0 %v698_v6 }
 0x217   : > { %v544_v59 = vld [vmem:[#allocation4] sm:$0xff] }
 0x218   : > { %v692_v8 = vpop.f32.mrf.mxu0 }
 0x21d   : > { %v603_v9 = vpop.f32.mrf.mxu1 }
 0x21e   : > { %v607_v10 = vmul.f32 0.35355338, %v603_v9 }
 0x220   : > { %v608_v11 = vsel %vm1133_vm8, %v607_v10, -1e+20 }
 0x221   : > { %v611_v12 = vsel %vm411_vm0, %v608_v11, -inf }
 0x222   : > { %612 = vmax.xlane.f32.xlu1 %v611_v12 }
 0x225   : > { %v605_v13 = vpop.f32.mrf.mxu1 }
 0x229   : > { %530 = vperm.xlu0 %992, %v524_v53  }
 0x231   : > { %642 = vrot.lane.b32.xlu0 %v554_v41, %s1045_s9 }
 0x288   : > { %v700_v16 = vpop.xlane.xlu0 %699 }
 0x289   : > { %v701_v17 = vmax.f32 %v697_v15, %v700_v16 }
 0x28b   : > { %757 = vst.msk [vmem:[#allocation2 + $0x18] sm:$0xff] %vm372_vm2, %v701_v17  ;;  %707 = vperm.xlu0 %992, %v701_v17   ;;  %v702_v30 = vsub.f32 %v697_v15, %v701_v17 }
 0x28d   : > { %v703_v31 = vmul.f32 1.442695, %v702_v30 }
 0x295   : > { %v613_v19 = vpop.xlane.xlu1 %612 }
 0x296   : > { %v614_v20 = vmax.f32 %v610_v18, %v613_v19 }
 0x298   : > { %670 = vst.msk [vmem:[#allocation2 + $0x10] sm:$0xff] %vm372_vm2, %v614_v20  ;;  %620 = vperm.xlu1 %993, %v614_v20   ;;  %v615_v27 = vsub.f32 %v610_v18, %v614_v20 }
 0x29a   : > { %v616_v28 = vmul.f32 1.442695, %v615_v27 }
 0x29b   : > { %v531_v21 = vpop.permute.xlu0 %530 }
 0x29c   : > { %v533_v22 = vsub.f32 %v1147_v33, %v531_v21 }
 0x29e   : > { %v534_v23 = vmul.f32 1.442695, %v533_v22 }
 0x2a0   : > { %1001 = vpow2.f32 %v534_v23 }
 0x2a1   : > { %1003 = vpow2.f32 %v616_v28 }
 0x2a2   : > { %1005 = vpow2.f32 %v703_v31 }
 0x2a3   : > { %v643_v35 = vpop.permute.xlu0 %642 }
 0x2a4   : > { %v648_v36 = vsel %vm468_vm9, %v643_v35, 0 }
 0x2a5   : > { %657 = vmatpush.bf16.msrb.mxu3 %v648_v36 }
 0x2a6   : > { %v1002_v24 = vpop.eup %1001 }
 0x2a7   : > { %v551_v25 = vpack.c.bf16 %v1002_v24, %v1002_v24  ;;  %v539_v29 = vsel %vm411_vm0, %v1002_v24, 0.0  ;;  %v1187_v32 = vpop.eup %1003 }
 0x2a8   : > { %v1006_v33 = vpop.eup %1005  ;;  %v628_v15 = vmul.f32 %v1187_v32, %v627_v14 }
 0x2a9   : > { %952 = vmatmul.msk.bf16.vlgmr.msra.gmra.mxu3 %vm411_vm0, %v551_v25  ;;  %v715_v1 = vmul.f32 %v1006_v33, %v714_v0 }
 0x2b5   : > { %452 = vadd.xlane.f32.xlu0 %v451_v26 }
 0x2c2   : > { %540 = vadd.xlane.f32.xlu1 %v539_v29 }
 0x2c9   : > { %637 = vperm.xlu0 %992, %v1187_v32  }
 0x2d1   : > { %724 = vperm.xlu0 %992, %v1006_v33  }
 0x2fd   : > { %v708_v37 = vpop.permute.xlu0 %707 }
 0x2fe   : > { %v710_v38 = vsub.f32 %v695_v5, %v708_v37  ;;  %v550_v5 = vmul.f32 %v548_v4, %v544_v59 }
 0x300   : > { %v711_v39 = vmul.f32 1.442695, %v710_v38 }
 0x302   : > { %1007 = vpow2.f32 %v711_v39 }
 0x308   : > { %v1008_v40 = vpop.eup %1007 }
 0x309   : > { %v716_v41 = vsel %vm411_vm0, %v1008_v40, 0.0  ;;  %v728_v42 = vpack.c.bf16 %v1008_v40, %v1008_v40 }
 0x30a   : > { %v621_v43 = vpop.permute.xlu1 %620  ;;  %717 = vadd.xlane.f32.xlu1 %v716_v41 }
 0x30b   : > { %v623_v45 = vsub.f32 %v608_v11, %v621_v43  ;;  %956 = vmatmul.msk.bf16.vlgmr.msrb.gmra.mxu2 %vm411_vm0, %v728_v42 }
 0x30d   : > { %v624_v46 = vmul.f32 1.442695, %v623_v45 }
 0x30f   : > { %1009 = vpow2.f32 %v624_v46 }
 0x315   : > { %v1010_v47 = vpop.eup %1009 }
 0x316   : > { %v641_v48 = vpack.c.bf16 %v1010_v47, %v1010_v47  ;;  %v629_v63 = vsel %vm411_vm0, %v1010_v47, 0.0 }
 0x318   : > { %954 = vmatmul.msk.bf16.vlgmr.msrb.gmra.mxu3 %vm411_vm0, %v641_v48 }
 0x328   : > { %v453_v51 = vpop.xlane.xlu0 %452 }
 0x329   : > { %v454_v52 = vadd.f32 %v453_v51, %v450_v50 }
 0x32b   : > { %456 = vst.msk [vmem:[#allocation3] sm:$0xff] %vm372_vm2, %v454_v52 }
 0x32c   : > { %v572_v53 = vpop.f32.mrf.mxu3 }
 0x32d   : > { %577 = vrot.lane.b32.xlu2 %v572_v53, %s1049_s17 }
 0x332   : > { %v762_v55 = vld [vmem:[#allocation3] sm:$0xff] }
 0x333   : > { %1011 = vrcp.f32 %v762_v55 }
 0x334   : > { %v574_v56 = vpop.f32.mrf.mxu3 }
 0x335   : > { %v541_v58 = vpop.xlane.xlu1 %540 }
 0x336   : > { %v542_v60 = vadd.f32 %v541_v58, %v538_v57 }
 0x338   : > { %543 = vst.msk [vmem:[#allocation3 + $0x8] sm:$0xff] %vm372_vm2, %v542_v60 }
 0x339   : > { %v1012_v61 = vpop.eup %1011 }
 0x33a   : > { %766 = vperm.xlu0 %992, %v1012_v61  }
 0x33b   : > { %v638_v21 = vpop.permute.xlu0 %637 }
 0x33f   : > { %v772_v44 = vld [vmem:[#allocation3 + $0x8] sm:$0xff] }
 0x340   : > { %1013 = vrcp.f32 %v772_v44 }
 0x343   : > { %v725_v25 = vpop.permute.xlu0 %724 }
 0x346   : > { %v1014_v62 = vpop.eup %1013 }
 0x347   : > { %776 = vperm.xlu0 %992, %v1014_v62  }
 0x356   : > { %630 = vadd.xlane.f32.xlu2 %v629_v63 }
 0x37d   : > { %v718_v2 = vpop.xlane.xlu1 %717 }
 0x37e   : > { %v719_v3 = vadd.f32 %v718_v2, %v715_v1 }
 0x380   : > { %720 = vst.msk [vmem:[#allocation3 + $0x18] sm:$0xff] %vm372_vm2, %v719_v3 }
 0x387   : > { %v578_v6 = vpop.permute.xlu2 %577  ;;  %v792_v7 = vld [vmem:[#allocation3 + $0x18] sm:$0xff] }
 0x388   : > { %v580_v8 = vadd.f32 %v578_v6, %v550_v5  ;;  %1015 = vrcp.f32 %v792_v7 }
 0x38a   : > { %582 = vst.msk [vmem:[#allocation4] sm:$0xff] %vm581_vm11, %v580_v8 }
 0x38e   : > { %v1016_v9 = vpop.eup %1015  ;;  %v746_v10 = vpop.f32.mrf.mxu2 }
 0x38f   : > { %751 = vrot.lane.b32.xlu2 %v746_v10, %s1050_s18  ;;  %796 = vperm.xlu0 %992, %v1016_v9  }
 0x391   : > { %v634_v20 = vld [vmem:[#allocation4] sm:$0xff] }
 0x392   : > { %v640_v22 = vmul.f32 %v638_v21, %v634_v20 }
 0x396   : > { %v748_v11 = vpop.f32.mrf.mxu2 }
 0x39b   : > { %v659_v12 = vpop.f32.mrf.mxu3 }
 0x39c   : > { %664 = vrot.lane.b32.xlu1 %v659_v12, %s1051_s23 }
 0x3a3   : > { %v661_v13 = vpop.f32.mrf.mxu3 }
 0x3ac   : > { %v767_v30 = vpop.permute.xlu0 %766 }
 0x3b9   : > { %v777_v33 = vpop.permute.xlu0 %776 }
 0x3c9   : > { %v631_v16 = vpop.xlane.xlu2 %630 }
 0x3ca   : > { %v632_v17 = vadd.f32 %v631_v16, %v628_v15 }
 0x3cc   : > { %633 = vst.msk [vmem:[#allocation3 + $0x10] sm:$0xff] %vm372_vm2, %v632_v17 }
 0x3d3   : > { %v782_v18 = vld [vmem:[#allocation3 + $0x10] sm:$0xff] }
 0x3d4   : > { %1017 = vrcp.f32 %v782_v18 }
 0x3da   : > { %v1018_v19 = vpop.eup %1017 }
 0x3db   : > { %786 = vperm.xlu1 %993, %v1018_v19  }
 0x3e9   : > { %v752_v28 = vpop.permute.xlu2 %751 }
 0x401   : > { %v797_v39 = vpop.permute.xlu0 %796 }
 0x40e   : > { %v665_v23 = vpop.permute.xlu1 %664 }
 0x40f   : > { %v667_v24 = vadd.f32 %v665_v23, %v640_v22 }
 0x411   : > { %669 = vst.msk [vmem:[#allocation4] sm:$0xff] %vm668_vm12, %v667_v24 }
 0x418   : > { %v721_v26 = vld [vmem:[#allocation4] sm:$0xff] }
 0x419   : > { %v727_v27 = vmul.f32 %v725_v25, %v721_v26 }
 0x41b   : > { %v754_v29 = vadd.f32 %v752_v28, %v727_v27 }
 0x41d   : > { %756 = vst.msk [vmem:[#allocation4] sm:$0xff] %vm755_vm13, %v754_v29 }
 0x424   : > { %v761_v31 = vld [vmem:[#allocation4] sm:$0xff] }
 0x425   : > { %v769_v32 = vmul.f32 %v767_v30, %v761_v31 }
 0x427   : > { %770 = vst.msk [vmem:[#allocation4] sm:$0xff] %vm411_vm0, %v769_v32 }
 0x42e   : > { %v771_v34 = vld [vmem:[#allocation4] sm:$0xff] }
 0x42f   : > { %v779_v35 = vmul.f32 %v777_v33, %v771_v34 }
 0x431   : > { %780 = vst.msk [vmem:[#allocation4] sm:$0xff] %vm581_vm11, %v779_v35 }
 0x438   : > { %v781_v37 = vld [vmem:[#allocation4] sm:$0xff] }
 0x44d   : > { %v787_v36 = vpop.permute.xlu1 %786 }
 0x44e   : > { %v789_v38 = vmul.f32 %v787_v36, %v781_v37 }
 0x450   : > { %790 = vst.msk [vmem:[#allocation4] sm:$0xff] %vm668_vm12, %v789_v38 }
 0x457   : > { %v791_v40 = vld [vmem:[#allocation4] sm:$0xff] }
 0x458   : > { %v799_v41 = vmul.f32 %v797_v39, %v791_v40 }
 0x45a   : > { %800 = vst.msk [vmem:[#allocation4] sm:$0xff] %vm755_vm13, %v799_v41 }
 0x461   : > { %v801_v42 = vld [vmem:[#allocation4] sm:$0xff] }
 0x462   : > { %v802_v43 = vpack.c.bf16 %v801_v42, %v801_v42 }
 0x464   : > { %804 = vst.msk [vmem:[%s366_s26] sm:$0xf] %vm803_vm14, %v802_v43 }
 0x465 PF: > { %s15_s20 = sadd.s32 1, %s1041_s20   ;;  %s1231_s18 = smov %s1037_s19 }
 0x466   : > { %p12_p5 = scmp.ge.s32.totalorder %s15_s20, 4   ;;  %s1232_s19 = smov %s1234_s21 }
 0x468   :  { %14 = sbr.rel (!%p12_p5) target bundleno = 2 (0x2), region = 96 }

</bundles_post_ra>
